<compile_context>
chip_gen: v7x
topology: tpu7x:2x2x1
jax: 0.10.0
libtpu: 0.0.40
codegen_flags: <defaults>
</compile_context>

<pallas_src>
import functools

import jax
import jax.numpy as jnp
from jax import lax
from jax.experimental import pallas as pl
from jax.experimental.pallas import tpu as pltpu


# ----------------------------- kernel helpers -----------------------------

def _layernorm(x, gamma, beta, eps=1e-8):
    # PyTorch LayerNorm over last dim, biased variance, eps=1e-8 (f32 math).
    mean = jnp.mean(x, axis=-1, keepdims=True)
    var = jnp.mean(jnp.square(x - mean), axis=-1, keepdims=True)
    return (x - mean) * lax.rsqrt(var + eps) * gamma + beta


# ------------------------------ fused kernel -------------------------------

def fused_sasrec_kernel(emb_ref, mask_ref, causal_ref, lastln_ref, ln_ref,
                        bqkv_ref, bias2_ref, wqkv_ref, wo_ref, wff_ref,
                        out_ref, *, num_blocks, num_heads):
    """embed -> all transformer blocks -> final LayerNorm, for one batch block.

    emb_ref   : (Bt*T, D) f32   item_emb*sqrt(D) + pos_emb (pre-gathered on host)
    mask_ref  : (Bt*T, 1) f32   timeline mask (pos != 0)
    causal_ref: (T, T)    f32   additive causal bias (0 / -1e30), VMEM-resident
    lastln_ref: (2, D)    f32   [gamma; beta] of the last LayerNorm
    ln_ref    : (L, 4, D) f32   [ln1_g, ln1_b, ln2_g, ln2_b] per block
    bqkv_ref  : (L, 3, H, 1, hd) f32  per-head q/k/v biases (q pre-scaled)
    bias2_ref : (L, 3, D) f32   [bo, b1, b2] per block
    wqkv_ref  : (L, 3, H, D, hd) bf16 per-head q/k/v projections (q pre-scaled)
    wo_ref    : (L, H, hd, D) bf16    per-head slices of the output projection
    wff_ref   : (L, 2, D, D) bf16     [w1, w2] of the point-wise FFN
    """
    M, D = emb_ref.shape                  # M = Bt * T  (merged batch-rows slab)
    T = causal_ref.shape[0]
    Bt = M // T
    H = num_heads
    hd = wqkv_ref.shape[-1]

    tmask = mask_ref[...]                 # (M, 1), lane-broadcasts for free
    causal = causal_ref[...]              # (T, T) finite additive bias

    # Embedding sum (item table pre-scaled by sqrt(D)) * timeline mask.
    x = emb_ref[...] * tmask              # (M, D) f32 residual stream

    for blk in range(num_blocks):         # static unroll over transformer blocks
        # ---------------- multi-head self-attention (pre-LN on Q path) --------
        nrm = _layernorm(x, ln_ref[blk, 0:1, :], ln_ref[blk, 1:2, :])
        nrm_b = nrm.astype(jnp.bfloat16)
        x_b = x.astype(jnp.bfloat16)

        attn = None
        for h in range(H):                # static unroll; weights pre-sliced per
            # head on the host, so there is no lane-offset slicing in-kernel.
            q = (jnp.dot(nrm_b, wqkv_ref[blk, 0, h],
                         preferred_element_type=jnp.float32)
                 + bqkv_ref[blk, 0, h])                      # (M, hd), 1/sqrt(hd) folded
            k = (jnp.dot(x_b, wqkv_ref[blk, 1, h],
                         preferred_element_type=jnp.float32)
                 + bqkv_ref[blk, 1, h])
            v = (jnp.dot(x_b, wqkv_ref[blk, 2, h],
                         preferred_element_type=jnp.float32)
                 + bqkv_ref[blk, 2, h])

            q3 = q.reshape(Bt, T, hd).astype(jnp.bfloat16)
            k3 = k.reshape(Bt, T, hd).astype(jnp.bfloat16)
            v3 = v.reshape(Bt, T, hd).astype(jnp.bfloat16)

            # Scores and softmax stay in f32; causal bias is finite so a row can
            # never produce NaN via (-inf) - (-inf).
            s = jnp.einsum("bqd,bkd->bqk", q3, k3,
                           preferred_element_type=jnp.float32)   # (Bt, T, T)
            s = s + causal
            s = s - jnp.max(s, axis=-1, keepdims=True)
            p = jnp.exp(s)
            p = p * pl.reciprocal(jnp.sum(p, axis=-1, keepdims=True), approx=True)

            head = jnp.einsum("bqk,bkd->bqd", p.astype(jnp.bfloat16), v3,
                              preferred_element_type=jnp.float32)  # (Bt, T, hd)
            # Head concat is avoided by accumulating through Wo's head slice.
            piece = jnp.dot(head.reshape(M, hd).astype(jnp.bfloat16),
                            wo_ref[blk, h],
                            preferred_element_type=jnp.float32)    # (M, D)
            attn = piece if attn is None else attn + piece
        attn = attn + bias2_ref[blk, 0:1, :]

        # Residual with the *normalized* query input (matches the reference).
        h1 = nrm + attn

        # ---------------- point-wise FFN + residual, then timeline mask -------
        h2 = _layernorm(h1, ln_ref[blk, 2:3, :], ln_ref[blk, 3:4, :])
        ff = (jnp.dot(h2.astype(jnp.bfloat16), wff_ref[blk, 0],
                      preferred_element_type=jnp.float32)
              + bias2_ref[blk, 1:2, :])
        ff = jnp.maximum(ff, 0.0)
        ff = (jnp.dot(ff.astype(jnp.bfloat16), wff_ref[blk, 1],
                      preferred_element_type=jnp.float32)
              + bias2_ref[blk, 2:3, :])
        x = (ff + h2) * tmask

    out_ref[...] = _layernorm(x, lastln_ref[0:1, :], lastln_ref[1:2, :])


# -------------------------------- wrapper ----------------------------------

def _pick_block_rows(batch, seq_len):
    """Batch rows per grid step.  Two grid steps keep both v7x TensorCores busy
    while Bt*T rows per step amortise per-step overhead; capped so activation
    slabs stay comfortably inside VMEM."""
    if batch <= 1:
        return 1
    bt = pl.cdiv(batch, 2)
    return max(1, min(bt, max(1, 4096 // seq_len)))


def sasrec_forward(seq, pos, prepared, block_rows=None):
    item_emb = prepared["item_emb"]           # (num_items, D), pre-scaled by sqrt(D)
    pos_emb = prepared["pos_emb"]             # (max_len + 1, D)
    L = prepared["num_blocks"]
    H = prepared["num_heads"]
    B, T = seq.shape
    D = item_emb.shape[1]

    bt = block_rows if block_rows is not None else _pick_block_rows(B, T)
    nb = pl.cdiv(B, bt)
    Bp = nb * bt                              # padded batch (multiple of bt)

    # TODO(synk): data-dependent embedding gathers stay in plain JAX (no clean
    # in-kernel equivalent without a manual DMA gather at these tiny sizes).
    x0 = jnp.take(item_emb, seq, axis=0) + jnp.take(pos_emb, pos, axis=0)  # (B,T,D)
    tmask = (pos != 0).astype(jnp.float32)[:, :, None]                     # (B,T,1)
    if Bp != B:
        x0 = jnp.pad(x0, ((0, Bp - B), (0, 0), (0, 0)))
        tmask = jnp.pad(tmask, ((0, Bp - B), (0, 0), (0, 0)))
    x0 = x0.reshape(Bp * T, D).astype(jnp.float32)
    tmask = tmask.reshape(Bp * T, 1)

    # Finite additive causal bias, host-precomputed and VMEM-resident.
    causal = jnp.triu(jnp.full((T, T), -1e30, dtype=jnp.float32), k=1)

    consts = [causal, prepared["last_ln"], prepared["ln"], prepared["bqkv"],
              prepared["bias2"], prepared["wqkv"], prepared["wo"], prepared["wff"]]
    inputs = [x0, tmask, *consts]

    kernel = functools.partial(fused_sasrec_kernel, num_blocks=L, num_heads=H)

    def build(single_buffer_weights):
        def const_spec(a):
            nd = a.ndim
            kwargs = {}
            if single_buffer_weights:
                # Constant index map -> the block never changes; one buffer is
                # enough and halves the resident-weight footprint (v7x VMEM).
                kwargs["pipeline_mode"] = pl.Buffered(1)
            return pl.BlockSpec(a.shape, lambda b, _nd=nd: (0,) * _nd, **kwargs)

        in_specs = [pl.BlockSpec((bt * T, D), lambda b: (b, 0)),
                    pl.BlockSpec((bt * T, 1), lambda b: (b, 0))]
        in_specs += [const_spec(a) for a in consts]

        # Explicit VMEM budget: resident weights (x buffer count) + pipelined
        # activation blocks + compiler headroom, capped for v7x's 64 MiB.
        wbuf = 1 if single_buffer_weights else 2
        const_bytes = sum(int(a.size) * a.dtype.itemsize for a in consts)
        act_bytes = bt * T * D * 4 * 2            # input + output blocks (f32)
        mask_bytes = bt * T * 4
        vmem_limit = int(min(64 << 20,
                             const_bytes * wbuf + (act_bytes + mask_bytes) * 2
                             + (12 << 20)))

        return pl.pallas_call(
            kernel,
            out_shape=jax.ShapeDtypeStruct((Bp * T, D), jnp.float32),
            grid=(nb,),
            in_specs=in_specs,
            out_specs=pl.BlockSpec((bt * T, D), lambda b: (b, 0)),
            compiler_params=pltpu.CompilerParams(
                dimension_semantics=("parallel",),
                vmem_limit_bytes=vmem_limit),
        )

    try:
        out = build(single_buffer_weights=True)(*inputs)
    except Exception:
        # This jax build rejected pl.Buffered(1); default double-buffering is
        # correct (just a larger weight footprint), so fall back transparently.
        out = build(single_buffer_weights=False)(*inputs)

    return out.reshape(Bp, T, D)[:B]


# ----------------------------- parameter init ------------------------------

def xavier_uniform(key, shape):
    fan_in, fan_out = shape[-2], shape[-1]
    limit = (6.0 / (fan_in + fan_out)) ** 0.5
    return jax.random.uniform(key, shape, jnp.float32, -limit, limit)


def init_params(key, num_items, embed_dim, n_blocks, n_heads, max_len):
    """Raw parameters (weights stored (in, out)), mirroring the PyTorch module."""
    keys = iter(jax.random.split(key, 64))
    D = embed_dim
    params = {
        "num_heads": n_heads,
        "item_emb": xavier_uniform(next(keys), (num_items, D)),
        "pos_emb": xavier_uniform(next(keys), (max_len + 1, D)),
        "last_ln_g": jnp.ones((1, D), jnp.float32),
        "last_ln_b": jnp.zeros((1, D), jnp.float32),
        "blocks": [],
    }
    for _ in range(n_blocks):
        params["blocks"].append({
            "ln1_g": jnp.ones((1, D), jnp.float32),
            "ln1_b": jnp.zeros((1, D), jnp.float32),
            "wq": xavier_uniform(next(keys), (D, D)),
            "bq": jnp.zeros((1, D), jnp.float32),
            "wk": xavier_uniform(next(keys), (D, D)),
            "bk": jnp.zeros((1, D), jnp.float32),
            "wv": xavier_uniform(next(keys), (D, D)),
            "bv": jnp.zeros((1, D), jnp.float32),
            "wo": xavier_uniform(next(keys), (D, D)),
            "bo": jnp.zeros((1, D), jnp.float32),
            "ln2_g": jnp.ones((1, D), jnp.float32),
            "ln2_b": jnp.zeros((1, D), jnp.float32),
            "w1": xavier_uniform(next(keys), (D, D)),
            "b1": jnp.zeros((1, D), jnp.float32),
            "w2": xavier_uniform(next(keys), (D, D)),
            "b2": jnp.zeros((1, D), jnp.float32),
        })
    return params


def prepare_params(params):
    """One-time host-side folding / re-layout:
       * item_emb *= sqrt(D);  wq, bq *= 1/sqrt(head_dim)
       * per-head slices of Wq/Wk/Wv/Wo pre-cut and stacked (no in-kernel
         lane-offset slicing);  matmul weights cast to bf16
       * all per-block params collapsed into a handful of stacked tensors."""
    D = params["item_emb"].shape[1]
    H = params["num_heads"]
    hd = D // H
    L = len(params["blocks"])
    q_scale = 1.0 / (hd ** 0.5)

    def per_head_cols(w):      # (D, D) -> (H, D, hd): head h = columns h*hd:(h+1)*hd
        return jnp.transpose(w.reshape(D, H, hd), (1, 0, 2))

    ln, bqkv, bias2, wqkv, wo, wff = [], [], [], [], [], []
    for b in params["blocks"]:
        ln.append(jnp.stack([b["ln1_g"][0], b["ln1_b"][0],
                             b["ln2_g"][0], b["ln2_b"][0]]))              # (4, D)
        bqkv.append(jnp.stack([(b["bq"][0] * q_scale).reshape(H, 1, hd),
                               b["bk"][0].reshape(H, 1, hd),
                               b["bv"][0].reshape(H, 1, hd)]))            # (3, H, 1, hd)
        bias2.append(jnp.stack([b["bo"][0], b["b1"][0], b["b2"][0]]))     # (3, D)
        wqkv.append(jnp.stack([per_head_cols(b["wq"] * q_scale),
                               per_head_cols(b["wk"]),
                               per_head_cols(b["wv"])]))                  # (3, H, D, hd)
        wo.append(b["wo"].reshape(H, hd, D))                              # (H, hd, D)
        wff.append(jnp.stack([b["w1"], b["w2"]]))                         # (2, D, D)

    return {
        "num_heads": H,
        "num_blocks": L,
        "item_emb": params["item_emb"] * (float(D) ** 0.5),
        "pos_emb": params["pos_emb"],
        "last_ln": jnp.concatenate([params["last_ln_g"],
                                    params["last_ln_b"]], axis=0),        # (2, D)
        "ln": jnp.stack(ln),                                              # (L, 4, D) f32
        "bqkv": jnp.stack(bqkv),                                          # (L, 3, H, 1, hd) f32
        "bias2": jnp.stack(bias2),                                        # (L, 3, D) f32
        "wqkv": jnp.stack(wqkv).astype(jnp.bfloat16),                     # (L, 3, H, D, hd)
        "wo": jnp.stack(wo).astype(jnp.bfloat16),                         # (L, H, hd, D)
        "wff": jnp.stack(wff).astype(jnp.bfloat16),                       # (L, 2, D, D)
    }


# ----------------------------------- main -----------------------------------

if __name__ == "__main__":
    NUM_ITEMS, EMBED_DIM, N_BLOCKS, N_HEADS, MAX_LEN = 50, 32, 2, 2, 8
    B, T = 2, MAX_LEN

    key = jax.random.PRNGKey(0)
    kp, ks = jax.random.split(key)
    raw_params = init_params(kp, NUM_ITEMS, EMBED_DIM, N_BLOCKS, N_HEADS, MAX_LEN)
    prepared = prepare_params(raw_params)

    seq = jax.random.randint(ks, (B, T), 1, NUM_ITEMS, dtype=jnp.int32)
    # positions: zeros indicate padding (timeline mask), like the reference
    pos = jnp.array([[0, 0, 1, 2, 3, 4, 5, 6],
                     [1, 2, 3, 4, 5, 6, 7, 8]], dtype=jnp.int32)

    out = sasrec_forward(seq, pos, prepared)
    out = jax.block_until_ready(out)
    assert out.shape == (B, T, EMBED_DIM)
    assert bool(jnp.all(jnp.isfinite(out)))
    print("KERNEL_OK")
</pallas_src>

<mosaic_0001>
module attributes {stable_mosaic.version = 11 : i64} {
  func.func @fused_sasrec_kernel(%arg0: i32, %arg1: memref<8x32xf32, #tpu.memory_space<vmem>>, %arg2: memref<8x1xf32, #tpu.memory_space<vmem>>, %arg3: memref<8x8xf32, #tpu.memory_space<vmem>>, %arg4: memref<2x32xf32, #tpu.memory_space<vmem>>, %arg5: memref<2x4x32xf32, #tpu.memory_space<vmem>>, %arg6: memref<2x3x2x1x16xf32, #tpu.memory_space<vmem>>, %arg7: memref<2x3x32xf32, #tpu.memory_space<vmem>>, %arg8: memref<2x3x2x32x16xbf16, #tpu.memory_space<vmem>>, %arg9: memref<2x2x16x32xbf16, #tpu.memory_space<vmem>>, %arg10: memref<2x2x32x32xbf16, #tpu.memory_space<vmem>>, %arg11: memref<8x32xf32, #tpu.memory_space<vmem>>) attributes {dimension_semantics = [#tpu.dimension_semantics<parallel>], iteration_bounds = array<i64: 2>, scalar_prefetch = 0 : i64, scratch_operands = 0 : i64, tpu.core_type = #tpu.core_type<tc>, window_params = [{transform_indices = @transform_0, window_bounds = array<i64: 8, 32>}, {transform_indices = @transform_1, window_bounds = array<i64: 8, 1>}, {pipeline_mode = #tpu.pipeline_mode<synchronous>, transform_indices = @transform_2, window_bounds = array<i64: 8, 8>}, {pipeline_mode = #tpu.pipeline_mode<synchronous>, transform_indices = @transform_3, window_bounds = array<i64: 2, 32>}, {pipeline_mode = #tpu.pipeline_mode<synchronous>, transform_indices = @transform_4, window_bounds = array<i64: 2, 4, 32>}, {pipeline_mode = #tpu.pipeline_mode<synchronous>, transform_indices = @transform_5, window_bounds = array<i64: 2, 3, 2, 1, 16>}, {pipeline_mode = #tpu.pipeline_mode<synchronous>, transform_indices = @transform_6, window_bounds = array<i64: 2, 3, 32>}, {pipeline_mode = #tpu.pipeline_mode<synchronous>, transform_indices = @transform_7, window_bounds = array<i64: 2, 3, 2, 32, 16>}, {pipeline_mode = #tpu.pipeline_mode<synchronous>, transform_indices = @transform_8, window_bounds = array<i64: 2, 2, 16, 32>}, {pipeline_mode = #tpu.pipeline_mode<synchronous>, transform_indices = @transform_9, window_bounds = array<i64: 2, 2, 32, 32>}, {transform_indices = @transform_10, window_bounds = array<i64: 8, 32>}]} {
    %c0 = arith.constant 0 : index
    %c0_0 = arith.constant 0 : index
    %0 = vector.load %arg2[%c0, %c0_0] : memref<8x1xf32, #tpu.memory_space<vmem>>, vector<8x1xf32>
    %c0_1 = arith.constant 0 : index
    %c0_2 = arith.constant 0 : index
    %1 = vector.load %arg3[%c0_1, %c0_2] : memref<8x8xf32, #tpu.memory_space<vmem>>, vector<8x8xf32>
    %c0_3 = arith.constant 0 : index
    %c0_4 = arith.constant 0 : index
    %2 = vector.load %arg1[%c0_3, %c0_4] : memref<8x32xf32, #tpu.memory_space<vmem>>, vector<8x32xf32>
    %3 = vector.broadcast %0 : vector<8x1xf32> to vector<8x32xf32>
    %4 = arith.mulf %2, %3 : vector<8x32xf32>
    %c0_5 = arith.constant 0 : index
    %c0_6 = arith.constant 0 : index
    %c0_7 = arith.constant 0 : index
    %5 = vector.load %arg5[%c0_5, %c0_6, %c0_7] : memref<2x4x32xf32, #tpu.memory_space<vmem>>, vector<1x1x32xf32>
    %6 = vector.shape_cast %5 : vector<1x1x32xf32> to vector<1x32xf32>
    %c0_8 = arith.constant 0 : index
    %c1 = arith.constant 1 : index
    %c0_9 = arith.constant 0 : index
    %7 = vector.load %arg5[%c0_8, %c1, %c0_9] : memref<2x4x32xf32, #tpu.memory_space<vmem>>, vector<1x1x32xf32>
    %8 = vector.shape_cast %7 : vector<1x1x32xf32> to vector<1x32xf32>
    %cst = arith.constant dense<0.000000e+00> : vector<8xf32>
    %9 = vector.multi_reduction <add>, %4, %cst [1] : vector<8x32xf32> to vector<8xf32>
    %10 = vector.shape_cast %9 : vector<8xf32> to vector<8x1xf32>
    %cst_10 = arith.constant 3.200000e+01 : f32
    %11 = vector.broadcast %cst_10 : f32 to vector<8x1xf32>
    %12 = arith.divf %10, %11 : vector<8x1xf32>
    %13 = vector.broadcast %12 : vector<8x1xf32> to vector<8x32xf32>
    %14 = arith.subf %4, %13 : vector<8x32xf32>
    %15 = arith.mulf %14, %14 : vector<8x32xf32>
    %cst_11 = arith.constant dense<0.000000e+00> : vector<8xf32>
    %16 = vector.multi_reduction <add>, %15, %cst_11 [1] : vector<8x32xf32> to vector<8xf32>
    %17 = vector.shape_cast %16 : vector<8xf32> to vector<8x1xf32>
    %cst_12 = arith.constant 3.200000e+01 : f32
    %18 = vector.broadcast %cst_12 : f32 to vector<8x1xf32>
    %19 = arith.divf %17, %18 : vector<8x1xf32>
    %20 = vector.broadcast %12 : vector<8x1xf32> to vector<8x32xf32>
    %21 = arith.subf %4, %20 : vector<8x32xf32>
    %cst_13 = arith.constant 9.99999993E-9 : f32
    %22 = vector.broadcast %cst_13 : f32 to vector<8x1xf32>
    %23 = arith.addf %19, %22 : vector<8x1xf32>
    %24 = math.rsqrt %23 : vector<8x1xf32>
    %25 = vector.broadcast %24 : vector<8x1xf32> to vector<8x32xf32>
    %26 = arith.mulf %21, %25 : vector<8x32xf32>
    %27 = vector.broadcast %6 : vector<1x32xf32> to vector<8x32xf32>
    %28 = arith.mulf %26, %27 : vector<8x32xf32>
    %29 = vector.broadcast %8 : vector<1x32xf32> to vector<8x32xf32>
    %30 = arith.addf %28, %29 : vector<8x32xf32>
    %31 = arith.truncf %30 : vector<8x32xf32> to vector<8x32xbf16>
    %32 = arith.truncf %4 : vector<8x32xf32> to vector<8x32xbf16>
    %c0_14 = arith.constant 0 : index
    %c0_15 = arith.constant 0 : index
    %c0_16 = arith.constant 0 : index
    %c0_17 = arith.constant 0 : index
    %c0_18 = arith.constant 0 : index
    %33 = vector.load %arg8[%c0_14, %c0_15, %c0_16, %c0_17, %c0_18] : memref<2x3x2x32x16xbf16, #tpu.memory_space<vmem>>, vector<1x1x1x32x16xbf16>
    %34 = vector.shape_cast %33 : vector<1x1x1x32x16xbf16> to vector<32x16xbf16>
    %cst_19 = arith.constant dense<0.000000e+00> : vector<8x16xf32>
    %35 = tpu.matmul %31, %34, %cst_19 {dimension_numbers = #tpu.dot_dimension_numbers<[1], [0], [0], [1], [0, 0, 1, 1], [], []>} : vector<8x32xbf16>, vector<32x16xbf16>, vector<8x16xf32> -> vector<8x16xf32>
    %c0_20 = arith.constant 0 : index
    %c0_21 = arith.constant 0 : index
    %c0_22 = arith.constant 0 : index
    %c0_23 = arith.constant 0 : index
    %c0_24 = arith.constant 0 : index
    %36 = vector.load %arg6[%c0_20, %c0_21, %c0_22, %c0_23, %c0_24] : memref<2x3x2x1x16xf32, #tpu.memory_space<vmem>>, vector<1x1x1x1x16xf32>
    %37 = vector.shape_cast %36 : vector<1x1x1x1x16xf32> to vector<1x16xf32>
    %38 = vector.broadcast %37 : vector<1x16xf32> to vector<8x16xf32>
    %39 = arith.addf %35, %38 : vector<8x16xf32>
    %c0_25 = arith.constant 0 : index
    %c1_26 = arith.constant 1 : index
    %c0_27 = arith.constant 0 : index
    %c0_28 = arith.constant 0 : index
    %c0_29 = arith.constant 0 : index
    %40 = vector.load %arg8[%c0_25, %c1_26, %c0_27, %c0_28, %c0_29] : memref<2x3x2x32x16xbf16, #tpu.memory_space<vmem>>, vector<1x1x1x32x16xbf16>
    %41 = vector.shape_cast %40 : vector<1x1x1x32x16xbf16> to vector<32x16xbf16>
    %cst_30 = arith.constant dense<0.000000e+00> : vector<8x16xf32>
    %42 = tpu.matmul %32, %41, %cst_30 {dimension_numbers = #tpu.dot_dimension_numbers<[1], [0], [0], [1], [0, 0, 1, 1], [], []>} : vector<8x32xbf16>, vector<32x16xbf16>, vector<8x16xf32> -> vector<8x16xf32>
    %c0_31 = arith.constant 0 : index
    %c1_32 = arith.constant 1 : index
    %c0_33 = arith.constant 0 : index
    %c0_34 = arith.constant 0 : index
    %c0_35 = arith.constant 0 : index
    %43 = vector.load %arg6[%c0_31, %c1_32, %c0_33, %c0_34, %c0_35] : memref<2x3x2x1x16xf32, #tpu.memory_space<vmem>>, vector<1x1x1x1x16xf32>
    %44 = vector.shape_cast %43 : vector<1x1x1x1x16xf32> to vector<1x16xf32>
    %45 = vector.broadcast %44 : vector<1x16xf32> to vector<8x16xf32>
    %46 = arith.addf %42, %45 : vector<8x16xf32>
    %c0_36 = arith.constant 0 : index
    %c2 = arith.constant 2 : index
    %c0_37 = arith.constant 0 : index
    %c0_38 = arith.constant 0 : index
    %c0_39 = arith.constant 0 : index
    %47 = vector.load %arg8[%c0_36, %c2, %c0_37, %c0_38, %c0_39] : memref<2x3x2x32x16xbf16, #tpu.memory_space<vmem>>, vector<1x1x1x32x16xbf16>
    %48 = vector.shape_cast %47 : vector<1x1x1x32x16xbf16> to vector<32x16xbf16>
    %cst_40 = arith.constant dense<0.000000e+00> : vector<8x16xf32>
    %49 = tpu.matmul %32, %48, %cst_40 {dimension_numbers = #tpu.dot_dimension_numbers<[1], [0], [0], [1], [0, 0, 1, 1], [], []>} : vector<8x32xbf16>, vector<32x16xbf16>, vector<8x16xf32> -> vector<8x16xf32>
    %c0_41 = arith.constant 0 : index
    %c2_42 = arith.constant 2 : index
    %c0_43 = arith.constant 0 : index
    %c0_44 = arith.constant 0 : index
    %c0_45 = arith.constant 0 : index
    %50 = vector.load %arg6[%c0_41, %c2_42, %c0_43, %c0_44, %c0_45] : memref<2x3x2x1x16xf32, #tpu.memory_space<vmem>>, vector<1x1x1x1x16xf32>
    %51 = vector.shape_cast %50 : vector<1x1x1x1x16xf32> to vector<1x16xf32>
    %52 = vector.broadcast %51 : vector<1x16xf32> to vector<8x16xf32>
    %53 = arith.addf %49, %52 : vector<8x16xf32>
    %54 = vector.shape_cast %39 : vector<8x16xf32> to vector<1x8x16xf32>
    %55 = arith.truncf %54 : vector<1x8x16xf32> to vector<1x8x16xbf16>
    %56 = vector.shape_cast %46 : vector<8x16xf32> to vector<1x8x16xf32>
    %57 = arith.truncf %56 : vector<1x8x16xf32> to vector<1x8x16xbf16>
    %58 = vector.shape_cast %53 : vector<8x16xf32> to vector<1x8x16xf32>
    %59 = arith.truncf %58 : vector<1x8x16xf32> to vector<1x8x16xbf16>
    "tpu.trace_start"() <{level = 10 : i32, message = "bqd,bkd->bqk"}> : () -> ()
    %cst_46 = arith.constant dense<0.000000e+00> : vector<1x8x8xf32>
    %60 = tpu.matmul %55, %57, %cst_46 {dimension_numbers = #tpu.dot_dimension_numbers<[2], [2], [1], [1], [0, 0, 0, 1, 1, 1], [0], [0]>} : vector<1x8x16xbf16>, vector<1x8x16xbf16>, vector<1x8x8xf32> -> vector<1x8x8xf32>
    "tpu.trace_stop"() : () -> ()
    %61 = vector.shape_cast %1 : vector<8x8xf32> to vector<1x8x8xf32>
    %62 = arith.addf %60, %61 : vector<1x8x8xf32>
    %cst_47 = arith.constant dense<0xFF800000> : vector<1x8xf32>
    %63 = vector.multi_reduction <maximumf>, %62, %cst_47 [2] : vector<1x8x8xf32> to vector<1x8xf32>
    %64 = vector.shape_cast %63 : vector<1x8xf32> to vector<1x8x1xf32>
    %65 = vector.broadcast %64 : vector<1x8x1xf32> to vector<1x8x8xf32>
    %66 = arith.subf %62, %65 : vector<1x8x8xf32>
    %67 = math.exp %66 : vector<1x8x8xf32>
    %cst_48 = arith.constant dense<0.000000e+00> : vector<1x8xf32>
    %68 = vector.multi_reduction <add>, %67, %cst_48 [2] : vector<1x8x8xf32> to vector<1x8xf32>
    %69 = vector.shape_cast %68 : vector<1x8xf32> to vector<1x8x1xf32>
    %70 = tpu.reciprocal %69 {approx = true} : vector<1x8x1xf32> -> vector<1x8x1xf32>
    %71 = vector.broadcast %70 : vector<1x8x1xf32> to vector<1x8x8xf32>
    %72 = arith.mulf %67, %71 : vector<1x8x8xf32>
    %73 = arith.truncf %72 : vector<1x8x8xf32> to vector<1x8x8xbf16>
    "tpu.trace_start"() <{level = 10 : i32, message = "bqk,bkd->bqd"}> : () -> ()
    %cst_49 = arith.constant dense<0.000000e+00> : vector<1x8x16xf32>
    %74 = tpu.matmul %73, %59, %cst_49 {dimension_numbers = #tpu.dot_dimension_numbers<[2], [1], [1], [2], [0, 0, 0, 1, 1, 2], [0], [0]>} : vector<1x8x8xbf16>, vector<1x8x16xbf16>, vector<1x8x16xf32> -> vector<1x8x16xf32>
    "tpu.trace_stop"() : () -> ()
    %75 = vector.shape_cast %74 : vector<1x8x16xf32> to vector<8x16xf32>
    %76 = arith.truncf %75 : vector<8x16xf32> to vector<8x16xbf16>
    %c0_50 = arith.constant 0 : index
    %c0_51 = arith.constant 0 : index
    %c0_52 = arith.constant 0 : index
    %c0_53 = arith.constant 0 : index
    %77 = vector.load %arg9[%c0_50, %c0_51, %c0_52, %c0_53] : memref<2x2x16x32xbf16, #tpu.memory_space<vmem>>, vector<1x1x16x32xbf16>
    %78 = vector.shape_cast %77 : vector<1x1x16x32xbf16> to vector<16x32xbf16>
    %cst_54 = arith.constant dense<0.000000e+00> : vector<8x32xf32>
    %79 = tpu.matmul %76, %78, %cst_54 {dimension_numbers = #tpu.dot_dimension_numbers<[1], [0], [0], [1], [0, 0, 1, 1], [], []>} : vector<8x16xbf16>, vector<16x32xbf16>, vector<8x32xf32> -> vector<8x32xf32>
    %c0_55 = arith.constant 0 : index
    %c0_56 = arith.constant 0 : index
    %c1_57 = arith.constant 1 : index
    %c0_58 = arith.constant 0 : index
    %c0_59 = arith.constant 0 : index
    %80 = vector.load %arg8[%c0_55, %c0_56, %c1_57, %c0_58, %c0_59] : memref<2x3x2x32x16xbf16, #tpu.memory_space<vmem>>, vector<1x1x1x32x16xbf16>
    %81 = vector.shape_cast %80 : vector<1x1x1x32x16xbf16> to vector<32x16xbf16>
    %cst_60 = arith.constant dense<0.000000e+00> : vector<8x16xf32>
    %82 = tpu.matmul %31, %81, %cst_60 {dimension_numbers = #tpu.dot_dimension_numbers<[1], [0], [0], [1], [0, 0, 1, 1], [], []>} : vector<8x32xbf16>, vector<32x16xbf16>, vector<8x16xf32> -> vector<8x16xf32>
    %c0_61 = arith.constant 0 : index
    %c0_62 = arith.constant 0 : index
    %c1_63 = arith.constant 1 : index
    %c0_64 = arith.constant 0 : index
    %c0_65 = arith.constant 0 : index
    %83 = vector.load %arg6[%c0_61, %c0_62, %c1_63, %c0_64, %c0_65] : memref<2x3x2x1x16xf32, #tpu.memory_space<vmem>>, vector<1x1x1x1x16xf32>
    %84 = vector.shape_cast %83 : vector<1x1x1x1x16xf32> to vector<1x16xf32>
    %85 = vector.broadcast %84 : vector<1x16xf32> to vector<8x16xf32>
    %86 = arith.addf %82, %85 : vector<8x16xf32>
    %c0_66 = arith.constant 0 : index
    %c1_67 = arith.constant 1 : index
    %c1_68 = arith.constant 1 : index
    %c0_69 = arith.constant 0 : index
    %c0_70 = arith.constant 0 : index
    %87 = vector.load %arg8[%c0_66, %c1_67, %c1_68, %c0_69, %c0_70] : memref<2x3x2x32x16xbf16, #tpu.memory_space<vmem>>, vector<1x1x1x32x16xbf16>
    %88 = vector.shape_cast %87 : vector<1x1x1x32x16xbf16> to vector<32x16xbf16>
    %cst_71 = arith.constant dense<0.000000e+00> : vector<8x16xf32>
    %89 = tpu.matmul %32, %88, %cst_71 {dimension_numbers = #tpu.dot_dimension_numbers<[1], [0], [0], [1], [0, 0, 1, 1], [], []>} : vector<8x32xbf16>, vector<32x16xbf16>, vector<8x16xf32> -> vector<8x16xf32>
    %c0_72 = arith.constant 0 : index
    %c1_73 = arith.constant 1 : index
    %c1_74 = arith.constant 1 : index
    %c0_75 = arith.constant 0 : index
    %c0_76 = arith.constant 0 : index
    %90 = vector.load %arg6[%c0_72, %c1_73, %c1_74, %c0_75, %c0_76] : memref<2x3x2x1x16xf32, #tpu.memory_space<vmem>>, vector<1x1x1x1x16xf32>
    %91 = vector.shape_cast %90 : vector<1x1x1x1x16xf32> to vector<1x16xf32>
    %92 = vector.broadcast %91 : vector<1x16xf32> to vector<8x16xf32>
    %93 = arith.addf %89, %92 : vector<8x16xf32>
    %c0_77 = arith.constant 0 : index
    %c2_78 = arith.constant 2 : index
    %c1_79 = arith.constant 1 : index
    %c0_80 = arith.constant 0 : index
    %c0_81 = arith.constant 0 : index
    %94 = vector.load %arg8[%c0_77, %c2_78, %c1_79, %c0_80, %c0_81] : memref<2x3x2x32x16xbf16, #tpu.memory_space<vmem>>, vector<1x1x1x32x16xbf16>
    %95 = vector.shape_cast %94 : vector<1x1x1x32x16xbf16> to vector<32x16xbf16>
    %cst_82 = arith.constant dense<0.000000e+00> : vector<8x16xf32>
    %96 = tpu.matmul %32, %95, %cst_82 {dimension_numbers = #tpu.dot_dimension_numbers<[1], [0], [0], [1], [0, 0, 1, 1], [], []>} : vector<8x32xbf16>, vector<32x16xbf16>, vector<8x16xf32> -> vector<8x16xf32>
    %c0_83 = arith.constant 0 : index
    %c2_84 = arith.constant 2 : index
    %c1_85 = arith.constant 1 : index
    %c0_86 = arith.constant 0 : index
    %c0_87 = arith.constant 0 : index
    %97 = vector.load %arg6[%c0_83, %c2_84, %c1_85, %c0_86, %c0_87] : memref<2x3x2x1x16xf32, #tpu.memory_space<vmem>>, vector<1x1x1x1x16xf32>
    %98 = vector.shape_cast %97 : vector<1x1x1x1x16xf32> to vector<1x16xf32>
    %99 = vector.broadcast %98 : vector<1x16xf32> to vector<8x16xf32>
    %100 = arith.addf %96, %99 : vector<8x16xf32>
    %101 = vector.shape_cast %86 : vector<8x16xf32> to vector<1x8x16xf32>
    %102 = arith.truncf %101 : vector<1x8x16xf32> to vector<1x8x16xbf16>
    %103 = vector.shape_cast %93 : vector<8x16xf32> to vector<1x8x16xf32>
    %104 = arith.truncf %103 : vector<1x8x16xf32> to vector<1x8x16xbf16>
    %105 = vector.shape_cast %100 : vector<8x16xf32> to vector<1x8x16xf32>
    %106 = arith.truncf %105 : vector<1x8x16xf32> to vector<1x8x16xbf16>
    "tpu.trace_start"() <{level = 10 : i32, message = "bqd,bkd->bqk"}> : () -> ()
    %cst_88 = arith.constant dense<0.000000e+00> : vector<1x8x8xf32>
    %107 = tpu.matmul %102, %104, %cst_88 {dimension_numbers = #tpu.dot_dimension_numbers<[2], [2], [1], [1], [0, 0, 0, 1, 1, 1], [0], [0]>} : vector<1x8x16xbf16>, vector<1x8x16xbf16>, vector<1x8x8xf32> -> vector<1x8x8xf32>
    "tpu.trace_stop"() : () -> ()
    %108 = vector.shape_cast %1 : vector<8x8xf32> to vector<1x8x8xf32>
    %109 = arith.addf %107, %108 : vector<1x8x8xf32>
    %cst_89 = arith.constant dense<0xFF800000> : vector<1x8xf32>
    %110 = vector.multi_reduction <maximumf>, %109, %cst_89 [2] : vector<1x8x8xf32> to vector<1x8xf32>
    %111 = vector.shape_cast %110 : vector<1x8xf32> to vector<1x8x1xf32>
    %112 = vector.broadcast %111 : vector<1x8x1xf32> to vector<1x8x8xf32>
    %113 = arith.subf %109, %112 : vector<1x8x8xf32>
    %114 = math.exp %113 : vector<1x8x8xf32>
    %cst_90 = arith.constant dense<0.000000e+00> : vector<1x8xf32>
    %115 = vector.multi_reduction <add>, %114, %cst_90 [2] : vector<1x8x8xf32> to vector<1x8xf32>
    %116 = vector.shape_cast %115 : vector<1x8xf32> to vector<1x8x1xf32>
    %117 = tpu.reciprocal %116 {approx = true} : vector<1x8x1xf32> -> vector<1x8x1xf32>
    %118 = vector.broadcast %117 : vector<1x8x1xf32> to vector<1x8x8xf32>
    %119 = arith.mulf %114, %118 : vector<1x8x8xf32>
    %120 = arith.truncf %119 : vector<1x8x8xf32> to vector<1x8x8xbf16>
    "tpu.trace_start"() <{level = 10 : i32, message = "bqk,bkd->bqd"}> : () -> ()
    %cst_91 = arith.constant dense<0.000000e+00> : vector<1x8x16xf32>
    %121 = tpu.matmul %120, %106, %cst_91 {dimension_numbers = #tpu.dot_dimension_numbers<[2], [1], [1], [2], [0, 0, 0, 1, 1, 2], [0], [0]>} : vector<1x8x8xbf16>, vector<1x8x16xbf16>, vector<1x8x16xf32> -> vector<1x8x16xf32>
    "tpu.trace_stop"() : () -> ()
    %122 = vector.shape_cast %121 : vector<1x8x16xf32> to vector<8x16xf32>
    %123 = arith.truncf %122 : vector<8x16xf32> to vector<8x16xbf16>
    %c0_92 = arith.constant 0 : index
    %c1_93 = arith.constant 1 : index
    %c0_94 = arith.constant 0 : index
    %c0_95 = arith.constant 0 : index
    %124 = vector.load %arg9[%c0_92, %c1_93, %c0_94, %c0_95] : memref<2x2x16x32xbf16, #tpu.memory_space<vmem>>, vector<1x1x16x32xbf16>
    %125 = vector.shape_cast %124 : vector<1x1x16x32xbf16> to vector<16x32xbf16>
    %cst_96 = arith.constant dense<0.000000e+00> : vector<8x32xf32>
    %126 = tpu.matmul %123, %125, %cst_96 {dimension_numbers = #tpu.dot_dimension_numbers<[1], [0], [0], [1], [0, 0, 1, 1], [], []>} : vector<8x16xbf16>, vector<16x32xbf16>, vector<8x32xf32> -> vector<8x32xf32>
    %127 = arith.addf %79, %126 : vector<8x32xf32>
    %c0_97 = arith.constant 0 : index
    %c0_98 = arith.constant 0 : index
    %c0_99 = arith.constant 0 : index
    %128 = vector.load %arg7[%c0_97, %c0_98, %c0_99] : memref<2x3x32xf32, #tpu.memory_space<vmem>>, vector<1x1x32xf32>
    %129 = vector.shape_cast %128 : vector<1x1x32xf32> to vector<1x32xf32>
    %130 = vector.broadcast %129 : vector<1x32xf32> to vector<8x32xf32>
    %131 = arith.addf %127, %130 : vector<8x32xf32>
    %132 = arith.addf %30, %131 : vector<8x32xf32>
    %c0_100 = arith.constant 0 : index
    %c2_101 = arith.constant 2 : index
    %c0_102 = arith.constant 0 : index
    %133 = vector.load %arg5[%c0_100, %c2_101, %c0_102] : memref<2x4x32xf32, #tpu.memory_space<vmem>>, vector<1x1x32xf32>
    %134 = vector.shape_cast %133 : vector<1x1x32xf32> to vector<1x32xf32>
    %c0_103 = arith.constant 0 : index
    %c3 = arith.constant 3 : index
    %c0_104 = arith.constant 0 : index
    %135 = vector.load %arg5[%c0_103, %c3, %c0_104] : memref<2x4x32xf32, #tpu.memory_space<vmem>>, vector<1x1x32xf32>
    %136 = vector.shape_cast %135 : vector<1x1x32xf32> to vector<1x32xf32>
    %cst_105 = arith.constant dense<0.000000e+00> : vector<8xf32>
    %137 = vector.multi_reduction <add>, %132, %cst_105 [1] : vector<8x32xf32> to vector<8xf32>
    %138 = vector.shape_cast %137 : vector<8xf32> to vector<8x1xf32>
    %cst_106 = arith.constant 3.200000e+01 : f32
    %139 = vector.broadcast %cst_106 : f32 to vector<8x1xf32>
    %140 = arith.divf %138, %139 : vector<8x1xf32>
    %141 = vector.broadcast %140 : vector<8x1xf32> to vector<8x32xf32>
    %142 = arith.subf %132, %141 : vector<8x32xf32>
    %143 = arith.mulf %142, %142 : vector<8x32xf32>
    %cst_107 = arith.constant dense<0.000000e+00> : vector<8xf32>
    %144 = vector.multi_reduction <add>, %143, %cst_107 [1] : vector<8x32xf32> to vector<8xf32>
    %145 = vector.shape_cast %144 : vector<8xf32> to vector<8x1xf32>
    %cst_108 = arith.constant 3.200000e+01 : f32
    %146 = vector.broadcast %cst_108 : f32 to vector<8x1xf32>
    %147 = arith.divf %145, %146 : vector<8x1xf32>
    %148 = vector.broadcast %140 : vector<8x1xf32> to vector<8x32xf32>
    %149 = arith.subf %132, %148 : vector<8x32xf32>
    %cst_109 = arith.constant 9.99999993E-9 : f32
    %150 = vector.broadcast %cst_109 : f32 to vector<8x1xf32>
    %151 = arith.addf %147, %150 : vector<8x1xf32>
    %152 = math.rsqrt %151 : vector<8x1xf32>
    %153 = vector.broadcast %152 : vector<8x1xf32> to vector<8x32xf32>
    %154 = arith.mulf %149, %153 : vector<8x32xf32>
    %155 = vector.broadcast %134 : vector<1x32xf32> to vector<8x32xf32>
    %156 = arith.mulf %154, %155 : vector<8x32xf32>
    %157 = vector.broadcast %136 : vector<1x32xf32> to vector<8x32xf32>
    %158 = arith.addf %156, %157 : vector<8x32xf32>
    %159 = arith.truncf %158 : vector<8x32xf32> to vector<8x32xbf16>
    %c0_110 = arith.constant 0 : index
    %c0_111 = arith.constant 0 : index
    %c0_112 = arith.constant 0 : index
    %c0_113 = arith.constant 0 : index
    %160 = vector.load %arg10[%c0_110, %c0_111, %c0_112, %c0_113] : memref<2x2x32x32xbf16, #tpu.memory_space<vmem>>, vector<1x1x32x32xbf16>
    %161 = vector.shape_cast %160 : vector<1x1x32x32xbf16> to vector<32x32xbf16>
    %cst_114 = arith.constant dense<0.000000e+00> : vector<8x32xf32>
    %162 = tpu.matmul %159, %161, %cst_114 {dimension_numbers = #tpu.dot_dimension_numbers<[1], [0], [0], [1], [0, 0, 1, 1], [], []>} : vector<8x32xbf16>, vector<32x32xbf16>, vector<8x32xf32> -> vector<8x32xf32>
    %c0_115 = arith.constant 0 : index
    %c1_116 = arith.constant 1 : index
    %c0_117 = arith.constant 0 : index
    %163 = vector.load %arg7[%c0_115, %c1_116, %c0_117] : memref<2x3x32xf32, #tpu.memory_space<vmem>>, vector<1x1x32xf32>
    %164 = vector.shape_cast %163 : vector<1x1x32xf32> to vector<1x32xf32>
    %165 = vector.broadcast %164 : vector<1x32xf32> to vector<8x32xf32>
    %166 = arith.addf %162, %165 : vector<8x32xf32>
    %cst_118 = arith.constant 0.000000e+00 : f32
    %167 = vector.broadcast %cst_118 : f32 to vector<8x32xf32>
    %168 = arith.maximumf %166, %167 : vector<8x32xf32>
    %169 = arith.truncf %168 : vector<8x32xf32> to vector<8x32xbf16>
    %c0_119 = arith.constant 0 : index
    %c1_120 = arith.constant 1 : index
    %c0_121 = arith.constant 0 : index
    %c0_122 = arith.constant 0 : index
    %170 = vector.load %arg10[%c0_119, %c1_120, %c0_121, %c0_122] : memref<2x2x32x32xbf16, #tpu.memory_space<vmem>>, vector<1x1x32x32xbf16>
    %171 = vector.shape_cast %170 : vector<1x1x32x32xbf16> to vector<32x32xbf16>
    %cst_123 = arith.constant dense<0.000000e+00> : vector<8x32xf32>
    %172 = tpu.matmul %169, %171, %cst_123 {dimension_numbers = #tpu.dot_dimension_numbers<[1], [0], [0], [1], [0, 0, 1, 1], [], []>} : vector<8x32xbf16>, vector<32x32xbf16>, vector<8x32xf32> -> vector<8x32xf32>
    %c0_124 = arith.constant 0 : index
    %c2_125 = arith.constant 2 : index
    %c0_126 = arith.constant 0 : index
    %173 = vector.load %arg7[%c0_124, %c2_125, %c0_126] : memref<2x3x32xf32, #tpu.memory_space<vmem>>, vector<1x1x32xf32>
    %174 = vector.shape_cast %173 : vector<1x1x32xf32> to vector<1x32xf32>
    %175 = vector.broadcast %174 : vector<1x32xf32> to vector<8x32xf32>
    %176 = arith.addf %172, %175 : vector<8x32xf32>
    %177 = arith.addf %176, %158 : vector<8x32xf32>
    %178 = vector.broadcast %0 : vector<8x1xf32> to vector<8x32xf32>
    %179 = arith.mulf %177, %178 : vector<8x32xf32>
    %c1_127 = arith.constant 1 : index
    %c0_128 = arith.constant 0 : index
    %c0_129 = arith.constant 0 : index
    %180 = vector.load %arg5[%c1_127, %c0_128, %c0_129] : memref<2x4x32xf32, #tpu.memory_space<vmem>>, vector<1x1x32xf32>
    %181 = vector.shape_cast %180 : vector<1x1x32xf32> to vector<1x32xf32>
    %c1_130 = arith.constant 1 : index
    %c1_131 = arith.constant 1 : index
    %c0_132 = arith.constant 0 : index
    %182 = vector.load %arg5[%c1_130, %c1_131, %c0_132] : memref<2x4x32xf32, #tpu.memory_space<vmem>>, vector<1x1x32xf32>
    %183 = vector.shape_cast %182 : vector<1x1x32xf32> to vector<1x32xf32>
    %cst_133 = arith.constant dense<0.000000e+00> : vector<8xf32>
    %184 = vector.multi_reduction <add>, %179, %cst_133 [1] : vector<8x32xf32> to vector<8xf32>
    %185 = vector.shape_cast %184 : vector<8xf32> to vector<8x1xf32>
    %cst_134 = arith.constant 3.200000e+01 : f32
    %186 = vector.broadcast %cst_134 : f32 to vector<8x1xf32>
    %187 = arith.divf %185, %186 : vector<8x1xf32>
    %188 = vector.broadcast %187 : vector<8x1xf32> to vector<8x32xf32>
    %189 = arith.subf %179, %188 : vector<8x32xf32>
    %190 = arith.mulf %189, %189 : vector<8x32xf32>
    %cst_135 = arith.constant dense<0.000000e+00> : vector<8xf32>
    %191 = vector.multi_reduction <add>, %190, %cst_135 [1] : vector<8x32xf32> to vector<8xf32>
    %192 = vector.shape_cast %191 : vector<8xf32> to vector<8x1xf32>
    %cst_136 = arith.constant 3.200000e+01 : f32
    %193 = vector.broadcast %cst_136 : f32 to vector<8x1xf32>
    %194 = arith.divf %192, %193 : vector<8x1xf32>
    %195 = vector.broadcast %187 : vector<8x1xf32> to vector<8x32xf32>
    %196 = arith.subf %179, %195 : vector<8x32xf32>
    %cst_137 = arith.constant 9.99999993E-9 : f32
    %197 = vector.broadcast %cst_137 : f32 to vector<8x1xf32>
    %198 = arith.addf %194, %197 : vector<8x1xf32>
    %199 = math.rsqrt %198 : vector<8x1xf32>
    %200 = vector.broadcast %199 : vector<8x1xf32> to vector<8x32xf32>
    %201 = arith.mulf %196, %200 : vector<8x32xf32>
    %202 = vector.broadcast %181 : vector<1x32xf32> to vector<8x32xf32>
    %203 = arith.mulf %201, %202 : vector<8x32xf32>
    %204 = vector.broadcast %183 : vector<1x32xf32> to vector<8x32xf32>
    %205 = arith.addf %203, %204 : vector<8x32xf32>
    %206 = arith.truncf %205 : vector<8x32xf32> to vector<8x32xbf16>
    %207 = arith.truncf %179 : vector<8x32xf32> to vector<8x32xbf16>
    %c1_138 = arith.constant 1 : index
    %c0_139 = arith.constant 0 : index
    %c0_140 = arith.constant 0 : index
    %c0_141 = arith.constant 0 : index
    %c0_142 = arith.constant 0 : index
    %208 = vector.load %arg8[%c1_138, %c0_139, %c0_140, %c0_141, %c0_142] : memref<2x3x2x32x16xbf16, #tpu.memory_space<vmem>>, vector<1x1x1x32x16xbf16>
    %209 = vector.shape_cast %208 : vector<1x1x1x32x16xbf16> to vector<32x16xbf16>
    %cst_143 = arith.constant dense<0.000000e+00> : vector<8x16xf32>
    %210 = tpu.matmul %206, %209, %cst_143 {dimension_numbers = #tpu.dot_dimension_numbers<[1], [0], [0], [1], [0, 0, 1, 1], [], []>} : vector<8x32xbf16>, vector<32x16xbf16>, vector<8x16xf32> -> vector<8x16xf32>
    %c1_144 = arith.constant 1 : index
    %c0_145 = arith.constant 0 : index
    %c0_146 = arith.constant 0 : index
    %c0_147 = arith.constant 0 : index
    %c0_148 = arith.constant 0 : index
    %211 = vector.load %arg6[%c1_144, %c0_145, %c0_146, %c0_147, %c0_148] : memref<2x3x2x1x16xf32, #tpu.memory_space<vmem>>, vector<1x1x1x1x16xf32>
    %212 = vector.shape_cast %211 : vector<1x1x1x1x16xf32> to vector<1x16xf32>
    %213 = vector.broadcast %212 : vector<1x16xf32> to vector<8x16xf32>
    %214 = arith.addf %210, %213 : vector<8x16xf32>
    %c1_149 = arith.constant 1 : index
    %c1_150 = arith.constant 1 : index
    %c0_151 = arith.constant 0 : index
    %c0_152 = arith.constant 0 : index
    %c0_153 = arith.constant 0 : index
    %215 = vector.load %arg8[%c1_149, %c1_150, %c0_151, %c0_152, %c0_153] : memref<2x3x2x32x16xbf16, #tpu.memory_space<vmem>>, vector<1x1x1x32x16xbf16>
    %216 = vector.shape_cast %215 : vector<1x1x1x32x16xbf16> to vector<32x16xbf16>
    %cst_154 = arith.constant dense<0.000000e+00> : vector<8x16xf32>
    %217 = tpu.matmul %207, %216, %cst_154 {dimension_numbers = #tpu.dot_dimension_numbers<[1], [0], [0], [1], [0, 0, 1, 1], [], []>} : vector<8x32xbf16>, vector<32x16xbf16>, vector<8x16xf32> -> vector<8x16xf32>
    %c1_155 = arith.constant 1 : index
    %c1_156 = arith.constant 1 : index
    %c0_157 = arith.constant 0 : index
    %c0_158 = arith.constant 0 : index
    %c0_159 = arith.constant 0 : index
    %218 = vector.load %arg6[%c1_155, %c1_156, %c0_157, %c0_158, %c0_159] : memref<2x3x2x1x16xf32, #tpu.memory_space<vmem>>, vector<1x1x1x1x16xf32>
    %219 = vector.shape_cast %218 : vector<1x1x1x1x16xf32> to vector<1x16xf32>
    %220 = vector.broadcast %219 : vector<1x16xf32> to vector<8x16xf32>
    %221 = arith.addf %217, %220 : vector<8x16xf32>
    %c1_160 = arith.constant 1 : index
    %c2_161 = arith.constant 2 : index
    %c0_162 = arith.constant 0 : index
    %c0_163 = arith.constant 0 : index
    %c0_164 = arith.constant 0 : index
    %222 = vector.load %arg8[%c1_160, %c2_161, %c0_162, %c0_163, %c0_164] : memref<2x3x2x32x16xbf16, #tpu.memory_space<vmem>>, vector<1x1x1x32x16xbf16>
    %223 = vector.shape_cast %222 : vector<1x1x1x32x16xbf16> to vector<32x16xbf16>
    %cst_165 = arith.constant dense<0.000000e+00> : vector<8x16xf32>
    %224 = tpu.matmul %207, %223, %cst_165 {dimension_numbers = #tpu.dot_dimension_numbers<[1], [0], [0], [1], [0, 0, 1, 1], [], []>} : vector<8x32xbf16>, vector<32x16xbf16>, vector<8x16xf32> -> vector<8x16xf32>
    %c1_166 = arith.constant 1 : index
    %c2_167 = arith.constant 2 : index
    %c0_168 = arith.constant 0 : index
    %c0_169 = arith.constant 0 : index
    %c0_170 = arith.constant 0 : index
    %225 = vector.load %arg6[%c1_166, %c2_167, %c0_168, %c0_169, %c0_170] : memref<2x3x2x1x16xf32, #tpu.memory_space<vmem>>, vector<1x1x1x1x16xf32>
    %226 = vector.shape_cast %225 : vector<1x1x1x1x16xf32> to vector<1x16xf32>
    %227 = vector.broadcast %226 : vector<1x16xf32> to vector<8x16xf32>
    %228 = arith.addf %224, %227 : vector<8x16xf32>
    %229 = vector.shape_cast %214 : vector<8x16xf32> to vector<1x8x16xf32>
    %230 = arith.truncf %229 : vector<1x8x16xf32> to vector<1x8x16xbf16>
    %231 = vector.shape_cast %221 : vector<8x16xf32> to vector<1x8x16xf32>
    %232 = arith.truncf %231 : vector<1x8x16xf32> to vector<1x8x16xbf16>
    %233 = vector.shape_cast %228 : vector<8x16xf32> to vector<1x8x16xf32>
    %234 = arith.truncf %233 : vector<1x8x16xf32> to vector<1x8x16xbf16>
    "tpu.trace_start"() <{level = 10 : i32, message = "bqd,bkd->bqk"}> : () -> ()
    %cst_171 = arith.constant dense<0.000000e+00> : vector<1x8x8xf32>
    %235 = tpu.matmul %230, %232, %cst_171 {dimension_numbers = #tpu.dot_dimension_numbers<[2], [2], [1], [1], [0, 0, 0, 1, 1, 1], [0], [0]>} : vector<1x8x16xbf16>, vector<1x8x16xbf16>, vector<1x8x8xf32> -> vector<1x8x8xf32>
    "tpu.trace_stop"() : () -> ()
    %236 = vector.shape_cast %1 : vector<8x8xf32> to vector<1x8x8xf32>
    %237 = arith.addf %235, %236 : vector<1x8x8xf32>
    %cst_172 = arith.constant dense<0xFF800000> : vector<1x8xf32>
    %238 = vector.multi_reduction <maximumf>, %237, %cst_172 [2] : vector<1x8x8xf32> to vector<1x8xf32>
    %239 = vector.shape_cast %238 : vector<1x8xf32> to vector<1x8x1xf32>
    %240 = vector.broadcast %239 : vector<1x8x1xf32> to vector<1x8x8xf32>
    %241 = arith.subf %237, %240 : vector<1x8x8xf32>
    %242 = math.exp %241 : vector<1x8x8xf32>
    %cst_173 = arith.constant dense<0.000000e+00> : vector<1x8xf32>
    %243 = vector.multi_reduction <add>, %242, %cst_173 [2] : vector<1x8x8xf32> to vector<1x8xf32>
    %244 = vector.shape_cast %243 : vector<1x8xf32> to vector<1x8x1xf32>
    %245 = tpu.reciprocal %244 {approx = true} : vector<1x8x1xf32> -> vector<1x8x1xf32>
    %246 = vector.broadcast %245 : vector<1x8x1xf32> to vector<1x8x8xf32>
    %247 = arith.mulf %242, %246 : vector<1x8x8xf32>
    %248 = arith.truncf %247 : vector<1x8x8xf32> to vector<1x8x8xbf16>
    "tpu.trace_start"() <{level = 10 : i32, message = "bqk,bkd->bqd"}> : () -> ()
    %cst_174 = arith.constant dense<0.000000e+00> : vector<1x8x16xf32>
    %249 = tpu.matmul %248, %234, %cst_174 {dimension_numbers = #tpu.dot_dimension_numbers<[2], [1], [1], [2], [0, 0, 0, 1, 1, 2], [0], [0]>} : vector<1x8x8xbf16>, vector<1x8x16xbf16>, vector<1x8x16xf32> -> vector<1x8x16xf32>
    "tpu.trace_stop"() : () -> ()
    %250 = vector.shape_cast %249 : vector<1x8x16xf32> to vector<8x16xf32>
    %251 = arith.truncf %250 : vector<8x16xf32> to vector<8x16xbf16>
    %c1_175 = arith.constant 1 : index
    %c0_176 = arith.constant 0 : index
    %c0_177 = arith.constant 0 : index
    %c0_178 = arith.constant 0 : index
    %252 = vector.load %arg9[%c1_175, %c0_176, %c0_177, %c0_178] : memref<2x2x16x32xbf16, #tpu.memory_space<vmem>>, vector<1x1x16x32xbf16>
    %253 = vector.shape_cast %252 : vector<1x1x16x32xbf16> to vector<16x32xbf16>
    %cst_179 = arith.constant dense<0.000000e+00> : vector<8x32xf32>
    %254 = tpu.matmul %251, %253, %cst_179 {dimension_numbers = #tpu.dot_dimension_numbers<[1], [0], [0], [1], [0, 0, 1, 1], [], []>} : vector<8x16xbf16>, vector<16x32xbf16>, vector<8x32xf32> -> vector<8x32xf32>
    %c1_180 = arith.constant 1 : index
    %c0_181 = arith.constant 0 : index
    %c1_182 = arith.constant 1 : index
    %c0_183 = arith.constant 0 : index
    %c0_184 = arith.constant 0 : index
    %255 = vector.load %arg8[%c1_180, %c0_181, %c1_182, %c0_183, %c0_184] : memref<2x3x2x32x16xbf16, #tpu.memory_space<vmem>>, vector<1x1x1x32x16xbf16>
    %256 = vector.shape_cast %255 : vector<1x1x1x32x16xbf16> to vector<32x16xbf16>
    %cst_185 = arith.constant dense<0.000000e+00> : vector<8x16xf32>
    %257 = tpu.matmul %206, %256, %cst_185 {dimension_numbers = #tpu.dot_dimension_numbers<[1], [0], [0], [1], [0, 0, 1, 1], [], []>} : vector<8x32xbf16>, vector<32x16xbf16>, vector<8x16xf32> -> vector<8x16xf32>
    %c1_186 = arith.constant 1 : index
    %c0_187 = arith.constant 0 : index
    %c1_188 = arith.constant 1 : index
    %c0_189 = arith.constant 0 : index
    %c0_190 = arith.constant 0 : index
    %258 = vector.load %arg6[%c1_186, %c0_187, %c1_188, %c0_189, %c0_190] : memref<2x3x2x1x16xf32, #tpu.memory_space<vmem>>, vector<1x1x1x1x16xf32>
    %259 = vector.shape_cast %258 : vector<1x1x1x1x16xf32> to vector<1x16xf32>
    %260 = vector.broadcast %259 : vector<1x16xf32> to vector<8x16xf32>
    %261 = arith.addf %257, %260 : vector<8x16xf32>
    %c1_191 = arith.constant 1 : index
    %c1_192 = arith.constant 1 : index
    %c1_193 = arith.constant 1 : index
    %c0_194 = arith.constant 0 : index
    %c0_195 = arith.constant 0 : index
    %262 = vector.load %arg8[%c1_191, %c1_192, %c1_193, %c0_194, %c0_195] : memref<2x3x2x32x16xbf16, #tpu.memory_space<vmem>>, vector<1x1x1x32x16xbf16>
    %263 = vector.shape_cast %262 : vector<1x1x1x32x16xbf16> to vector<32x16xbf16>
    %cst_196 = arith.constant dense<0.000000e+00> : vector<8x16xf32>
    %264 = tpu.matmul %207, %263, %cst_196 {dimension_numbers = #tpu.dot_dimension_numbers<[1], [0], [0], [1], [0, 0, 1, 1], [], []>} : vector<8x32xbf16>, vector<32x16xbf16>, vector<8x16xf32> -> vector<8x16xf32>
    %c1_197 = arith.constant 1 : index
    %c1_198 = arith.constant 1 : index
    %c1_199 = arith.constant 1 : index
    %c0_200 = arith.constant 0 : index
    %c0_201 = arith.constant 0 : index
    %265 = vector.load %arg6[%c1_197, %c1_198, %c1_199, %c0_200, %c0_201] : memref<2x3x2x1x16xf32, #tpu.memory_space<vmem>>, vector<1x1x1x1x16xf32>
    %266 = vector.shape_cast %265 : vector<1x1x1x1x16xf32> to vector<1x16xf32>
    %267 = vector.broadcast %266 : vector<1x16xf32> to vector<8x16xf32>
    %268 = arith.addf %264, %267 : vector<8x16xf32>
    %c1_202 = arith.constant 1 : index
    %c2_203 = arith.constant 2 : index
    %c1_204 = arith.constant 1 : index
    %c0_205 = arith.constant 0 : index
    %c0_206 = arith.constant 0 : index
    %269 = vector.load %arg8[%c1_202, %c2_203, %c1_204, %c0_205, %c0_206] : memref<2x3x2x32x16xbf16, #tpu.memory_space<vmem>>, vector<1x1x1x32x16xbf16>
    %270 = vector.shape_cast %269 : vector<1x1x1x32x16xbf16> to vector<32x16xbf16>
    %cst_207 = arith.constant dense<0.000000e+00> : vector<8x16xf32>
    %271 = tpu.matmul %207, %270, %cst_207 {dimension_numbers = #tpu.dot_dimension_numbers<[1], [0], [0], [1], [0, 0, 1, 1], [], []>} : vector<8x32xbf16>, vector<32x16xbf16>, vector<8x16xf32> -> vector<8x16xf32>
    %c1_208 = arith.constant 1 : index
    %c2_209 = arith.constant 2 : index
    %c1_210 = arith.constant 1 : index
    %c0_211 = arith.constant 0 : index
    %c0_212 = arith.constant 0 : index
    %272 = vector.load %arg6[%c1_208, %c2_209, %c1_210, %c0_211, %c0_212] : memref<2x3x2x1x16xf32, #tpu.memory_space<vmem>>, vector<1x1x1x1x16xf32>
    %273 = vector.shape_cast %272 : vector<1x1x1x1x16xf32> to vector<1x16xf32>
    %274 = vector.broadcast %273 : vector<1x16xf32> to vector<8x16xf32>
    %275 = arith.addf %271, %274 : vector<8x16xf32>
    %276 = vector.shape_cast %261 : vector<8x16xf32> to vector<1x8x16xf32>
    %277 = arith.truncf %276 : vector<1x8x16xf32> to vector<1x8x16xbf16>
    %278 = vector.shape_cast %268 : vector<8x16xf32> to vector<1x8x16xf32>
    %279 = arith.truncf %278 : vector<1x8x16xf32> to vector<1x8x16xbf16>
    %280 = vector.shape_cast %275 : vector<8x16xf32> to vector<1x8x16xf32>
    %281 = arith.truncf %280 : vector<1x8x16xf32> to vector<1x8x16xbf16>
    "tpu.trace_start"() <{level = 10 : i32, message = "bqd,bkd->bqk"}> : () -> ()
    %cst_213 = arith.constant dense<0.000000e+00> : vector<1x8x8xf32>
    %282 = tpu.matmul %277, %279, %cst_213 {dimension_numbers = #tpu.dot_dimension_numbers<[2], [2], [1], [1], [0, 0, 0, 1, 1, 1], [0], [0]>} : vector<1x8x16xbf16>, vector<1x8x16xbf16>, vector<1x8x8xf32> -> vector<1x8x8xf32>
    "tpu.trace_stop"() : () -> ()
    %283 = vector.shape_cast %1 : vector<8x8xf32> to vector<1x8x8xf32>
    %284 = arith.addf %282, %283 : vector<1x8x8xf32>
    %cst_214 = arith.constant dense<0xFF800000> : vector<1x8xf32>
    %285 = vector.multi_reduction <maximumf>, %284, %cst_214 [2] : vector<1x8x8xf32> to vector<1x8xf32>
    %286 = vector.shape_cast %285 : vector<1x8xf32> to vector<1x8x1xf32>
    %287 = vector.broadcast %286 : vector<1x8x1xf32> to vector<1x8x8xf32>
    %288 = arith.subf %284, %287 : vector<1x8x8xf32>
    %289 = math.exp %288 : vector<1x8x8xf32>
    %cst_215 = arith.constant dense<0.000000e+00> : vector<1x8xf32>
    %290 = vector.multi_reduction <add>, %289, %cst_215 [2] : vector<1x8x8xf32> to vector<1x8xf32>
    %291 = vector.shape_cast %290 : vector<1x8xf32> to vector<1x8x1xf32>
    %292 = tpu.reciprocal %291 {approx = true} : vector<1x8x1xf32> -> vector<1x8x1xf32>
    %293 = vector.broadcast %292 : vector<1x8x1xf32> to vector<1x8x8xf32>
    %294 = arith.mulf %289, %293 : vector<1x8x8xf32>
    %295 = arith.truncf %294 : vector<1x8x8xf32> to vector<1x8x8xbf16>
    "tpu.trace_start"() <{level = 10 : i32, message = "bqk,bkd->bqd"}> : () -> ()
    %cst_216 = arith.constant dense<0.000000e+00> : vector<1x8x16xf32>
    %296 = tpu.matmul %295, %281, %cst_216 {dimension_numbers = #tpu.dot_dimension_numbers<[2], [1], [1], [2], [0, 0, 0, 1, 1, 2], [0], [0]>} : vector<1x8x8xbf16>, vector<1x8x16xbf16>, vector<1x8x16xf32> -> vector<1x8x16xf32>
    "tpu.trace_stop"() : () -> ()
    %297 = vector.shape_cast %296 : vector<1x8x16xf32> to vector<8x16xf32>
    %298 = arith.truncf %297 : vector<8x16xf32> to vector<8x16xbf16>
    %c1_217 = arith.constant 1 : index
    %c1_218 = arith.constant 1 : index
    %c0_219 = arith.constant 0 : index
    %c0_220 = arith.constant 0 : index
    %299 = vector.load %arg9[%c1_217, %c1_218, %c0_219, %c0_220] : memref<2x2x16x32xbf16, #tpu.memory_space<vmem>>, vector<1x1x16x32xbf16>
    %300 = vector.shape_cast %299 : vector<1x1x16x32xbf16> to vector<16x32xbf16>
    %cst_221 = arith.constant dense<0.000000e+00> : vector<8x32xf32>
    %301 = tpu.matmul %298, %300, %cst_221 {dimension_numbers = #tpu.dot_dimension_numbers<[1], [0], [0], [1], [0, 0, 1, 1], [], []>} : vector<8x16xbf16>, vector<16x32xbf16>, vector<8x32xf32> -> vector<8x32xf32>
    %302 = arith.addf %254, %301 : vector<8x32xf32>
    %c1_222 = arith.constant 1 : index
    %c0_223 = arith.constant 0 : index
    %c0_224 = arith.constant 0 : index
    %303 = vector.load %arg7[%c1_222, %c0_223, %c0_224] : memref<2x3x32xf32, #tpu.memory_space<vmem>>, vector<1x1x32xf32>
    %304 = vector.shape_cast %303 : vector<1x1x32xf32> to vector<1x32xf32>
    %305 = vector.broadcast %304 : vector<1x32xf32> to vector<8x32xf32>
    %306 = arith.addf %302, %305 : vector<8x32xf32>
    %307 = arith.addf %205, %306 : vector<8x32xf32>
    %c1_225 = arith.constant 1 : index
    %c2_226 = arith.constant 2 : index
    %c0_227 = arith.constant 0 : index
    %308 = vector.load %arg5[%c1_225, %c2_226, %c0_227] : memref<2x4x32xf32, #tpu.memory_space<vmem>>, vector<1x1x32xf32>
    %309 = vector.shape_cast %308 : vector<1x1x32xf32> to vector<1x32xf32>
    %c1_228 = arith.constant 1 : index
    %c3_229 = arith.constant 3 : index
    %c0_230 = arith.constant 0 : index
    %310 = vector.load %arg5[%c1_228, %c3_229, %c0_230] : memref<2x4x32xf32, #tpu.memory_space<vmem>>, vector<1x1x32xf32>
    %311 = vector.shape_cast %310 : vector<1x1x32xf32> to vector<1x32xf32>
    %cst_231 = arith.constant dense<0.000000e+00> : vector<8xf32>
    %312 = vector.multi_reduction <add>, %307, %cst_231 [1] : vector<8x32xf32> to vector<8xf32>
    %313 = vector.shape_cast %312 : vector<8xf32> to vector<8x1xf32>
    %cst_232 = arith.constant 3.200000e+01 : f32
    %314 = vector.broadcast %cst_232 : f32 to vector<8x1xf32>
    %315 = arith.divf %313, %314 : vector<8x1xf32>
    %316 = vector.broadcast %315 : vector<8x1xf32> to vector<8x32xf32>
    %317 = arith.subf %307, %316 : vector<8x32xf32>
    %318 = arith.mulf %317, %317 : vector<8x32xf32>
    %cst_233 = arith.constant dense<0.000000e+00> : vector<8xf32>
    %319 = vector.multi_reduction <add>, %318, %cst_233 [1] : vector<8x32xf32> to vector<8xf32>
    %320 = vector.shape_cast %319 : vector<8xf32> to vector<8x1xf32>
    %cst_234 = arith.constant 3.200000e+01 : f32
    %321 = vector.broadcast %cst_234 : f32 to vector<8x1xf32>
    %322 = arith.divf %320, %321 : vector<8x1xf32>
    %323 = vector.broadcast %315 : vector<8x1xf32> to vector<8x32xf32>
    %324 = arith.subf %307, %323 : vector<8x32xf32>
    %cst_235 = arith.constant 9.99999993E-9 : f32
    %325 = vector.broadcast %cst_235 : f32 to vector<8x1xf32>
    %326 = arith.addf %322, %325 : vector<8x1xf32>
    %327 = math.rsqrt %326 : vector<8x1xf32>
    %328 = vector.broadcast %327 : vector<8x1xf32> to vector<8x32xf32>
    %329 = arith.mulf %324, %328 : vector<8x32xf32>
    %330 = vector.broadcast %309 : vector<1x32xf32> to vector<8x32xf32>
    %331 = arith.mulf %329, %330 : vector<8x32xf32>
    %332 = vector.broadcast %311 : vector<1x32xf32> to vector<8x32xf32>
    %333 = arith.addf %331, %332 : vector<8x32xf32>
    %334 = arith.truncf %333 : vector<8x32xf32> to vector<8x32xbf16>
    %c1_236 = arith.constant 1 : index
    %c0_237 = arith.constant 0 : index
    %c0_238 = arith.constant 0 : index
    %c0_239 = arith.constant 0 : index
    %335 = vector.load %arg10[%c1_236, %c0_237, %c0_238, %c0_239] : memref<2x2x32x32xbf16, #tpu.memory_space<vmem>>, vector<1x1x32x32xbf16>
    %336 = vector.shape_cast %335 : vector<1x1x32x32xbf16> to vector<32x32xbf16>
    %cst_240 = arith.constant dense<0.000000e+00> : vector<8x32xf32>
    %337 = tpu.matmul %334, %336, %cst_240 {dimension_numbers = #tpu.dot_dimension_numbers<[1], [0], [0], [1], [0, 0, 1, 1], [], []>} : vector<8x32xbf16>, vector<32x32xbf16>, vector<8x32xf32> -> vector<8x32xf32>
    %c1_241 = arith.constant 1 : index
    %c1_242 = arith.constant 1 : index
    %c0_243 = arith.constant 0 : index
    %338 = vector.load %arg7[%c1_241, %c1_242, %c0_243] : memref<2x3x32xf32, #tpu.memory_space<vmem>>, vector<1x1x32xf32>
    %339 = vector.shape_cast %338 : vector<1x1x32xf32> to vector<1x32xf32>
    %340 = vector.broadcast %339 : vector<1x32xf32> to vector<8x32xf32>
    %341 = arith.addf %337, %340 : vector<8x32xf32>
    %cst_244 = arith.constant 0.000000e+00 : f32
    %342 = vector.broadcast %cst_244 : f32 to vector<8x32xf32>
    %343 = arith.maximumf %341, %342 : vector<8x32xf32>
    %344 = arith.truncf %343 : vector<8x32xf32> to vector<8x32xbf16>
    %c1_245 = arith.constant 1 : index
    %c1_246 = arith.constant 1 : index
    %c0_247 = arith.constant 0 : index
    %c0_248 = arith.constant 0 : index
    %345 = vector.load %arg10[%c1_245, %c1_246, %c0_247, %c0_248] : memref<2x2x32x32xbf16, #tpu.memory_space<vmem>>, vector<1x1x32x32xbf16>
    %346 = vector.shape_cast %345 : vector<1x1x32x32xbf16> to vector<32x32xbf16>
    %cst_249 = arith.constant dense<0.000000e+00> : vector<8x32xf32>
    %347 = tpu.matmul %344, %346, %cst_249 {dimension_numbers = #tpu.dot_dimension_numbers<[1], [0], [0], [1], [0, 0, 1, 1], [], []>} : vector<8x32xbf16>, vector<32x32xbf16>, vector<8x32xf32> -> vector<8x32xf32>
    %c1_250 = arith.constant 1 : index
    %c2_251 = arith.constant 2 : index
    %c0_252 = arith.constant 0 : index
    %348 = vector.load %arg7[%c1_250, %c2_251, %c0_252] : memref<2x3x32xf32, #tpu.memory_space<vmem>>, vector<1x1x32xf32>
    %349 = vector.shape_cast %348 : vector<1x1x32xf32> to vector<1x32xf32>
    %350 = vector.broadcast %349 : vector<1x32xf32> to vector<8x32xf32>
    %351 = arith.addf %347, %350 : vector<8x32xf32>
    %352 = arith.addf %351, %333 : vector<8x32xf32>
    %353 = vector.broadcast %0 : vector<8x1xf32> to vector<8x32xf32>
    %354 = arith.mulf %352, %353 : vector<8x32xf32>
    %c0_253 = arith.constant 0 : index
    %c0_254 = arith.constant 0 : index
    %355 = vector.load %arg4[%c0_253, %c0_254] : memref<2x32xf32, #tpu.memory_space<vmem>>, vector<1x32xf32>
    %c1_255 = arith.constant 1 : index
    %c0_256 = arith.constant 0 : index
    %356 = vector.load %arg4[%c1_255, %c0_256] : memref<2x32xf32, #tpu.memory_space<vmem>>, vector<1x32xf32>
    %cst_257 = arith.constant dense<0.000000e+00> : vector<8xf32>
    %357 = vector.multi_reduction <add>, %354, %cst_257 [1] : vector<8x32xf32> to vector<8xf32>
    %358 = vector.shape_cast %357 : vector<8xf32> to vector<8x1xf32>
    %cst_258 = arith.constant 3.200000e+01 : f32
    %359 = vector.broadcast %cst_258 : f32 to vector<8x1xf32>
    %360 = arith.divf %358, %359 : vector<8x1xf32>
    %361 = vector.broadcast %360 : vector<8x1xf32> to vector<8x32xf32>
    %362 = arith.subf %354, %361 : vector<8x32xf32>
    %363 = arith.mulf %362, %362 : vector<8x32xf32>
    %cst_259 = arith.constant dense<0.000000e+00> : vector<8xf32>
    %364 = vector.multi_reduction <add>, %363, %cst_259 [1] : vector<8x32xf32> to vector<8xf32>
    %365 = vector.shape_cast %364 : vector<8xf32> to vector<8x1xf32>
    %cst_260 = arith.constant 3.200000e+01 : f32
    %366 = vector.broadcast %cst_260 : f32 to vector<8x1xf32>
    %367 = arith.divf %365, %366 : vector<8x1xf32>
    %368 = vector.broadcast %360 : vector<8x1xf32> to vector<8x32xf32>
    %369 = arith.subf %354, %368 : vector<8x32xf32>
    %cst_261 = arith.constant 9.99999993E-9 : f32
    %370 = vector.broadcast %cst_261 : f32 to vector<8x1xf32>
    %371 = arith.addf %367, %370 : vector<8x1xf32>
    %372 = math.rsqrt %371 : vector<8x1xf32>
    %373 = vector.broadcast %372 : vector<8x1xf32> to vector<8x32xf32>
    %374 = arith.mulf %369, %373 : vector<8x32xf32>
    %375 = vector.broadcast %355 : vector<1x32xf32> to vector<8x32xf32>
    %376 = arith.mulf %374, %375 : vector<8x32xf32>
    %377 = vector.broadcast %356 : vector<1x32xf32> to vector<8x32xf32>
    %378 = arith.addf %376, %377 : vector<8x32xf32>
    %c0_262 = arith.constant 0 : index
    %c0_263 = arith.constant 0 : index
    %379 = vector.load %arg11[%c0_262, %c0_263] : memref<8x32xf32, #tpu.memory_space<vmem>>, vector<8x32xf32>
    tpu.vector_store %arg11[%c0_262, %c0_263], %378 {strides = array<i32>} : memref<8x32xf32, #tpu.memory_space<vmem>>, vector<8x32xf32>,
    return
  }
  func.func @transform_0(%arg0: i32) -> (i32, i32) {
    %c0_i32 = arith.constant 0 : i32
    %c0_i32_0 = arith.constant 0 : i32
    return %arg0, %c0_i32 : i32, i32
  }
  func.func @transform_1(%arg0: i32) -> (i32, i32) {
    %c0_i32 = arith.constant 0 : i32
    %c0_i32_0 = arith.constant 0 : i32
    return %arg0, %c0_i32 : i32, i32
  }
  func.func @transform_2(%arg0: i32) -> (i32, i32) {
    %c0_i32 = arith.constant 0 : i32
    %c0_i32_0 = arith.constant 0 : i32
    %c0_i32_1 = arith.constant 0 : i32
    return %c0_i32, %c0_i32_0 : i32, i32
  }
  func.func @transform_3(%arg0: i32) -> (i32, i32) {
    %c0_i32 = arith.constant 0 : i32
    %c0_i32_0 = arith.constant 0 : i32
    %c0_i32_1 = arith.constant 0 : i32
    return %c0_i32, %c0_i32_0 : i32, i32
  }
  func.func @transform_4(%arg0: i32) -> (i32, i32, i32) {
    %c0_i32 = arith.constant 0 : i32
    %c0_i32_0 = arith.constant 0 : i32
    %c0_i32_1 = arith.constant 0 : i32
    %c0_i32_2 = arith.constant 0 : i32
    return %c0_i32, %c0_i32_0, %c0_i32_1 : i32, i32, i32
  }
  func.func @transform_5(%arg0: i32) -> (i32, i32, i32, i32, i32) {
    %c0_i32 = arith.constant 0 : i32
    %c0_i32_0 = arith.constant 0 : i32
    %c0_i32_1 = arith.constant 0 : i32
    %c0_i32_2 = arith.constant 0 : i32
    %c0_i32_3 = arith.constant 0 : i32
    %c0_i32_4 = arith.constant 0 : i32
    return %c0_i32, %c0_i32_0, %c0_i32_1, %c0_i32_2, %c0_i32_3 : i32, i32, i32, i32, i32
  }
  func.func @transform_6(%arg0: i32) -> (i32, i32, i32) {
    %c0_i32 = arith.constant 0 : i32
    %c0_i32_0 = arith.constant 0 : i32
    %c0_i32_1 = arith.constant 0 : i32
    %c0_i32_2 = arith.constant 0 : i32
    return %c0_i32, %c0_i32_0, %c0_i32_1 : i32, i32, i32
  }
  func.func @transform_7(%arg0: i32) -> (i32, i32, i32, i32, i32) {
    %c0_i32 = arith.constant 0 : i32
    %c0_i32_0 = arith.constant 0 : i32
    %c0_i32_1 = arith.constant 0 : i32
    %c0_i32_2 = arith.constant 0 : i32
    %c0_i32_3 = arith.constant 0 : i32
    %c0_i32_4 = arith.constant 0 : i32
    return %c0_i32, %c0_i32_0, %c0_i32_1, %c0_i32_2, %c0_i32_3 : i32, i32, i32, i32, i32
  }
  func.func @transform_8(%arg0: i32) -> (i32, i32, i32, i32) {
    %c0_i32 = arith.constant 0 : i32
    %c0_i32_0 = arith.constant 0 : i32
    %c0_i32_1 = arith.constant 0 : i32
    %c0_i32_2 = arith.constant 0 : i32
    %c0_i32_3 = arith.constant 0 : i32
    return %c0_i32, %c0_i32_0, %c0_i32_1, %c0_i32_2 : i32, i32, i32, i32
  }
  func.func @transform_9(%arg0: i32) -> (i32, i32, i32, i32) {
    %c0_i32 = arith.constant 0 : i32
    %c0_i32_0 = arith.constant 0 : i32
    %c0_i32_1 = arith.constant 0 : i32
    %c0_i32_2 = arith.constant 0 : i32
    %c0_i32_3 = arith.constant 0 : i32
    return %c0_i32, %c0_i32_0, %c0_i32_1, %c0_i32_2 : i32, i32, i32, i32
  }
  func.func @transform_10(%arg0: i32) -> (i32, i32) {
    %c0_i32 = arith.constant 0 : i32
    %c0_i32_0 = arith.constant 0 : i32
    return %arg0, %c0_i32 : i32, i32
  }
}

module attributes {stable_mosaic.version = 11 : i64} {
  func.func @fused_sasrec_kernel(%arg0: i32, %arg1: memref<8x32xf32, #tpu.memory_space<vmem>>, %arg2: memref<8x1xf32, #tpu.memory_space<vmem>>, %arg3: memref<8x8xf32, #tpu.memory_space<vmem>>, %arg4: memref<2x32xf32, #tpu.memory_space<vmem>>, %arg5: memref<2x4x32xf32, #tpu.memory_space<vmem>>, %arg6: memref<2x3x2x1x16xf32, #tpu.memory_space<vmem>>, %arg7: memref<2x3x32xf32, #tpu.memory_space<vmem>>, %arg8: memref<2x3x2x32x16xbf16, #tpu.memory_space<vmem>>, %arg9: memref<2x2x16x32xbf16, #tpu.memory_space<vmem>>, %arg10: memref<2x2x32x32xbf16, #tpu.memory_space<vmem>>, %arg11: memref<8x32xf32, #tpu.memory_space<vmem>>) attributes {dimension_semantics = [#tpu.dimension_semantics<parallel>], iteration_bounds = array<i64: 2>, scalar_prefetch = 0 : i64, scratch_operands = 0 : i64, tpu.core_type = #tpu.core_type<tc>, window_params = [{transform_indices = @transform_0, window_bounds = array<i64: 8, 32>}, {transform_indices = @transform_1, window_bounds = array<i64: 8, 1>}, {pipeline_mode = #tpu.pipeline_mode<synchronous>, transform_indices = @transform_2, window_bounds = array<i64: 8, 8>}, {pipeline_mode = #tpu.pipeline_mode<synchronous>, transform_indices = @transform_3, window_bounds = array<i64: 2, 32>}, {pipeline_mode = #tpu.pipeline_mode<synchronous>, transform_indices = @transform_4, window_bounds = array<i64: 2, 4, 32>}, {pipeline_mode = #tpu.pipeline_mode<synchronous>, transform_indices = @transform_5, window_bounds = array<i64: 2, 3, 2, 1, 16>}, {pipeline_mode = #tpu.pipeline_mode<synchronous>, transform_indices = @transform_6, window_bounds = array<i64: 2, 3, 32>}, {pipeline_mode = #tpu.pipeline_mode<synchronous>, transform_indices = @transform_7, window_bounds = array<i64: 2, 3, 2, 32, 16>}, {pipeline_mode = #tpu.pipeline_mode<synchronous>, transform_indices = @transform_8, window_bounds = array<i64: 2, 2, 16, 32>}, {pipeline_mode = #tpu.pipeline_mode<synchronous>, transform_indices = @transform_9, window_bounds = array<i64: 2, 2, 32, 32>}, {transform_indices = @transform_10, window_bounds = array<i64: 8, 32>}]} {
    %c0 = arith.constant 0 : index
    %c0_0 = arith.constant 0 : index
    %0 = vector.load %arg2[%c0, %c0_0] : memref<8x1xf32, #tpu.memory_space<vmem>>, vector<8x1xf32>
    %c0_1 = arith.constant 0 : index
    %c0_2 = arith.constant 0 : index
    %1 = vector.load %arg3[%c0_1, %c0_2] : memref<8x8xf32, #tpu.memory_space<vmem>>, vector<8x8xf32>
    %c0_3 = arith.constant 0 : index
    %c0_4 = arith.constant 0 : index
    %2 = vector.load %arg1[%c0_3, %c0_4] : memref<8x32xf32, #tpu.memory_space<vmem>>, vector<8x32xf32>
    %3 = vector.broadcast %0 : vector<8x1xf32> to vector<8x32xf32>
    %4 = arith.mulf %2, %3 : vector<8x32xf32>
    %c0_5 = arith.constant 0 : index
    %c0_6 = arith.constant 0 : index
    %c0_7 = arith.constant 0 : index
    %5 = vector.load %arg5[%c0_5, %c0_6, %c0_7] : memref<2x4x32xf32, #tpu.memory_space<vmem>>, vector<1x1x32xf32>
    %6 = vector.shape_cast %5 : vector<1x1x32xf32> to vector<1x32xf32>
    %c0_8 = arith.constant 0 : index
    %c1 = arith.constant 1 : index
    %c0_9 = arith.constant 0 : index
    %7 = vector.load %arg5[%c0_8, %c1, %c0_9] : memref<2x4x32xf32, #tpu.memory_space<vmem>>, vector<1x1x32xf32>
    %8 = vector.shape_cast %7 : vector<1x1x32xf32> to vector<1x32xf32>
    %cst = arith.constant dense<0.000000e+00> : vector<8xf32>
    %9 = vector.multi_reduction <add>, %4, %cst [1] : vector<8x32xf32> to vector<8xf32>
    %10 = vector.shape_cast %9 : vector<8xf32> to vector<8x1xf32>
    %cst_10 = arith.constant 3.200000e+01 : f32
    %11 = vector.broadcast %cst_10 : f32 to vector<8x1xf32>
    %12 = arith.divf %10, %11 : vector<8x1xf32>
    %13 = vector.broadcast %12 : vector<8x1xf32> to vector<8x32xf32>
    %14 = arith.subf %4, %13 : vector<8x32xf32>
    %15 = arith.mulf %14, %14 : vector<8x32xf32>
    %cst_11 = arith.constant dense<0.000000e+00> : vector<8xf32>
    %16 = vector.multi_reduction <add>, %15, %cst_11 [1] : vector<8x32xf32> to vector<8xf32>
    %17 = vector.shape_cast %16 : vector<8xf32> to vector<8x1xf32>
    %cst_12 = arith.constant 3.200000e+01 : f32
    %18 = vector.broadcast %cst_12 : f32 to vector<8x1xf32>
    %19 = arith.divf %17, %18 : vector<8x1xf32>
    %20 = vector.broadcast %12 : vector<8x1xf32> to vector<8x32xf32>
    %21 = arith.subf %4, %20 : vector<8x32xf32>
    %cst_13 = arith.constant 9.99999993E-9 : f32
    %22 = vector.broadcast %cst_13 : f32 to vector<8x1xf32>
    %23 = arith.addf %19, %22 : vector<8x1xf32>
    %24 = math.rsqrt %23 : vector<8x1xf32>
    %25 = vector.broadcast %24 : vector<8x1xf32> to vector<8x32xf32>
    %26 = arith.mulf %21, %25 : vector<8x32xf32>
    %27 = vector.broadcast %6 : vector<1x32xf32> to vector<8x32xf32>
    %28 = arith.mulf %26, %27 : vector<8x32xf32>
    %29 = vector.broadcast %8 : vector<1x32xf32> to vector<8x32xf32>
    %30 = arith.addf %28, %29 : vector<8x32xf32>
    %31 = arith.truncf %30 : vector<8x32xf32> to vector<8x32xbf16>
    %32 = arith.truncf %4 : vector<8x32xf32> to vector<8x32xbf16>
    %c0_14 = arith.constant 0 : index
    %c0_15 = arith.constant 0 : index
    %c0_16 = arith.constant 0 : index
    %c0_17 = arith.constant 0 : index
    %c0_18 = arith.constant 0 : index
    %33 = vector.load %arg8[%c0_14, %c0_15, %c0_16, %c0_17, %c0_18] : memref<2x3x2x32x16xbf16, #tpu.memory_space<vmem>>, vector<1x1x1x32x16xbf16>
    %34 = vector.shape_cast %33 : vector<1x1x1x32x16xbf16> to vector<32x16xbf16>
    %cst_19 = arith.constant dense<0.000000e+00> : vector<8x16xf32>
    %35 = tpu.matmul %31, %34, %cst_19 {dimension_numbers = #tpu.dot_dimension_numbers<[1], [0], [0], [1], [0, 0, 1, 1], [], []>} : vector<8x32xbf16>, vector<32x16xbf16>, vector<8x16xf32> -> vector<8x16xf32>
    %c0_20 = arith.constant 0 : index
    %c0_21 = arith.constant 0 : index
    %c0_22 = arith.constant 0 : index
    %c0_23 = arith.constant 0 : index
    %c0_24 = arith.constant 0 : index
    %36 = vector.load %arg6[%c0_20, %c0_21, %c0_22, %c0_23, %c0_24] : memref<2x3x2x1x16xf32, #tpu.memory_space<vmem>>, vector<1x1x1x1x16xf32>
    %37 = vector.shape_cast %36 : vector<1x1x1x1x16xf32> to vector<1x16xf32>
    %38 = vector.broadcast %37 : vector<1x16xf32> to vector<8x16xf32>
    %39 = arith.addf %35, %38 : vector<8x16xf32>
    %c0_25 = arith.constant 0 : index
    %c1_26 = arith.constant 1 : index
    %c0_27 = arith.constant 0 : index
    %c0_28 = arith.constant 0 : index
    %c0_29 = arith.constant 0 : index
    %40 = vector.load %arg8[%c0_25, %c1_26, %c0_27, %c0_28, %c0_29] : memref<2x3x2x32x16xbf16, #tpu.memory_space<vmem>>, vector<1x1x1x32x16xbf16>
    %41 = vector.shape_cast %40 : vector<1x1x1x32x16xbf16> to vector<32x16xbf16>
    %cst_30 = arith.constant dense<0.000000e+00> : vector<8x16xf32>
    %42 = tpu.matmul %32, %41, %cst_30 {dimension_numbers = #tpu.dot_dimension_numbers<[1], [0], [0], [1], [0, 0, 1, 1], [], []>} : vector<8x32xbf16>, vector<32x16xbf16>, vector<8x16xf32> -> vector<8x16xf32>
    %c0_31 = arith.constant 0 : index
    %c1_32 = arith.constant 1 : index
    %c0_33 = arith.constant 0 : index
    %c0_34 = arith.constant 0 : index
    %c0_35 = arith.constant 0 : index
    %43 = vector.load %arg6[%c0_31, %c1_32, %c0_33, %c0_34, %c0_35] : memref<2x3x2x1x16xf32, #tpu.memory_space<vmem>>, vector<1x1x1x1x16xf32>
    %44 = vector.shape_cast %43 : vector<1x1x1x1x16xf32> to vector<1x16xf32>
    %45 = vector.broadcast %44 : vector<1x16xf32> to vector<8x16xf32>
    %46 = arith.addf %42, %45 : vector<8x16xf32>
    %c0_36 = arith.constant 0 : index
    %c2 = arith.constant 2 : index
    %c0_37 = arith.constant 0 : index
    %c0_38 = arith.constant 0 : index
    %c0_39 = arith.constant 0 : index
    %47 = vector.load %arg8[%c0_36, %c2, %c0_37, %c0_38, %c0_39] : memref<2x3x2x32x16xbf16, #tpu.memory_space<vmem>>, vector<1x1x1x32x16xbf16>
    %48 = vector.shape_cast %47 : vector<1x1x1x32x16xbf16> to vector<32x16xbf16>
    %cst_40 = arith.constant dense<0.000000e+00> : vector<8x16xf32>
    %49 = tpu.matmul %32, %48, %cst_40 {dimension_numbers = #tpu.dot_dimension_numbers<[1], [0], [0], [1], [0, 0, 1, 1], [], []>} : vector<8x32xbf16>, vector<32x16xbf16>, vector<8x16xf32> -> vector<8x16xf32>
    %c0_41 = arith.constant 0 : index
    %c2_42 = arith.constant 2 : index
    %c0_43 = arith.constant 0 : index
    %c0_44 = arith.constant 0 : index
    %c0_45 = arith.constant 0 : index
    %50 = vector.load %arg6[%c0_41, %c2_42, %c0_43, %c0_44, %c0_45] : memref<2x3x2x1x16xf32, #tpu.memory_space<vmem>>, vector<1x1x1x1x16xf32>
    %51 = vector.shape_cast %50 : vector<1x1x1x1x16xf32> to vector<1x16xf32>
    %52 = vector.broadcast %51 : vector<1x16xf32> to vector<8x16xf32>
    %53 = arith.addf %49, %52 : vector<8x16xf32>
    %54 = vector.shape_cast %39 : vector<8x16xf32> to vector<1x8x16xf32>
    %55 = arith.truncf %54 : vector<1x8x16xf32> to vector<1x8x16xbf16>
    %56 = vector.shape_cast %46 : vector<8x16xf32> to vector<1x8x16xf32>
    %57 = arith.truncf %56 : vector<1x8x16xf32> to vector<1x8x16xbf16>
    %58 = vector.shape_cast %53 : vector<8x16xf32> to vector<1x8x16xf32>
    %59 = arith.truncf %58 : vector<1x8x16xf32> to vector<1x8x16xbf16>
    "tpu.trace_start"() <{level = 10 : i32, message = "bqd,bkd->bqk"}> : () -> ()
    %cst_46 = arith.constant dense<0.000000e+00> : vector<1x8x8xf32>
    %60 = tpu.matmul %55, %57, %cst_46 {dimension_numbers = #tpu.dot_dimension_numbers<[2], [2], [1], [1], [0, 0, 0, 1, 1, 1], [0], [0]>} : vector<1x8x16xbf16>, vector<1x8x16xbf16>, vector<1x8x8xf32> -> vector<1x8x8xf32>
    "tpu.trace_stop"() : () -> ()
    %61 = vector.shape_cast %1 : vector<8x8xf32> to vector<1x8x8xf32>
    %62 = arith.addf %60, %61 : vector<1x8x8xf32>
    %cst_47 = arith.constant dense<0xFF800000> : vector<1x8xf32>
    %63 = vector.multi_reduction <maximumf>, %62, %cst_47 [2] : vector<1x8x8xf32> to vector<1x8xf32>
    %64 = vector.shape_cast %63 : vector<1x8xf32> to vector<1x8x1xf32>
    %65 = vector.broadcast %64 : vector<1x8x1xf32> to vector<1x8x8xf32>
    %66 = arith.subf %62, %65 : vector<1x8x8xf32>
    %67 = math.exp %66 : vector<1x8x8xf32>
    %cst_48 = arith.constant dense<0.000000e+00> : vector<1x8xf32>
    %68 = vector.multi_reduction <add>, %67, %cst_48 [2] : vector<1x8x8xf32> to vector<1x8xf32>
    %69 = vector.shape_cast %68 : vector<1x8xf32> to vector<1x8x1xf32>
    %70 = tpu.reciprocal %69 {approx = true} : vector<1x8x1xf32> -> vector<1x8x1xf32>
    %71 = vector.broadcast %70 : vector<1x8x1xf32> to vector<1x8x8xf32>
    %72 = arith.mulf %67, %71 : vector<1x8x8xf32>
    %73 = arith.truncf %72 : vector<1x8x8xf32> to vector<1x8x8xbf16>
    "tpu.trace_start"() <{level = 10 : i32, message = "bqk,bkd->bqd"}> : () -> ()
    %cst_49 = arith.constant dense<0.000000e+00> : vector<1x8x16xf32>
    %74 = tpu.matmul %73, %59, %cst_49 {dimension_numbers = #tpu.dot_dimension_numbers<[2], [1], [1], [2], [0, 0, 0, 1, 1, 2], [0], [0]>} : vector<1x8x8xbf16>, vector<1x8x16xbf16>, vector<1x8x16xf32> -> vector<1x8x16xf32>
    "tpu.trace_stop"() : () -> ()
    %75 = vector.shape_cast %74 : vector<1x8x16xf32> to vector<8x16xf32>
    %76 = arith.truncf %75 : vector<8x16xf32> to vector<8x16xbf16>
    %c0_50 = arith.constant 0 : index
    %c0_51 = arith.constant 0 : index
    %c0_52 = arith.constant 0 : index
    %c0_53 = arith.constant 0 : index
    %77 = vector.load %arg9[%c0_50, %c0_51, %c0_52, %c0_53] : memref<2x2x16x32xbf16, #tpu.memory_space<vmem>>, vector<1x1x16x32xbf16>
    %78 = vector.shape_cast %77 : vector<1x1x16x32xbf16> to vector<16x32xbf16>
    %cst_54 = arith.constant dense<0.000000e+00> : vector<8x32xf32>
    %79 = tpu.matmul %76, %78, %cst_54 {dimension_numbers = #tpu.dot_dimension_numbers<[1], [0], [0], [1], [0, 0, 1, 1], [], []>} : vector<8x16xbf16>, vector<16x32xbf16>, vector<8x32xf32> -> vector<8x32xf32>
    %c0_55 = arith.constant 0 : index
    %c0_56 = arith.constant 0 : index
    %c1_57 = arith.constant 1 : index
    %c0_58 = arith.constant 0 : index
    %c0_59 = arith.constant 0 : index
    %80 = vector.load %arg8[%c0_55, %c0_56, %c1_57, %c0_58, %c0_59] : memref<2x3x2x32x16xbf16, #tpu.memory_space<vmem>>, vector<1x1x1x32x16xbf16>
    %81 = vector.shape_cast %80 : vector<1x1x1x32x16xbf16> to vector<32x16xbf16>
    %cst_60 = arith.constant dense<0.000000e+00> : vector<8x16xf32>
    %82 = tpu.matmul %31, %81, %cst_60 {dimension_numbers = #tpu.dot_dimension_numbers<[1], [0], [0], [1], [0, 0, 1, 1], [], []>} : vector<8x32xbf16>, vector<32x16xbf16>, vector<8x16xf32> -> vector<8x16xf32>
    %c0_61 = arith.constant 0 : index
    %c0_62 = arith.constant 0 : index
    %c1_63 = arith.constant 1 : index
    %c0_64 = arith.constant 0 : index
    %c0_65 = arith.constant 0 : index
    %83 = vector.load %arg6[%c0_61, %c0_62, %c1_63, %c0_64, %c0_65] : memref<2x3x2x1x16xf32, #tpu.memory_space<vmem>>, vector<1x1x1x1x16xf32>
    %84 = vector.shape_cast %83 : vector<1x1x1x1x16xf32> to vector<1x16xf32>
    %85 = vector.broadcast %84 : vector<1x16xf32> to vector<8x16xf32>
    %86 = arith.addf %82, %85 : vector<8x16xf32>
    %c0_66 = arith.constant 0 : index
    %c1_67 = arith.constant 1 : index
    %c1_68 = arith.constant 1 : index
    %c0_69 = arith.constant 0 : index
    %c0_70 = arith.constant 0 : index
    %87 = vector.load %arg8[%c0_66, %c1_67, %c1_68, %c0_69, %c0_70] : memref<2x3x2x32x16xbf16, #tpu.memory_space<vmem>>, vector<1x1x1x32x16xbf16>
    %88 = vector.shape_cast %87 : vector<1x1x1x32x16xbf16> to vector<32x16xbf16>
    %cst_71 = arith.constant dense<0.000000e+00> : vector<8x16xf32>
    %89 = tpu.matmul %32, %88, %cst_71 {dimension_numbers = #tpu.dot_dimension_numbers<[1], [0], [0], [1], [0, 0, 1, 1], [], []>} : vector<8x32xbf16>, vector<32x16xbf16>, vector<8x16xf32> -> vector<8x16xf32>
    %c0_72 = arith.constant 0 : index
    %c1_73 = arith.constant 1 : index
    %c1_74 = arith.constant 1 : index
    %c0_75 = arith.constant 0 : index
    %c0_76 = arith.constant 0 : index
    %90 = vector.load %arg6[%c0_72, %c1_73, %c1_74, %c0_75, %c0_76] : memref<2x3x2x1x16xf32, #tpu.memory_space<vmem>>, vector<1x1x1x1x16xf32>
    %91 = vector.shape_cast %90 : vector<1x1x1x1x16xf32> to vector<1x16xf32>
    %92 = vector.broadcast %91 : vector<1x16xf32> to vector<8x16xf32>
    %93 = arith.addf %89, %92 : vector<8x16xf32>
    %c0_77 = arith.constant 0 : index
    %c2_78 = arith.constant 2 : index
    %c1_79 = arith.constant 1 : index
    %c0_80 = arith.constant 0 : index
    %c0_81 = arith.constant 0 : index
    %94 = vector.load %arg8[%c0_77, %c2_78, %c1_79, %c0_80, %c0_81] : memref<2x3x2x32x16xbf16, #tpu.memory_space<vmem>>, vector<1x1x1x32x16xbf16>
    %95 = vector.shape_cast %94 : vector<1x1x1x32x16xbf16> to vector<32x16xbf16>
    %cst_82 = arith.constant dense<0.000000e+00> : vector<8x16xf32>
    %96 = tpu.matmul %32, %95, %cst_82 {dimension_numbers = #tpu.dot_dimension_numbers<[1], [0], [0], [1], [0, 0, 1, 1], [], []>} : vector<8x32xbf16>, vector<32x16xbf16>, vector<8x16xf32> -> vector<8x16xf32>
    %c0_83 = arith.constant 0 : index
    %c2_84 = arith.constant 2 : index
    %c1_85 = arith.constant 1 : index
    %c0_86 = arith.constant 0 : index
    %c0_87 = arith.constant 0 : index
    %97 = vector.load %arg6[%c0_83, %c2_84, %c1_85, %c0_86, %c0_87] : memref<2x3x2x1x16xf32, #tpu.memory_space<vmem>>, vector<1x1x1x1x16xf32>
    %98 = vector.shape_cast %97 : vector<1x1x1x1x16xf32> to vector<1x16xf32>
    %99 = vector.broadcast %98 : vector<1x16xf32> to vector<8x16xf32>
    %100 = arith.addf %96, %99 : vector<8x16xf32>
    %101 = vector.shape_cast %86 : vector<8x16xf32> to vector<1x8x16xf32>
    %102 = arith.truncf %101 : vector<1x8x16xf32> to vector<1x8x16xbf16>
    %103 = vector.shape_cast %93 : vector<8x16xf32> to vector<1x8x16xf32>
    %104 = arith.truncf %103 : vector<1x8x16xf32> to vector<1x8x16xbf16>
    %105 = vector.shape_cast %100 : vector<8x16xf32> to vector<1x8x16xf32>
    %106 = arith.truncf %105 : vector<1x8x16xf32> to vector<1x8x16xbf16>
    "tpu.trace_start"() <{level = 10 : i32, message = "bqd,bkd->bqk"}> : () -> ()
    %cst_88 = arith.constant dense<0.000000e+00> : vector<1x8x8xf32>
    %107 = tpu.matmul %102, %104, %cst_88 {dimension_numbers = #tpu.dot_dimension_numbers<[2], [2], [1], [1], [0, 0, 0, 1, 1, 1], [0], [0]>} : vector<1x8x16xbf16>, vector<1x8x16xbf16>, vector<1x8x8xf32> -> vector<1x8x8xf32>
    "tpu.trace_stop"() : () -> ()
    %108 = vector.shape_cast %1 : vector<8x8xf32> to vector<1x8x8xf32>
    %109 = arith.addf %107, %108 : vector<1x8x8xf32>
    %cst_89 = arith.constant dense<0xFF800000> : vector<1x8xf32>
    %110 = vector.multi_reduction <maximumf>, %109, %cst_89 [2] : vector<1x8x8xf32> to vector<1x8xf32>
    %111 = vector.shape_cast %110 : vector<1x8xf32> to vector<1x8x1xf32>
    %112 = vector.broadcast %111 : vector<1x8x1xf32> to vector<1x8x8xf32>
    %113 = arith.subf %109, %112 : vector<1x8x8xf32>
    %114 = math.exp %113 : vector<1x8x8xf32>
    %cst_90 = arith.constant dense<0.000000e+00> : vector<1x8xf32>
    %115 = vector.multi_reduction <add>, %114, %cst_90 [2] : vector<1x8x8xf32> to vector<1x8xf32>
    %116 = vector.shape_cast %115 : vector<1x8xf32> to vector<1x8x1xf32>
    %117 = tpu.reciprocal %116 {approx = true} : vector<1x8x1xf32> -> vector<1x8x1xf32>
    %118 = vector.broadcast %117 : vector<1x8x1xf32> to vector<1x8x8xf32>
    %119 = arith.mulf %114, %118 : vector<1x8x8xf32>
    %120 = arith.truncf %119 : vector<1x8x8xf32> to vector<1x8x8xbf16>
    "tpu.trace_start"() <{level = 10 : i32, message = "bqk,bkd->bqd"}> : () -> ()
    %cst_91 = arith.constant dense<0.000000e+00> : vector<1x8x16xf32>
    %121 = tpu.matmul %120, %106, %cst_91 {dimension_numbers = #tpu.dot_dimension_numbers<[2], [1], [1], [2], [0, 0, 0, 1, 1, 2], [0], [0]>} : vector<1x8x8xbf16>, vector<1x8x16xbf16>, vector<1x8x16xf32> -> vector<1x8x16xf32>
    "tpu.trace_stop"() : () -> ()
    %122 = vector.shape_cast %121 : vector<1x8x16xf32> to vector<8x16xf32>
    %123 = arith.truncf %122 : vector<8x16xf32> to vector<8x16xbf16>
    %c0_92 = arith.constant 0 : index
    %c1_93 = arith.constant 1 : index
    %c0_94 = arith.constant 0 : index
    %c0_95 = arith.constant 0 : index
    %124 = vector.load %arg9[%c0_92, %c1_93, %c0_94, %c0_95] : memref<2x2x16x32xbf16, #tpu.memory_space<vmem>>, vector<1x1x16x32xbf16>
    %125 = vector.shape_cast %124 : vector<1x1x16x32xbf16> to vector<16x32xbf16>
    %cst_96 = arith.constant dense<0.000000e+00> : vector<8x32xf32>
    %126 = tpu.matmul %123, %125, %cst_96 {dimension_numbers = #tpu.dot_dimension_numbers<[1], [0], [0], [1], [0, 0, 1, 1], [], []>} : vector<8x16xbf16>, vector<16x32xbf16>, vector<8x32xf32> -> vector<8x32xf32>
    %127 = arith.addf %79, %126 : vector<8x32xf32>
    %c0_97 = arith.constant 0 : index
    %c0_98 = arith.constant 0 : index
    %c0_99 = arith.constant 0 : index
    %128 = vector.load %arg7[%c0_97, %c0_98, %c0_99] : memref<2x3x32xf32, #tpu.memory_space<vmem>>, vector<1x1x32xf32>
    %129 = vector.shape_cast %128 : vector<1x1x32xf32> to vector<1x32xf32>
    %130 = vector.broadcast %129 : vector<1x32xf32> to vector<8x32xf32>
    %131 = arith.addf %127, %130 : vector<8x32xf32>
    %132 = arith.addf %30, %131 : vector<8x32xf32>
    %c0_100 = arith.constant 0 : index
    %c2_101 = arith.constant 2 : index
    %c0_102 = arith.constant 0 : index
    %133 = vector.load %arg5[%c0_100, %c2_101, %c0_102] : memref<2x4x32xf32, #tpu.memory_space<vmem>>, vector<1x1x32xf32>
    %134 = vector.shape_cast %133 : vector<1x1x32xf32> to vector<1x32xf32>
    %c0_103 = arith.constant 0 : index
    %c3 = arith.constant 3 : index
    %c0_104 = arith.constant 0 : index
    %135 = vector.load %arg5[%c0_103, %c3, %c0_104] : memref<2x4x32xf32, #tpu.memory_space<vmem>>, vector<1x1x32xf32>
    %136 = vector.shape_cast %135 : vector<1x1x32xf32> to vector<1x32xf32>
    %cst_105 = arith.constant dense<0.000000e+00> : vector<8xf32>
    %137 = vector.multi_reduction <add>, %132, %cst_105 [1] : vector<8x32xf32> to vector<8xf32>
    %138 = vector.shape_cast %137 : vector<8xf32> to vector<8x1xf32>
    %cst_106 = arith.constant 3.200000e+01 : f32
    %139 = vector.broadcast %cst_106 : f32 to vector<8x1xf32>
    %140 = arith.divf %138, %139 : vector<8x1xf32>
    %141 = vector.broadcast %140 : vector<8x1xf32> to vector<8x32xf32>
    %142 = arith.subf %132, %141 : vector<8x32xf32>
    %143 = arith.mulf %142, %142 : vector<8x32xf32>
    %cst_107 = arith.constant dense<0.000000e+00> : vector<8xf32>
    %144 = vector.multi_reduction <add>, %143, %cst_107 [1] : vector<8x32xf32> to vector<8xf32>
    %145 = vector.shape_cast %144 : vector<8xf32> to vector<8x1xf32>
    %cst_108 = arith.constant 3.200000e+01 : f32
    %146 = vector.broadcast %cst_108 : f32 to vector<8x1xf32>
    %147 = arith.divf %145, %146 : vector<8x1xf32>
    %148 = vector.broadcast %140 : vector<8x1xf32> to vector<8x32xf32>
    %149 = arith.subf %132, %148 : vector<8x32xf32>
    %cst_109 = arith.constant 9.99999993E-9 : f32
    %150 = vector.broadcast %cst_109 : f32 to vector<8x1xf32>
    %151 = arith.addf %147, %150 : vector<8x1xf32>
    %152 = math.rsqrt %151 : vector<8x1xf32>
    %153 = vector.broadcast %152 : vector<8x1xf32> to vector<8x32xf32>
    %154 = arith.mulf %149, %153 : vector<8x32xf32>
    %155 = vector.broadcast %134 : vector<1x32xf32> to vector<8x32xf32>
    %156 = arith.mulf %154, %155 : vector<8x32xf32>
    %157 = vector.broadcast %136 : vector<1x32xf32> to vector<8x32xf32>
    %158 = arith.addf %156, %157 : vector<8x32xf32>
    %159 = arith.truncf %158 : vector<8x32xf32> to vector<8x32xbf16>
    %c0_110 = arith.constant 0 : index
    %c0_111 = arith.constant 0 : index
    %c0_112 = arith.constant 0 : index
    %c0_113 = arith.constant 0 : index
    %160 = vector.load %arg10[%c0_110, %c0_111, %c0_112, %c0_113] : memref<2x2x32x32xbf16, #tpu.memory_space<vmem>>, vector<1x1x32x32xbf16>
    %161 = vector.shape_cast %160 : vector<1x1x32x32xbf16> to vector<32x32xbf16>
    %cst_114 = arith.constant dense<0.000000e+00> : vector<8x32xf32>
    %162 = tpu.matmul %159, %161, %cst_114 {dimension_numbers = #tpu.dot_dimension_numbers<[1], [0], [0], [1], [0, 0, 1, 1], [], []>} : vector<8x32xbf16>, vector<32x32xbf16>, vector<8x32xf32> -> vector<8x32xf32>
    %c0_115 = arith.constant 0 : index
    %c1_116 = arith.constant 1 : index
    %c0_117 = arith.constant 0 : index
    %163 = vector.load %arg7[%c0_115, %c1_116, %c0_117] : memref<2x3x32xf32, #tpu.memory_space<vmem>>, vector<1x1x32xf32>
    %164 = vector.shape_cast %163 : vector<1x1x32xf32> to vector<1x32xf32>
    %165 = vector.broadcast %164 : vector<1x32xf32> to vector<8x32xf32>
    %166 = arith.addf %162, %165 : vector<8x32xf32>
    %cst_118 = arith.constant 0.000000e+00 : f32
    %167 = vector.broadcast %cst_118 : f32 to vector<8x32xf32>
    %168 = arith.maximumf %166, %167 : vector<8x32xf32>
    %169 = arith.truncf %168 : vector<8x32xf32> to vector<8x32xbf16>
    %c0_119 = arith.constant 0 : index
    %c1_120 = arith.constant 1 : index
    %c0_121 = arith.constant 0 : index
    %c0_122 = arith.constant 0 : index
    %170 = vector.load %arg10[%c0_119, %c1_120, %c0_121, %c0_122] : memref<2x2x32x32xbf16, #tpu.memory_space<vmem>>, vector<1x1x32x32xbf16>
    %171 = vector.shape_cast %170 : vector<1x1x32x32xbf16> to vector<32x32xbf16>
    %cst_123 = arith.constant dense<0.000000e+00> : vector<8x32xf32>
    %172 = tpu.matmul %169, %171, %cst_123 {dimension_numbers = #tpu.dot_dimension_numbers<[1], [0], [0], [1], [0, 0, 1, 1], [], []>} : vector<8x32xbf16>, vector<32x32xbf16>, vector<8x32xf32> -> vector<8x32xf32>
    %c0_124 = arith.constant 0 : index
    %c2_125 = arith.constant 2 : index
    %c0_126 = arith.constant 0 : index
    %173 = vector.load %arg7[%c0_124, %c2_125, %c0_126] : memref<2x3x32xf32, #tpu.memory_space<vmem>>, vector<1x1x32xf32>
    %174 = vector.shape_cast %173 : vector<1x1x32xf32> to vector<1x32xf32>
    %175 = vector.broadcast %174 : vector<1x32xf32> to vector<8x32xf32>
    %176 = arith.addf %172, %175 : vector<8x32xf32>
    %177 = arith.addf %176, %158 : vector<8x32xf32>
    %178 = vector.broadcast %0 : vector<8x1xf32> to vector<8x32xf32>
    %179 = arith.mulf %177, %178 : vector<8x32xf32>
    %c1_127 = arith.constant 1 : index
    %c0_128 = arith.constant 0 : index
    %c0_129 = arith.constant 0 : index
    %180 = vector.load %arg5[%c1_127, %c0_128, %c0_129] : memref<2x4x32xf32, #tpu.memory_space<vmem>>, vector<1x1x32xf32>
    %181 = vector.shape_cast %180 : vector<1x1x32xf32> to vector<1x32xf32>
    %c1_130 = arith.constant 1 : index
    %c1_131 = arith.constant 1 : index
    %c0_132 = arith.constant 0 : index
    %182 = vector.load %arg5[%c1_130, %c1_131, %c0_132] : memref<2x4x32xf32, #tpu.memory_space<vmem>>, vector<1x1x32xf32>
    %183 = vector.shape_cast %182 : vector<1x1x32xf32> to vector<1x32xf32>
    %cst_133 = arith.constant dense<0.000000e+00> : vector<8xf32>
    %184 = vector.multi_reduction <add>, %179, %cst_133 [1] : vector<8x32xf32> to vector<8xf32>
    %185 = vector.shape_cast %184 : vector<8xf32> to vector<8x1xf32>
    %cst_134 = arith.constant 3.200000e+01 : f32
    %186 = vector.broadcast %cst_134 : f32 to vector<8x1xf32>
    %187 = arith.divf %185, %186 : vector<8x1xf32>
    %188 = vector.broadcast %187 : vector<8x1xf32> to vector<8x32xf32>
    %189 = arith.subf %179, %188 : vector<8x32xf32>
    %190 = arith.mulf %189, %189 : vector<8x32xf32>
    %cst_135 = arith.constant dense<0.000000e+00> : vector<8xf32>
    %191 = vector.multi_reduction <add>, %190, %cst_135 [1] : vector<8x32xf32> to vector<8xf32>
    %192 = vector.shape_cast %191 : vector<8xf32> to vector<8x1xf32>
    %cst_136 = arith.constant 3.200000e+01 : f32
    %193 = vector.broadcast %cst_136 : f32 to vector<8x1xf32>
    %194 = arith.divf %192, %193 : vector<8x1xf32>
    %195 = vector.broadcast %187 : vector<8x1xf32> to vector<8x32xf32>
    %196 = arith.subf %179, %195 : vector<8x32xf32>
    %cst_137 = arith.constant 9.99999993E-9 : f32
    %197 = vector.broadcast %cst_137 : f32 to vector<8x1xf32>
    %198 = arith.addf %194, %197 : vector<8x1xf32>
    %199 = math.rsqrt %198 : vector<8x1xf32>
    %200 = vector.broadcast %199 : vector<8x1xf32> to vector<8x32xf32>
    %201 = arith.mulf %196, %200 : vector<8x32xf32>
    %202 = vector.broadcast %181 : vector<1x32xf32> to vector<8x32xf32>
    %203 = arith.mulf %201, %202 : vector<8x32xf32>
    %204 = vector.broadcast %183 : vector<1x32xf32> to vector<8x32xf32>
    %205 = arith.addf %203, %204 : vector<8x32xf32>
    %206 = arith.truncf %205 : vector<8x32xf32> to vector<8x32xbf16>
    %207 = arith.truncf %179 : vector<8x32xf32> to vector<8x32xbf16>
    %c1_138 = arith.constant 1 : index
    %c0_139 = arith.constant 0 : index
    %c0_140 = arith.constant 0 : index
    %c0_141 = arith.constant 0 : index
    %c0_142 = arith.constant 0 : index
    %208 = vector.load %arg8[%c1_138, %c0_139, %c0_140, %c0_141, %c0_142] : memref<2x3x2x32x16xbf16, #tpu.memory_space<vmem>>, vector<1x1x1x32x16xbf16>
    %209 = vector.shape_cast %208 : vector<1x1x1x32x16xbf16> to vector<32x16xbf16>
    %cst_143 = arith.constant dense<0.000000e+00> : vector<8x16xf32>
    %210 = tpu.matmul %206, %209, %cst_143 {dimension_numbers = #tpu.dot_dimension_numbers<[1], [0], [0], [1], [0, 0, 1, 1], [], []>} : vector<8x32xbf16>, vector<32x16xbf16>, vector<8x16xf32> -> vector<8x16xf32>
    %c1_144 = arith.constant 1 : index
    %c0_145 = arith.constant 0 : index
    %c0_146 = arith.constant 0 : index
    %c0_147 = arith.constant 0 : index
    %c0_148 = arith.constant 0 : index
    %211 = vector.load %arg6[%c1_144, %c0_145, %c0_146, %c0_147, %c0_148] : memref<2x3x2x1x16xf32, #tpu.memory_space<vmem>>, vector<1x1x1x1x16xf32>
    %212 = vector.shape_cast %211 : vector<1x1x1x1x16xf32> to vector<1x16xf32>
    %213 = vector.broadcast %212 : vector<1x16xf32> to vector<8x16xf32>
    %214 = arith.addf %210, %213 : vector<8x16xf32>
    %c1_149 = arith.constant 1 : index
    %c1_150 = arith.constant 1 : index
    %c0_151 = arith.constant 0 : index
    %c0_152 = arith.constant 0 : index
    %c0_153 = arith.constant 0 : index
    %215 = vector.load %arg8[%c1_149, %c1_150, %c0_151, %c0_152, %c0_153] : memref<2x3x2x32x16xbf16, #tpu.memory_space<vmem>>, vector<1x1x1x32x16xbf16>
    %216 = vector.shape_cast %215 : vector<1x1x1x32x16xbf16> to vector<32x16xbf16>
    %cst_154 = arith.constant dense<0.000000e+00> : vector<8x16xf32>
    %217 = tpu.matmul %207, %216, %cst_154 {dimension_numbers = #tpu.dot_dimension_numbers<[1], [0], [0], [1], [0, 0, 1, 1], [], []>} : vector<8x32xbf16>, vector<32x16xbf16>, vector<8x16xf32> -> vector<8x16xf32>
    %c1_155 = arith.constant 1 : index
    %c1_156 = arith.constant 1 : index
    %c0_157 = arith.constant 0 : index
    %c0_158 = arith.constant 0 : index
    %c0_159 = arith.constant 0 : index
    %218 = vector.load %arg6[%c1_155, %c1_156, %c0_157, %c0_158, %c0_159] : memref<2x3x2x1x16xf32, #tpu.memory_space<vmem>>, vector<1x1x1x1x16xf32>
    %219 = vector.shape_cast %218 : vector<1x1x1x1x16xf32> to vector<1x16xf32>
    %220 = vector.broadcast %219 : vector<1x16xf32> to vector<8x16xf32>
    %221 = arith.addf %217, %220 : vector<8x16xf32>
    %c1_160 = arith.constant 1 : index
    %c2_161 = arith.constant 2 : index
    %c0_162 = arith.constant 0 : index
    %c0_163 = arith.constant 0 : index
    %c0_164 = arith.constant 0 : index
    %222 = vector.load %arg8[%c1_160, %c2_161, %c0_162, %c0_163, %c0_164] : memref<2x3x2x32x16xbf16, #tpu.memory_space<vmem>>, vector<1x1x1x32x16xbf16>
    %223 = vector.shape_cast %222 : vector<1x1x1x32x16xbf16> to vector<32x16xbf16>
    %cst_165 = arith.constant dense<0.000000e+00> : vector<8x16xf32>
    %224 = tpu.matmul %207, %223, %cst_165 {dimension_numbers = #tpu.dot_dimension_numbers<[1], [0], [0], [1], [0, 0, 1, 1], [], []>} : vector<8x32xbf16>, vector<32x16xbf16>, vector<8x16xf32> -> vector<8x16xf32>
    %c1_166 = arith.constant 1 : index
    %c2_167 = arith.constant 2 : index
    %c0_168 = arith.constant 0 : index
    %c0_169 = arith.constant 0 : index
    %c0_170 = arith.constant 0 : index
    %225 = vector.load %arg6[%c1_166, %c2_167, %c0_168, %c0_169, %c0_170] : memref<2x3x2x1x16xf32, #tpu.memory_space<vmem>>, vector<1x1x1x1x16xf32>
    %226 = vector.shape_cast %225 : vector<1x1x1x1x16xf32> to vector<1x16xf32>
    %227 = vector.broadcast %226 : vector<1x16xf32> to vector<8x16xf32>
    %228 = arith.addf %224, %227 : vector<8x16xf32>
    %229 = vector.shape_cast %214 : vector<8x16xf32> to vector<1x8x16xf32>
    %230 = arith.truncf %229 : vector<1x8x16xf32> to vector<1x8x16xbf16>
    %231 = vector.shape_cast %221 : vector<8x16xf32> to vector<1x8x16xf32>
    %232 = arith.truncf %231 : vector<1x8x16xf32> to vector<1x8x16xbf16>
    %233 = vector.shape_cast %228 : vector<8x16xf32> to vector<1x8x16xf32>
    %234 = arith.truncf %233 : vector<1x8x16xf32> to vector<1x8x16xbf16>
    "tpu.trace_start"() <{level = 10 : i32, message = "bqd,bkd->bqk"}> : () -> ()
    %cst_171 = arith.constant dense<0.000000e+00> : vector<1x8x8xf32>
    %235 = tpu.matmul %230, %232, %cst_171 {dimension_numbers = #tpu.dot_dimension_numbers<[2], [2], [1], [1], [0, 0, 0, 1, 1, 1], [0], [0]>} : vector<1x8x16xbf16>, vector<1x8x16xbf16>, vector<1x8x8xf32> -> vector<1x8x8xf32>
    "tpu.trace_stop"() : () -> ()
    %236 = vector.shape_cast %1 : vector<8x8xf32> to vector<1x8x8xf32>
    %237 = arith.addf %235, %236 : vector<1x8x8xf32>
    %cst_172 = arith.constant dense<0xFF800000> : vector<1x8xf32>
    %238 = vector.multi_reduction <maximumf>, %237, %cst_172 [2] : vector<1x8x8xf32> to vector<1x8xf32>
    %239 = vector.shape_cast %238 : vector<1x8xf32> to vector<1x8x1xf32>
    %240 = vector.broadcast %239 : vector<1x8x1xf32> to vector<1x8x8xf32>
    %241 = arith.subf %237, %240 : vector<1x8x8xf32>
    %242 = math.exp %241 : vector<1x8x8xf32>
    %cst_173 = arith.constant dense<0.000000e+00> : vector<1x8xf32>
    %243 = vector.multi_reduction <add>, %242, %cst_173 [2] : vector<1x8x8xf32> to vector<1x8xf32>
    %244 = vector.shape_cast %243 : vector<1x8xf32> to vector<1x8x1xf32>
    %245 = tpu.reciprocal %244 {approx = true} : vector<1x8x1xf32> -> vector<1x8x1xf32>
    %246 = vector.broadcast %245 : vector<1x8x1xf32> to vector<1x8x8xf32>
    %247 = arith.mulf %242, %246 : vector<1x8x8xf32>
    %248 = arith.truncf %247 : vector<1x8x8xf32> to vector<1x8x8xbf16>
    "tpu.trace_start"() <{level = 10 : i32, message = "bqk,bkd->bqd"}> : () -> ()
    %cst_174 = arith.constant dense<0.000000e+00> : vector<1x8x16xf32>
    %249 = tpu.matmul %248, %234, %cst_174 {dimension_numbers = #tpu.dot_dimension_numbers<[2], [1], [1], [2], [0, 0, 0, 1, 1, 2], [0], [0]>} : vector<1x8x8xbf16>, vector<1x8x16xbf16>, vector<1x8x16xf32> -> vector<1x8x16xf32>
    "tpu.trace_stop"() : () -> ()
    %250 = vector.shape_cast %249 : vector<1x8x16xf32> to vector<8x16xf32>
    %251 = arith.truncf %250 : vector<8x16xf32> to vector<8x16xbf16>
    %c1_175 = arith.constant 1 : index
    %c0_176 = arith.constant 0 : index
    %c0_177 = arith.constant 0 : index
    %c0_178 = arith.constant 0 : index
    %252 = vector.load %arg9[%c1_175, %c0_176, %c0_177, %c0_178] : memref<2x2x16x32xbf16, #tpu.memory_space<vmem>>, vector<1x1x16x32xbf16>
    %253 = vector.shape_cast %252 : vector<1x1x16x32xbf16> to vector<16x32xbf16>
    %cst_179 = arith.constant dense<0.000000e+00> : vector<8x32xf32>
    %254 = tpu.matmul %251, %253, %cst_179 {dimension_numbers = #tpu.dot_dimension_numbers<[1], [0], [0], [1], [0, 0, 1, 1], [], []>} : vector<8x16xbf16>, vector<16x32xbf16>, vector<8x32xf32> -> vector<8x32xf32>
    %c1_180 = arith.constant 1 : index
    %c0_181 = arith.constant 0 : index
    %c1_182 = arith.constant 1 : index
    %c0_183 = arith.constant 0 : index
    %c0_184 = arith.constant 0 : index
    %255 = vector.load %arg8[%c1_180, %c0_181, %c1_182, %c0_183, %c0_184] : memref<2x3x2x32x16xbf16, #tpu.memory_space<vmem>>, vector<1x1x1x32x16xbf16>
    %256 = vector.shape_cast %255 : vector<1x1x1x32x16xbf16> to vector<32x16xbf16>
    %cst_185 = arith.constant dense<0.000000e+00> : vector<8x16xf32>
    %257 = tpu.matmul %206, %256, %cst_185 {dimension_numbers = #tpu.dot_dimension_numbers<[1], [0], [0], [1], [0, 0, 1, 1], [], []>} : vector<8x32xbf16>, vector<32x16xbf16>, vector<8x16xf32> -> vector<8x16xf32>
    %c1_186 = arith.constant 1 : index
    %c0_187 = arith.constant 0 : index
    %c1_188 = arith.constant 1 : index
    %c0_189 = arith.constant 0 : index
    %c0_190 = arith.constant 0 : index
    %258 = vector.load %arg6[%c1_186, %c0_187, %c1_188, %c0_189, %c0_190] : memref<2x3x2x1x16xf32, #tpu.memory_space<vmem>>, vector<1x1x1x1x16xf32>
    %259 = vector.shape_cast %258 : vector<1x1x1x1x16xf32> to vector<1x16xf32>
    %260 = vector.broadcast %259 : vector<1x16xf32> to vector<8x16xf32>
    %261 = arith.addf %257, %260 : vector<8x16xf32>
    %c1_191 = arith.constant 1 : index
    %c1_192 = arith.constant 1 : index
    %c1_193 = arith.constant 1 : index
    %c0_194 = arith.constant 0 : index
    %c0_195 = arith.constant 0 : index
    %262 = vector.load %arg8[%c1_191, %c1_192, %c1_193, %c0_194, %c0_195] : memref<2x3x2x32x16xbf16, #tpu.memory_space<vmem>>, vector<1x1x1x32x16xbf16>
    %263 = vector.shape_cast %262 : vector<1x1x1x32x16xbf16> to vector<32x16xbf16>
    %cst_196 = arith.constant dense<0.000000e+00> : vector<8x16xf32>
    %264 = tpu.matmul %207, %263, %cst_196 {dimension_numbers = #tpu.dot_dimension_numbers<[1], [0], [0], [1], [0, 0, 1, 1], [], []>} : vector<8x32xbf16>, vector<32x16xbf16>, vector<8x16xf32> -> vector<8x16xf32>
    %c1_197 = arith.constant 1 : index
    %c1_198 = arith.constant 1 : index
    %c1_199 = arith.constant 1 : index
    %c0_200 = arith.constant 0 : index
    %c0_201 = arith.constant 0 : index
    %265 = vector.load %arg6[%c1_197, %c1_198, %c1_199, %c0_200, %c0_201] : memref<2x3x2x1x16xf32, #tpu.memory_space<vmem>>, vector<1x1x1x1x16xf32>
    %266 = vector.shape_cast %265 : vector<1x1x1x1x16xf32> to vector<1x16xf32>
    %267 = vector.broadcast %266 : vector<1x16xf32> to vector<8x16xf32>
    %268 = arith.addf %264, %267 : vector<8x16xf32>
    %c1_202 = arith.constant 1 : index
    %c2_203 = arith.constant 2 : index
    %c1_204 = arith.constant 1 : index
    %c0_205 = arith.constant 0 : index
    %c0_206 = arith.constant 0 : index
    %269 = vector.load %arg8[%c1_202, %c2_203, %c1_204, %c0_205, %c0_206] : memref<2x3x2x32x16xbf16, #tpu.memory_space<vmem>>, vector<1x1x1x32x16xbf16>
    %270 = vector.shape_cast %269 : vector<1x1x1x32x16xbf16> to vector<32x16xbf16>
    %cst_207 = arith.constant dense<0.000000e+00> : vector<8x16xf32>
    %271 = tpu.matmul %207, %270, %cst_207 {dimension_numbers = #tpu.dot_dimension_numbers<[1], [0], [0], [1], [0, 0, 1, 1], [], []>} : vector<8x32xbf16>, vector<32x16xbf16>, vector<8x16xf32> -> vector<8x16xf32>
    %c1_208 = arith.constant 1 : index
    %c2_209 = arith.constant 2 : index
    %c1_210 = arith.constant 1 : index
    %c0_211 = arith.constant 0 : index
    %c0_212 = arith.constant 0 : index
    %272 = vector.load %arg6[%c1_208, %c2_209, %c1_210, %c0_211, %c0_212] : memref<2x3x2x1x16xf32, #tpu.memory_space<vmem>>, vector<1x1x1x1x16xf32>
    %273 = vector.shape_cast %272 : vector<1x1x1x1x16xf32> to vector<1x16xf32>
    %274 = vector.broadcast %273 : vector<1x16xf32> to vector<8x16xf32>
    %275 = arith.addf %271, %274 : vector<8x16xf32>
    %276 = vector.shape_cast %261 : vector<8x16xf32> to vector<1x8x16xf32>
    %277 = arith.truncf %276 : vector<1x8x16xf32> to vector<1x8x16xbf16>
    %278 = vector.shape_cast %268 : vector<8x16xf32> to vector<1x8x16xf32>
    %279 = arith.truncf %278 : vector<1x8x16xf32> to vector<1x8x16xbf16>
    %280 = vector.shape_cast %275 : vector<8x16xf32> to vector<1x8x16xf32>
    %281 = arith.truncf %280 : vector<1x8x16xf32> to vector<1x8x16xbf16>
    "tpu.trace_start"() <{level = 10 : i32, message = "bqd,bkd->bqk"}> : () -> ()
    %cst_213 = arith.constant dense<0.000000e+00> : vector<1x8x8xf32>
    %282 = tpu.matmul %277, %279, %cst_213 {dimension_numbers = #tpu.dot_dimension_numbers<[2], [2], [1], [1], [0, 0, 0, 1, 1, 1], [0], [0]>} : vector<1x8x16xbf16>, vector<1x8x16xbf16>, vector<1x8x8xf32> -> vector<1x8x8xf32>
    "tpu.trace_stop"() : () -> ()
    %283 = vector.shape_cast %1 : vector<8x8xf32> to vector<1x8x8xf32>
    %284 = arith.addf %282, %283 : vector<1x8x8xf32>
    %cst_214 = arith.constant dense<0xFF800000> : vector<1x8xf32>
    %285 = vector.multi_reduction <maximumf>, %284, %cst_214 [2] : vector<1x8x8xf32> to vector<1x8xf32>
    %286 = vector.shape_cast %285 : vector<1x8xf32> to vector<1x8x1xf32>
    %287 = vector.broadcast %286 : vector<1x8x1xf32> to vector<1x8x8xf32>
    %288 = arith.subf %284, %287 : vector<1x8x8xf32>
    %289 = math.exp %288 : vector<1x8x8xf32>
    %cst_215 = arith.constant dense<0.000000e+00> : vector<1x8xf32>
    %290 = vector.multi_reduction <add>, %289, %cst_215 [2] : vector<1x8x8xf32> to vector<1x8xf32>
    %291 = vector.shape_cast %290 : vector<1x8xf32> to vector<1x8x1xf32>
    %292 = tpu.reciprocal %291 {approx = true} : vector<1x8x1xf32> -> vector<1x8x1xf32>
    %293 = vector.broadcast %292 : vector<1x8x1xf32> to vector<1x8x8xf32>
    %294 = arith.mulf %289, %293 : vector<1x8x8xf32>
    %295 = arith.truncf %294 : vector<1x8x8xf32> to vector<1x8x8xbf16>
    "tpu.trace_start"() <{level = 10 : i32, message = "bqk,bkd->bqd"}> : () -> ()
    %cst_216 = arith.constant dense<0.000000e+00> : vector<1x8x16xf32>
    %296 = tpu.matmul %295, %281, %cst_216 {dimension_numbers = #tpu.dot_dimension_numbers<[2], [1], [1], [2], [0, 0, 0, 1, 1, 2], [0], [0]>} : vector<1x8x8xbf16>, vector<1x8x16xbf16>, vector<1x8x16xf32> -> vector<1x8x16xf32>
    "tpu.trace_stop"() : () -> ()
    %297 = vector.shape_cast %296 : vector<1x8x16xf32> to vector<8x16xf32>
    %298 = arith.truncf %297 : vector<8x16xf32> to vector<8x16xbf16>
    %c1_217 = arith.constant 1 : index
    %c1_218 = arith.constant 1 : index
    %c0_219 = arith.constant 0 : index
    %c0_220 = arith.constant 0 : index
    %299 = vector.load %arg9[%c1_217, %c1_218, %c0_219, %c0_220] : memref<2x2x16x32xbf16, #tpu.memory_space<vmem>>, vector<1x1x16x32xbf16>
    %300 = vector.shape_cast %299 : vector<1x1x16x32xbf16> to vector<16x32xbf16>
    %cst_221 = arith.constant dense<0.000000e+00> : vector<8x32xf32>
    %301 = tpu.matmul %298, %300, %cst_221 {dimension_numbers = #tpu.dot_dimension_numbers<[1], [0], [0], [1], [0, 0, 1, 1], [], []>} : vector<8x16xbf16>, vector<16x32xbf16>, vector<8x32xf32> -> vector<8x32xf32>
    %302 = arith.addf %254, %301 : vector<8x32xf32>
    %c1_222 = arith.constant 1 : index
    %c0_223 = arith.constant 0 : index
    %c0_224 = arith.constant 0 : index
    %303 = vector.load %arg7[%c1_222, %c0_223, %c0_224] : memref<2x3x32xf32, #tpu.memory_space<vmem>>, vector<1x1x32xf32>
    %304 = vector.shape_cast %303 : vector<1x1x32xf32> to vector<1x32xf32>
    %305 = vector.broadcast %304 : vector<1x32xf32> to vector<8x32xf32>
    %306 = arith.addf %302, %305 : vector<8x32xf32>
    %307 = arith.addf %205, %306 : vector<8x32xf32>
    %c1_225 = arith.constant 1 : index
    %c2_226 = arith.constant 2 : index
    %c0_227 = arith.constant 0 : index
    %308 = vector.load %arg5[%c1_225, %c2_226, %c0_227] : memref<2x4x32xf32, #tpu.memory_space<vmem>>, vector<1x1x32xf32>
    %309 = vector.shape_cast %308 : vector<1x1x32xf32> to vector<1x32xf32>
    %c1_228 = arith.constant 1 : index
    %c3_229 = arith.constant 3 : index
    %c0_230 = arith.constant 0 : index
    %310 = vector.load %arg5[%c1_228, %c3_229, %c0_230] : memref<2x4x32xf32, #tpu.memory_space<vmem>>, vector<1x1x32xf32>
    %311 = vector.shape_cast %310 : vector<1x1x32xf32> to vector<1x32xf32>
    %cst_231 = arith.constant dense<0.000000e+00> : vector<8xf32>
    %312 = vector.multi_reduction <add>, %307, %cst_231 [1] : vector<8x32xf32> to vector<8xf32>
    %313 = vector.shape_cast %312 : vector<8xf32> to vector<8x1xf32>
    %cst_232 = arith.constant 3.200000e+01 : f32
    %314 = vector.broadcast %cst_232 : f32 to vector<8x1xf32>
    %315 = arith.divf %313, %314 : vector<8x1xf32>
    %316 = vector.broadcast %315 : vector<8x1xf32> to vector<8x32xf32>
    %317 = arith.subf %307, %316 : vector<8x32xf32>
    %318 = arith.mulf %317, %317 : vector<8x32xf32>
    %cst_233 = arith.constant dense<0.000000e+00> : vector<8xf32>
    %319 = vector.multi_reduction <add>, %318, %cst_233 [1] : vector<8x32xf32> to vector<8xf32>
    %320 = vector.shape_cast %319 : vector<8xf32> to vector<8x1xf32>
    %cst_234 = arith.constant 3.200000e+01 : f32
    %321 = vector.broadcast %cst_234 : f32 to vector<8x1xf32>
    %322 = arith.divf %320, %321 : vector<8x1xf32>
    %323 = vector.broadcast %315 : vector<8x1xf32> to vector<8x32xf32>
    %324 = arith.subf %307, %323 : vector<8x32xf32>
    %cst_235 = arith.constant 9.99999993E-9 : f32
    %325 = vector.broadcast %cst_235 : f32 to vector<8x1xf32>
    %326 = arith.addf %322, %325 : vector<8x1xf32>
    %327 = math.rsqrt %326 : vector<8x1xf32>
    %328 = vector.broadcast %327 : vector<8x1xf32> to vector<8x32xf32>
    %329 = arith.mulf %324, %328 : vector<8x32xf32>
    %330 = vector.broadcast %309 : vector<1x32xf32> to vector<8x32xf32>
    %331 = arith.mulf %329, %330 : vector<8x32xf32>
    %332 = vector.broadcast %311 : vector<1x32xf32> to vector<8x32xf32>
    %333 = arith.addf %331, %332 : vector<8x32xf32>
    %334 = arith.truncf %333 : vector<8x32xf32> to vector<8x32xbf16>
    %c1_236 = arith.constant 1 : index
    %c0_237 = arith.constant 0 : index
    %c0_238 = arith.constant 0 : index
    %c0_239 = arith.constant 0 : index
    %335 = vector.load %arg10[%c1_236, %c0_237, %c0_238, %c0_239] : memref<2x2x32x32xbf16, #tpu.memory_space<vmem>>, vector<1x1x32x32xbf16>
    %336 = vector.shape_cast %335 : vector<1x1x32x32xbf16> to vector<32x32xbf16>
    %cst_240 = arith.constant dense<0.000000e+00> : vector<8x32xf32>
    %337 = tpu.matmul %334, %336, %cst_240 {dimension_numbers = #tpu.dot_dimension_numbers<[1], [0], [0], [1], [0, 0, 1, 1], [], []>} : vector<8x32xbf16>, vector<32x32xbf16>, vector<8x32xf32> -> vector<8x32xf32>
    %c1_241 = arith.constant 1 : index
    %c1_242 = arith.constant 1 : index
    %c0_243 = arith.constant 0 : index
    %338 = vector.load %arg7[%c1_241, %c1_242, %c0_243] : memref<2x3x32xf32, #tpu.memory_space<vmem>>, vector<1x1x32xf32>
    %339 = vector.shape_cast %338 : vector<1x1x32xf32> to vector<1x32xf32>
    %340 = vector.broadcast %339 : vector<1x32xf32> to vector<8x32xf32>
    %341 = arith.addf %337, %340 : vector<8x32xf32>
    %cst_244 = arith.constant 0.000000e+00 : f32
    %342 = vector.broadcast %cst_244 : f32 to vector<8x32xf32>
    %343 = arith.maximumf %341, %342 : vector<8x32xf32>
    %344 = arith.truncf %343 : vector<8x32xf32> to vector<8x32xbf16>
    %c1_245 = arith.constant 1 : index
    %c1_246 = arith.constant 1 : index
    %c0_247 = arith.constant 0 : index
    %c0_248 = arith.constant 0 : index
    %345 = vector.load %arg10[%c1_245, %c1_246, %c0_247, %c0_248] : memref<2x2x32x32xbf16, #tpu.memory_space<vmem>>, vector<1x1x32x32xbf16>
    %346 = vector.shape_cast %345 : vector<1x1x32x32xbf16> to vector<32x32xbf16>
    %cst_249 = arith.constant dense<0.000000e+00> : vector<8x32xf32>
    %347 = tpu.matmul %344, %346, %cst_249 {dimension_numbers = #tpu.dot_dimension_numbers<[1], [0], [0], [1], [0, 0, 1, 1], [], []>} : vector<8x32xbf16>, vector<32x32xbf16>, vector<8x32xf32> -> vector<8x32xf32>
    %c1_250 = arith.constant 1 : index
    %c2_251 = arith.constant 2 : index
    %c0_252 = arith.constant 0 : index
    %348 = vector.load %arg7[%c1_250, %c2_251, %c0_252] : memref<2x3x32xf32, #tpu.memory_space<vmem>>, vector<1x1x32xf32>
    %349 = vector.shape_cast %348 : vector<1x1x32xf32> to vector<1x32xf32>
    %350 = vector.broadcast %349 : vector<1x32xf32> to vector<8x32xf32>
    %351 = arith.addf %347, %350 : vector<8x32xf32>
    %352 = arith.addf %351, %333 : vector<8x32xf32>
    %353 = vector.broadcast %0 : vector<8x1xf32> to vector<8x32xf32>
    %354 = arith.mulf %352, %353 : vector<8x32xf32>
    %c0_253 = arith.constant 0 : index
    %c0_254 = arith.constant 0 : index
    %355 = vector.load %arg4[%c0_253, %c0_254] : memref<2x32xf32, #tpu.memory_space<vmem>>, vector<1x32xf32>
    %c1_255 = arith.constant 1 : index
    %c0_256 = arith.constant 0 : index
    %356 = vector.load %arg4[%c1_255, %c0_256] : memref<2x32xf32, #tpu.memory_space<vmem>>, vector<1x32xf32>
    %cst_257 = arith.constant dense<0.000000e+00> : vector<8xf32>
    %357 = vector.multi_reduction <add>, %354, %cst_257 [1] : vector<8x32xf32> to vector<8xf32>
    %358 = vector.shape_cast %357 : vector<8xf32> to vector<8x1xf32>
    %cst_258 = arith.constant 3.200000e+01 : f32
    %359 = vector.broadcast %cst_258 : f32 to vector<8x1xf32>
    %360 = arith.divf %358, %359 : vector<8x1xf32>
    %361 = vector.broadcast %360 : vector<8x1xf32> to vector<8x32xf32>
    %362 = arith.subf %354, %361 : vector<8x32xf32>
    %363 = arith.mulf %362, %362 : vector<8x32xf32>
    %cst_259 = arith.constant dense<0.000000e+00> : vector<8xf32>
    %364 = vector.multi_reduction <add>, %363, %cst_259 [1] : vector<8x32xf32> to vector<8xf32>
    %365 = vector.shape_cast %364 : vector<8xf32> to vector<8x1xf32>
    %cst_260 = arith.constant 3.200000e+01 : f32
    %366 = vector.broadcast %cst_260 : f32 to vector<8x1xf32>
    %367 = arith.divf %365, %366 : vector<8x1xf32>
    %368 = vector.broadcast %360 : vector<8x1xf32> to vector<8x32xf32>
    %369 = arith.subf %354, %368 : vector<8x32xf32>
    %cst_261 = arith.constant 9.99999993E-9 : f32
    %370 = vector.broadcast %cst_261 : f32 to vector<8x1xf32>
    %371 = arith.addf %367, %370 : vector<8x1xf32>
    %372 = math.rsqrt %371 : vector<8x1xf32>
    %373 = vector.broadcast %372 : vector<8x1xf32> to vector<8x32xf32>
    %374 = arith.mulf %369, %373 : vector<8x32xf32>
    %375 = vector.broadcast %355 : vector<1x32xf32> to vector<8x32xf32>
    %376 = arith.mulf %374, %375 : vector<8x32xf32>
    %377 = vector.broadcast %356 : vector<1x32xf32> to vector<8x32xf32>
    %378 = arith.addf %376, %377 : vector<8x32xf32>
    %c0_262 = arith.constant 0 : index
    %c0_263 = arith.constant 0 : index
    %379 = vector.load %arg11[%c0_262, %c0_263] : memref<8x32xf32, #tpu.memory_space<vmem>>, vector<8x32xf32>
    tpu.vector_store %arg11[%c0_262, %c0_263], %378 {strides = array<i32>} : memref<8x32xf32, #tpu.memory_space<vmem>>, vector<8x32xf32>,
    return
  }
  func.func @transform_0(%arg0: i32) -> (i32, i32) {
    %c0_i32 = arith.constant 0 : i32
    %c0_i32_0 = arith.constant 0 : i32
    return %arg0, %c0_i32 : i32, i32
  }
  func.func @transform_1(%arg0: i32) -> (i32, i32) {
    %c0_i32 = arith.constant 0 : i32
    %c0_i32_0 = arith.constant 0 : i32
    return %arg0, %c0_i32 : i32, i32
  }
  func.func @transform_2(%arg0: i32) -> (i32, i32) {
    %c0_i32 = arith.constant 0 : i32
    %c0_i32_0 = arith.constant 0 : i32
    %c0_i32_1 = arith.constant 0 : i32
    return %c0_i32, %c0_i32_0 : i32, i32
  }
  func.func @transform_3(%arg0: i32) -> (i32, i32) {
    %c0_i32 = arith.constant 0 : i32
    %c0_i32_0 = arith.constant 0 : i32
    %c0_i32_1 = arith.constant 0 : i32
    return %c0_i32, %c0_i32_0 : i32, i32
  }
  func.func @transform_4(%arg0: i32) -> (i32, i32, i32) {
    %c0_i32 = arith.constant 0 : i32
    %c0_i32_0 = arith.constant 0 : i32
    %c0_i32_1 = arith.constant 0 : i32
    %c0_i32_2 = arith.constant 0 : i32
    return %c0_i32, %c0_i32_0, %c0_i32_1 : i32, i32, i32
  }
  func.func @transform_5(%arg0: i32) -> (i32, i32, i32, i32, i32) {
    %c0_i32 = arith.constant 0 : i32
    %c0_i32_0 = arith.constant 0 : i32
    %c0_i32_1 = arith.constant 0 : i32
    %c0_i32_2 = arith.constant 0 : i32
    %c0_i32_3 = arith.constant 0 : i32
    %c0_i32_4 = arith.constant 0 : i32
    return %c0_i32, %c0_i32_0, %c0_i32_1, %c0_i32_2, %c0_i32_3 : i32, i32, i32, i32, i32
  }
  func.func @transform_6(%arg0: i32) -> (i32, i32, i32) {
    %c0_i32 = arith.constant 0 : i32
    %c0_i32_0 = arith.constant 0 : i32
    %c0_i32_1 = arith.constant 0 : i32
    %c0_i32_2 = arith.constant 0 : i32
    return %c0_i32, %c0_i32_0, %c0_i32_1 : i32, i32, i32
  }
  func.func @transform_7(%arg0: i32) -> (i32, i32, i32, i32, i32) {
    %c0_i32 = arith.constant 0 : i32
    %c0_i32_0 = arith.constant 0 : i32
    %c0_i32_1 = arith.constant 0 : i32
    %c0_i32_2 = arith.constant 0 : i32
    %c0_i32_3 = arith.constant 0 : i32
    %c0_i32_4 = arith.constant 0 : i32
    return %c0_i32, %c0_i32_0, %c0_i32_1, %c0_i32_2, %c0_i32_3 : i32, i32, i32, i32, i32
  }
  func.func @transform_8(%arg0: i32) -> (i32, i32, i32, i32) {
    %c0_i32 = arith.constant 0 : i32
    %c0_i32_0 = arith.constant 0 : i32
    %c0_i32_1 = arith.constant 0 : i32
    %c0_i32_2 = arith.constant 0 : i32
    %c0_i32_3 = arith.constant 0 : i32
    return %c0_i32, %c0_i32_0, %c0_i32_1, %c0_i32_2 : i32, i32, i32, i32
  }
  func.func @transform_9(%arg0: i32) -> (i32, i32, i32, i32) {
    %c0_i32 = arith.constant 0 : i32
    %c0_i32_0 = arith.constant 0 : i32
    %c0_i32_1 = arith.constant 0 : i32
    %c0_i32_2 = arith.constant 0 : i32
    %c0_i32_3 = arith.constant 0 : i32
    return %c0_i32, %c0_i32_0, %c0_i32_1, %c0_i32_2 : i32, i32, i32, i32
  }
  func.func @transform_10(%arg0: i32) -> (i32, i32) {
    %c0_i32 = arith.constant 0 : i32
    %c0_i32_0 = arith.constant 0 : i32
    return %arg0, %c0_i32 : i32, i32
  }
}

</mosaic_0001>

<bundles_post_ra>
// kernel: tpu_custom_call.1
= control target key start
LH: loop header
LB: loop body
LE: loop exit
PB: predicated region body
PF: predicated region fallthrough
CT: control target
= control target key end

     0   :  { %s3485_s0 = inlined_call_operand.vmem [shape: f32[16,32], index: 0, kind: input, shape index: {}]   ;;  %s3486_s1 = inlined_call_operand.vmem [shape: f32[16,1], index: 1, kind: input, shape index: {}]   ;;  %s3487_s2 = inlined_call_operand.vmem [shape: f32[8,8], index: 2, kind: input, shape index: {}]   ;;  %s3488_s3 = inlined_call_operand.vmem [shape: f32[2,32], index: 3, kind: input, shape index: {}]   ;;  %s3489_s4 = inlined_call_operand.vmem [shape: f32[2,4,32], index: 4, kind: input, shape index: {}]   ;;  %s3490_s5 = inlined_call_operand.vmem [shape: f32[2,3,2,1,16], index: 5, kind: input, shape index: {}]   ;;  %s3491_s6 = inlined_call_operand.vmem [shape: f32[2,3,32], index: 6, kind: input, shape index: {}]   ;;  %s3492_s7 = inlined_call_operand.vmem [shape: bf16[2,3,2,32,16], index: 7, kind: input, shape index: {}]   ;;  %s3493_s8 = inlined_call_operand.vmem [shape: bf16[2,2,16,32], index: 8, kind: input, shape index: {}]   ;;  %s3494_s9 = inlined_call_operand.vmem [shape: bf16[2,2,32,32], index: 9, kind: input, shape index: {}]   ;;  %s3495_s10 = inlined_call_operand.hbm [shape: f32[16,32], index: 10, kind: output, shape index: {}]  }
   0x1   :  { %3496 = sst [smem:[#allocation5_spill]] %s3485_s0 }
   0x2   :  { %15 = vsyncpa [#allocation3], 0 }
   0x3   :  { %17 = vsyncpa [#allocation3 + $0x1], 0  ;;  %s2999_s13 = smov 0   ;;  %s3001_s14 = smov 0  }
   0x4   :  { %s3003_s15 = smov 0   ;;  %s3005_s16 = smov 0  }
   0x5 LB: > { %s3020_s17 = sadd.s32 4294967295, %s2938_s16   ;;  %s2316_s18 = sadd.s32 4294967294, %s2938_s16   ;;  %s2938_s16 = sphi %s3005_s16, %s3503_s16   ;;  %s2934_s15 = sphi %s3003_s15, %s3502_s15   ;;  %s2930_s14 = sphi %s3001_s14, %s3501_s14   ;;  %s2926_s13 = sphi %s2999_s13, %s3500_s13  }
   0x6   : > { %s3024_s19 = sadd.s32 1, %s2938_s16   ;;  %s250_s20 = sadd.s32 1, %s2934_s15 }
   0x7   : > { %s247_s21 = ssub.s32 %s2938_s16, %s3024_s19  ;;  %p260_p0 = scmp.ne.s32.totalorder %s2934_s15, %s2930_s14 }
   0x8   : > { %p248_p1 = scmp.eq.s32.totalorder %s247_s21, 0  ;;  %p261_p2 = scmp.eq.s32.totalorder %s3020_s17, 1 }
   0x9   : > { %p266_p3 = scmp.ne.s32.totalorder %s2930_s14, %s2926_s13  ;;  %p267_p4 = scmp.eq.s32.totalorder %s2316_s18, 1 }
   0xa   : > { %s3035_s22 = scalar_select %p248_p1, %s2934_s15, %s250_s20  }
   0xb   : > { %p3037_p5 = por %p261_p2, %p260_p0  ;;  %p3041_p6 = por %p267_p4, %p266_p3 }
   0xc   : > { %p2319_p7 = scmp.ge.s32.totalorder %s2938_s16, 1  ;;  %p323_p8 = scmp.lt.s32.totalorder %s2938_s16, 3 }
   0xe   : > { %p324_p9 = pnand %p2319_p7, %p323_p8 }
   0xf   : > { %p364_p10 = scmp.lt.s32.totalorder (!%p324_p9), %s3020_s17, 1  ;;  %v2814_v0 = vld [vmem:[%s3492_s7 + $0x20] sm:$0xff] (!%p324_p9)   ;;  %v2940_v1 = vmov (!%p324_p9), 0   ;;  %v2941_v2 = vmov (!%p324_p9), 0.0   ;;  %v2815_v4 = vld [vmem:[%s3492_s7 + $0x28] sm:$0xff] (!%p324_p9)   ;;  %vm2942_vm0 = vmmov (!%p324_p9), 0  }
  0x10   : > { %327 = sbr.rel (%p324_p9) target bundleno = 6497 (0x1961), region = 60  ;;  %2813 = vset.pattern.permute.xlu0 (!%p324_p9), %v2940_v1  ;;  %2579 = vmatprep.subr.bf16.mxu1 (!%p324_p9), %v2941_v2  ;;  %s3499_s0 = sld [smem:[#allocation5_spill]] (!%p324_p9)  ;;  %vm384_vm1 = vcmask (!%p324_p9), 261120   ;;  %v2816_v15 = vld [vmem:[%s3492_s7] sm:$0xff] (!%p324_p9)   ;;  %v2817_v16 = vld [vmem:[%s3492_s7 + $0x8] sm:$0xff] (!%p324_p9)   ;;  %vm613_vm2 = vcmask (!%p324_p9), 130048  }
  0x11   : > { %2580 = vmatpush3.bf16.msra.mxu1 (!%p324_p9), %v2814_v0  ;;  %2571 = vmatprep.subr.bf16.mxu0 (!%p324_p9), %v2941_v2  ;;  %v2334_v17 = vld [vmem:[%s3490_s5 + $0x2] ss:$0 sm:$0xff] (!%p324_p9)  ;;  %v2323_v29 = vld [vmem:[%s3489_s4] ss:$0 sm:$0xff] (!%p324_p9)  ;;  %v2324_v31 = vld [vmem:[%s3489_s4 + $0x1] ss:$0 sm:$0xff] (!%p324_p9) }
  0x12   : > { %2581 = vmatprep.subr.bf16.mxu1 (!%p324_p9), %v2941_v2  ;;  %2583 = vmatprep.mubr.msk.bf16.mxu1 (!%p324_p9), %vm2942_vm0, %v2941_v2  ;;  %v2818_v34 = vld [vmem:[%s3492_s7 + $0x40] sm:$0xff] (!%p324_p9)   ;;  %v2819_v36 = vld [vmem:[%s3492_s7 + $0x48] sm:$0xff] (!%p324_p9)   ;;  %v2820_v42 = vld [vmem:[%s3492_s7 + $0x10] sm:$0xff] (!%p324_p9)   ;;  %vm676_vm3 = vcmask (!%p324_p9), 1043456   ;;  %vm660_vm4 = vcmask (!%p324_p9), 64512   ;;  %s2496_s18 = sshll.u32 (!%p324_p9), %s3020_s17, 7 }
  0x13   : > { %2575 = vmatprep.mubr.msk.bf16.mxu0 (!%p324_p9), %vm2942_vm0, %v2941_v2  ;;  %2572 = vmatpush3.bf16.msra.mxu0 (!%p324_p9), %v2816_v15  ;;  %v2325_v37 = vld [vmem:[%s3490_s5] ss:$0 sm:$0xff] (!%p324_p9)  ;;  %v2343_v45 = vld [vmem:[%s3490_s5 + $0x4] ss:$0 sm:$0xff] (!%p324_p9)  ;;  %v2821_v46 = vld [vmem:[%s3492_s7 + $0x18] sm:$0xff] (!%p324_p9)  }
  0x14   : > { %2573 = vmatprep.subr.bf16.mxu0 (!%p324_p9), %v2941_v2  ;;  %v2822_v51 = vld [vmem:[%s3492_s7 + $0x50] sm:$0xff] (!%p324_p9)   ;;  %v2823_v55 = vld [vmem:[%s3492_s7 + $0x58] sm:$0xff] (!%p324_p9)   ;;  %v3155_v56 = vld [vmem:[%s3487_s2] sm:$0xff] (!%p324_p9) }
  0x15   : > { %2582 = vmatpush3.bf16.msra.mxu1 (!%p324_p9), %v2815_v4  ;;  %v2372_v4 = vld [vmem:[%s3490_s5 + $0x5] ss:$0 sm:$0xff] (!%p324_p9) }
  0x16   : > { %2595 = vmatprep.subr.bf16.mxu1 (!%p324_p9), %v2941_v2 }
  0x17   : > { %s365_s27 = scalar_select %p364_p10, %s3020_s17, 1  ;;  %2574 = vmatpush3.bf16.msra.mxu0 %v2817_v16 }
  0x18   : > { %2587 = vmatprep.subr.bf16.mxu0 %v2941_v2  ;;  %s2943_s17 = smov [#allocation2]  }
  0x19   : > { %s2321_s28 = sshll.u32 %s365_s27, 3  ;;  %s361_s27 = sand.u32 1, %s2930_s14  }
  0x1a   : > { %s371_s11 = scalar_lea.vmem %s3486_s1, %s2321_s28  ;;  %s367_s25 = scalar_lea.vmem %s3499_s0, %s2321_s28 }
  0x1b   : > { %v373_v3 = vld [vmem:[%s371_s11] sm:$0xff]  ;;  %s2320_s28 = sshll.u32 %s361_s27, 3  ;;  %s3442_s0 = scalar_lea.hbm %s3495_s10, %s2496_s18 }
  0x1c   : > { %378 = vperm.xlu0 %2813, %v373_v3   ;;  %v375_v5 = vld [vmem:[%s367_s25] sm:$0xff]  ;;  %s363_s20 = scalar_lea.vmem [#allocation2], %s2320_s28  ;;  %s2232_s29 = scalar_lea.sflag [#allocation3], %s361_s27 }
  0x1d   : > { %s2245_s21 = sshll.u32 %s363_s20, 4  ;;  %s2880_s28 = sshll.u32 %s2943_s17, 4  ;;  %s3444_s21 = int_to_ptr.vmem [resolvable:$true] %s2245_s21  ;;  %s2881_s28 = int_to_ptr.vmem [resolvable:$false] %s2880_s28 }
  0x1e   : > { %s2876_s30 = scalar_lea.vmem %s3444_s21, 128  ;;  %s2882_s11 = scalar_lea.vmem %s2881_s28, 256 }
  0x1f   : > { %p2877_p11 = scmp.ne.s32.totalorder %s3444_s21, %s2876_s30  ;;  %p2883_p0 = scmp.lt.s32.totalorder %s3444_s21, %s2881_s28 }
  0x20   : > { %p2884_p1 = scmp.lt.s32.totalorder %s2882_s11, %s2876_s30 }
  0x21   : > { %p2878_p12 = pnand %p2877_p11, %p3037_p5 }
  0x22   : > { %p2885_p2 = por %p2884_p1, %p2883_p0 }
  0x23   : > { %p2879_p13 = pneg %p2878_p12 }
  0x25   : > { %p2886_p3 = pnand %p2885_p2, %p2879_p13 }
  0x9b   : > { %v3069_v6 = vpop.permute.xlu0 %378 }
  0x9c   : > { %v381_v7 = vmul.f32 %v3069_v6, %v375_v5 }
  0x9e   : > { %v385_v8 = vsel %vm384_vm1, %v381_v7, 0.0  ;;  %v3073_v9 = vpack.c.bf16 %v381_v7, %v381_v7 }
  0x9f   : > { %386 = vadd.xlane.f32.xlu0 %v385_v8 }
  0xa0   : > { %2584 = vmatmul.mubr.msk.bf16.vlgmr.msra.gmra.mrb[0].mxu1 %vm384_vm1, %v3073_v9 }
  0xa1   : > { %2597 = vmatprep.mubr.msk.bf16.mxu1 %vm2942_vm0, %v2941_v2 }
 0x12c   : > { %v387_v10 = vpop.xlane.xlu0 %386 }
 0x12d   : > { %v389_v11 = vmul.f32 0.03125, %v387_v10 }
 0x12f   : > { %v390_v12 = vsub.f32 %v381_v7, %v389_v11 }
 0x131   : > { %v391_v13 = vmul.f32 %v390_v12, %v390_v12 }
 0x133   : > { %v392_v14 = vsel %vm384_vm1, %v391_v13, 0.0 }
 0x134   : > { %393 = vadd.xlane.f32.xlu1 %v392_v14 }
 0x173   : > { %v539_v18 = vpop.f32.mrb[0].mxu1 }
 0x174   : > { %v540_v19 = vadd.f32 %v2334_v17, %v539_v18  ;;  %v2585_v20 = vpop.f32.mrb[1].mxu1 }
 0x175   : > { %v542_v21 = vpop.f32.mrb[2].mxu1 }
 0x176   : > { %v611_v22 = vpack.c.bf16 %v540_v19, %v540_v19  ;;  %v2586_v23 = vpop.f32.mrb[3].mxu1 }
 0x178   : > { %v618_v24 = vsel %vm613_vm2, %v611_v22, 0  ;;  %v2824_v22 = vld [vmem:[%s3492_s7 + $0x30] sm:$0xff]  }
 0x179   : > { %2596 = vmatpush3.bf16.xpose.msra.mxu1 %v618_v24  ;;  %v2825_v24 = vld [vmem:[%s3492_s7 + $0x38] sm:$0xff]  }
 0x17a   : > { %2607 = vmatprep.subr.bf16.mxu1 %v2941_v2 }
 0x1c1   : > { %v394_v25 = vpop.xlane.xlu1 %393 }
 0x1c2   : > { %v395_v26 = vmul.f32 0.03125, %v394_v25 }
 0x1c4   : > { %v396_v27 = vadd.f32 1e-08, %v395_v26 }
 0x1c6   : > { %2850 = vrsqrt.f32 %v396_v27 }
 0x1d0   : > { %v2851_v28 = vpop.eup %2850 }
 0x1d1   : > { %v398_v30 = vmul.f32 %v2851_v28, %v390_v12 }
 0x1d3   : > { %v403_v32 = vmul.f32 %v2323_v29, %v398_v30  ;;  %v2363_v29 = vld [vmem:[%s3490_s5 + $0x3] ss:$0 sm:$0xff] }
 0x1d5   : > { %v3099_v33 = vadd.f32 %v2324_v31, %v403_v32 }
 0x1d7   : > { %v409_v35 = vpack.c.bf16 %v3099_v33, %v3099_v33 }
 0x1d9   : > { %2576 = vmatmul.mubr.msk.bf16.vlgmr.msra.gmra.mrb[0].mxu0 %vm384_vm1, %v409_v35 }
 0x1da   : > { %2588 = vmatpush3.bf16.msra.mxu0 %v2818_v34  ;;  %2591 = vmatprep.mubr.msk.bf16.mxu0 %vm2942_vm0, %v2941_v2 }
 0x1db   : > { %2589 = vmatprep.subr.bf16.mxu0 %v2941_v2 }
 0x1de   : > { %2590 = vmatpush3.bf16.msra.mxu0 %v2819_v36 }
 0x1df   : > { %2601 = vmatprep.subr.bf16.mxu0 %v2941_v2 }
 0x1e1   : > { %2592 = vmatmul.mubr.msk.bf16.vlgmr.msra.gmra.mrb[4].mxu0 %vm384_vm1, %v3073_v9 }
 0x1e2   : > { %2603 = vmatprep.mubr.msk.bf16.mxu0 %vm2942_vm0, %v2941_v2 }
 0x2ac   : > { %v471_v38 = vpop.f32.mrb[0].mxu0 }
 0x2ad   : > { %v472_v39 = vadd.f32 %v2325_v37, %v471_v38  ;;  %v2577_v40 = vpop.f32.mrb[1].mxu0 }
 0x2ae   : > { %v474_v41 = vpop.f32.mrb[2].mxu0 }
 0x2af   : > { %v610_v43 = vpack.c.bf16 %v472_v39, %v472_v39  ;;  %v2578_v44 = vpop.f32.mrb[3].mxu0 }
 0x2b1   : > { %2598 = vmatmul.mubr.msk.bf16.vlgmr.msra.gmra.mrb[4].mxu1 %vm613_vm2, %v610_v43 }
 0x2b2   : > { %2608 = vmatpush3.bf16.msra.mxu1 %v2820_v42  ;;  %2611 = vmatprep.mubr.msk.bf16.mxu1 %vm2942_vm0, %v2941_v2 }
 0x2b3   : > { %2609 = vmatprep.subr.bf16.mxu1 %v2941_v2 }
 0x2b4   : > { %v604_v47 = vpop.f32.mrb[4].mxu0 }
 0x2b5   : > { %v605_v48 = vadd.f32 %v2343_v45, %v604_v47  ;;  %v2593_v49 = vpop.f32.mrb[5].mxu0 }
 0x2b6   : > { %v607_v50 = vpop.f32.mrb[6].mxu0  ;;  %2610 = vmatpush3.bf16.msra.mxu1 %v2821_v46 }
 0x2b7   : > { %v612_v52 = vpack.c.bf16 %v605_v48, %v605_v48  ;;  %v2594_v53 = vpop.f32.mrb[7].mxu0  ;;  %2623 = vmatprep.subr.bf16.mxu1 %v2941_v2 }
 0x2b9   : > { %v678_v54 = vsel %vm676_vm3, %v612_v52, 0  ;;  %2612 = vmatmul.mubr.msk.bf16.vlgmr.msra.gmra.mrb[8].mxu1 %vm384_vm1, %v409_v35 }
 0x2ba   : > { %2602 = vmatpush3.bf16.msra.mxu0 %v678_v54  ;;  %2624 = vmatpush3.bf16.msra.mxu1 %v2822_v51  ;;  %v2827_v51 = vld [vmem:[%s3493_s8 + $0x8] sm:$0xff]  }
 0x2bb   : > { %2625 = vmatprep.subr.bf16.mxu1 %v2941_v2  ;;  %2627 = vmatprep.mubr.msk.bf16.mxu1 %vm2942_vm0, %v2941_v2 }
 0x2bc   : > { %2615 = vmatprep.subr.bf16.mxu0 %v2941_v2 }
 0x2be   : > { %2626 = vmatpush3.bf16.msra.mxu1 %v2823_v55  ;;  %v2826_v55 = vld [vmem:[%s3493_s8] sm:$0xff]  }
 0x2bf   : > { %2637 = vmatprep.subr.bf16.mxu1 %v2941_v2 }
 0x2c1   : > { %2628 = vmatmul.mubr.msk.bf16.vlgmr.msra.gmra.mrb[12].mxu1 %vm384_vm1, %v3073_v9 }
 0x2c2   : > { %2639 = vmatprep.mubr.msk.bf16.mxu1 %vm2942_vm0, %v2941_v2 }
 0x384   : > { %v654_v57 = vpop.f32.mrb[4].mxu1 }
 0x385   : > { %v655_v58 = vadd.f32 %v654_v57, %v3155_v56  ;;  %v2599_v59 = vpop.f32.mrb[5].mxu1 }
 0x386   : > { %v657_v60 = vpop.f32.mrb[6].mxu1 }
 0x387   : > { %v2600_v61 = vpop.f32.mrb[7].mxu1  ;;  %v661_v62 = vsel %vm660_vm4, %v655_v58, -inf }
 0x388   : > { %662 = vmax.xlane.f32.xlu1 %v661_v62 }
 0x38c   : > { %v782_v63 = vpop.f32.mrb[8].mxu1 }
 0x38d   : > { %v2613_v0 = vpop.f32.mrb[9].mxu1 }
 0x38e   : > { %v785_v1 = vpop.f32.mrb[10].mxu1 }
 0x38f   : > { %v2614_v3 = vpop.f32.mrb[11].mxu1 }
 0x394   : > { %v912_v5 = vpop.f32.mrb[12].mxu1 }
 0x395   : > { %v913_v7 = vadd.f32 %v2372_v4, %v912_v5  ;;  %v2629_v8 = vpop.f32.mrb[13].mxu1 }
 0x396   : > { %v915_v10 = vpop.f32.mrb[14].mxu1 }
 0x397   : > { %v920_v11 = vpack.c.bf16 %v913_v7, %v913_v7  ;;  %v2630_v12 = vpop.f32.mrb[15].mxu1  ;;  %v2384_v7 = vld [vmem:[%s3491_s6] ss:$0 sm:$0xff] }
 0x399   : > { %v983_v13 = vsel %vm676_vm3, %v920_v11, 0 }
 0x39a   : > { %2638 = vmatpush3.bf16.msra.mxu1 %v983_v13 }
 0x39b   : > { %2649 = vmatprep.subr.bf16.mxu1 %v2941_v2 }
 0x415   : > { %v663_v14 = vpop.xlane.xlu1 %662 }
 0x416   : > { %v664_v15 = vsub.f32 %v655_v58, %v663_v14 }
 0x418   : > { %v665_v16 = vmul.f32 1.442695, %v664_v15 }
 0x41a   : > { %2852 = vpow2.f32 %v665_v16 }
 0x424   : > { %v2853_v17 = vpop.eup %2852 }
 0x425   : > { %v667_v18 = vsel %vm660_vm4, %v2853_v17, 0.0 }
 0x426   : > { %668 = vadd.xlane.f32.xlu1 %v667_v18 }
 0x4b3   : > { %v669_v19 = vpop.xlane.xlu1 %668 }
 0x4b4   : > { %2854 = vrcp.f32 %v669_v19 }
 0x4be   : > { %v2855_v20 = vpop.eup %2854 }
 0x4bf   : > { %v671_v21 = vmul.f32 %v2855_v20, %v2853_v17 }
 0x4c1   : > { %v672_v23 = vpack.c.bf16 %v671_v21, %v671_v21  ;;  %v2828_v21 = vld [vmem:[%s3494_s9] sm:$0xff]  }
 0x4c3   : > { %2604 = vmatmul.mubr.msk.bf16.vlgmr.msra.gmra.mrb[8].mxu0 %vm660_vm4, %v672_v23 }
 0x4c4   : > { %2616 = vmatpush3.bf16.msra.mxu0 %v2824_v22  ;;  %2619 = vmatprep.mubr.msk.bf16.mxu0 %vm2942_vm0, %v2941_v2 }
 0x4c5   : > { %2617 = vmatprep.subr.bf16.mxu0 %v2941_v2 }
 0x4c8   : > { %2618 = vmatpush3.bf16.msra.mxu0 %v2825_v24 }
 0x4c9   : > { %2631 = vmatprep.subr.bf16.mxu0 %v2941_v2 }
 0x4cb   : > { %2620 = vmatmul.mubr.msk.bf16.vlgmr.msra.gmra.mrb[12].mxu0 %vm384_vm1, %v3073_v9  ;;  %v2354_v9 = vld [vmem:[%s3490_s5 + $0x1] ss:$0 sm:$0xff] }
 0x4cc   : > { %2633 = vmatprep.mubr.msk.bf16.mxu0 %vm2942_vm0, %v2941_v2  ;;  %v783_v38 = vadd.f32 %v2354_v9, %v782_v63 }
 0x4ce   : > { %v918_v39 = vpack.c.bf16 %v783_v38, %v783_v38 }
 0x596   : > { %v714_v25 = vpop.f32.mrb[8].mxu0 }
 0x597   : > { %v2605_v26 = vpop.f32.mrb[9].mxu0  ;;  %v720_v58 = vpack.c.bf16 %v714_v25, %v714_v25 }
 0x598   : > { %v717_v27 = vpop.f32.mrb[10].mxu0  ;;  %v2385_v26 = vld [vmem:[%s3489_s4 + $0x2] ss:$0 sm:$0xff] }
 0x599   : > { %v2606_v28 = vpop.f32.mrb[11].mxu0 }
 0x59a   : > { %v2386_v28 = vld [vmem:[%s3489_s4 + $0x3] ss:$0 sm:$0xff] }
 0x59e   : > { %v847_v30 = vpop.f32.mrb[12].mxu0 }
 0x59f   : > { %v848_v31 = vadd.f32 %v2363_v29, %v847_v30  ;;  %v2621_v32 = vpop.f32.mrb[13].mxu0 }
 0x5a0   : > { %v850_v34 = vpop.f32.mrb[14].mxu0  ;;  %v2830_v32 = vld [vmem:[%s3494_s9 + $0x10] sm:$0xff]  }
 0x5a1   : > { %v919_v35 = vpack.c.bf16 %v848_v31, %v848_v31  ;;  %v2622_v36 = vpop.f32.mrb[15].mxu0  ;;  %v2831_v34 = vld [vmem:[%s3494_s9 + $0x18] sm:$0xff]  }
 0x5a3   : > { %v925_v37 = vsel %vm613_vm2, %v919_v35, 0  ;;  %v2387_v35 = vld [vmem:[%s3491_s6 + $0x1] ss:$0 sm:$0xff] }
 0x5a4   : > { %2632 = vmatpush3.bf16.xpose.msra.mxu0 %v925_v37 }
 0x5a5   : > { %2643 = vmatprep.subr.bf16.mxu0 %v2941_v2 }
 0x5ab   : > { %2634 = vmatmul.mubr.msk.bf16.vlgmr.msra.gmra.mrb[16].mxu0 %vm613_vm2, %v918_v39 }
 0x5ac   : > { %2645 = vmatprep.mubr.msk.bf16.mxu0 %vm2942_vm0, %v2941_v2  ;;  %2644 = vmatpush3.bf16.msra.mxu0 %v2827_v51 }
 0x5ad   : > { %2655 = vmatprep.subr.bf16.mxu0 %v2941_v2 }
 0x67e   : > { %v961_v40 = vpop.f32.mrb[16].mxu0 }
 0x67f   : > { %v962_v41 = vadd.f32 %v961_v40, %v3155_v56  ;;  %v2635_v42 = vpop.f32.mrb[17].mxu0 }
 0x680   : > { %v964_v43 = vpop.f32.mrb[18].mxu0  ;;  %v2832_v42 = vld [vmem:[%s3492_s7 + $0x80] sm:$0xff]  }
 0x681   : > { %v2636_v44 = vpop.f32.mrb[19].mxu0  ;;  %v967_v45 = vsel %vm660_vm4, %v962_v41, -inf  ;;  %v2833_v43 = vld [vmem:[%s3492_s7 + $0x88] sm:$0xff]  }
 0x682   : > { %968 = vmax.xlane.f32.xlu1 %v967_v45  ;;  %v2395_v44 = vld [vmem:[%s3491_s6 + $0x2] ss:$0 sm:$0xff] }
 0x70f   : > { %v969_v46 = vpop.xlane.xlu1 %968 }
 0x710   : > { %v970_v47 = vsub.f32 %v962_v41, %v969_v46 }
 0x712   : > { %v971_v48 = vmul.f32 1.442695, %v970_v47 }
 0x714   : > { %2856 = vpow2.f32 %v971_v48 }
 0x71e   : > { %v2857_v49 = vpop.eup %2856 }
 0x71f   : > { %v973_v50 = vsel %vm660_vm4, %v2857_v49, 0.0 }
 0x720   : > { %974 = vadd.xlane.f32.xlu1 %v973_v50 }
 0x7ad   : > { %v975_v52 = vpop.xlane.xlu1 %974 }
 0x7ae   : > { %2858 = vrcp.f32 %v975_v52 }
 0x7b8   : > { %v2859_v53 = vpop.eup %2858 }
 0x7b9   : > { %v977_v54 = vmul.f32 %v2859_v53, %v2857_v49 }
 0x7bb   : > { %v978_v57 = vpack.c.bf16 %v977_v54, %v977_v54 }
 0x7bd   : > { %2640 = vmatmul.mubr.msk.bf16.vlgmr.msra.gmra.mrb[16].mxu1 %vm660_vm4, %v978_v57 }
 0x7be   : > { %2650 = vmatpush3.bf16.msra.mxu1 %v2826_v55  ;;  %2651 = vmatprep.mubr.msk.bf16.mxu1 %vm2942_vm0, %v2941_v2 }
 0x7bf   : > { %2663 = vmatprep.subr.bf16.mxu1 %v2941_v2 }
 0x7c5   : > { %2652 = vmatmul.mubr.msk.bf16.vlgmr.msra.gmra.mrb[20].mxu1 %vm613_vm2, %v720_v58 }
 0x7c6   : > { %2667 = vmatprep.mubr.msk.bf16.mxu1 %vm2942_vm0, %v2941_v2  ;;  %2664 = vmatpush3.bf16.msra.mxu1 %v2830_v32 }
 0x7c7   : > { %2665 = vmatprep.subr.bf16.mxu1 %v2941_v2 }
 0x7ca   : > { %2666 = vmatpush3.bf16.msra.mxu1 %v2831_v34 }
 0x7cb   : > { %2679 = vmatprep.subr.bf16.mxu1 %v2941_v2 }
 0x890   : > { %v1019_v59 = vpop.f32.mrb[16].mxu1 }
 0x891   : > { %v1025_v60 = vpack.c.bf16 %v1019_v59, %v1019_v59  ;;  %v2641_v61 = vpop.f32.mrb[17].mxu1 }
 0x892   : > { %v1022_v62 = vpop.f32.mrb[18].mxu1  ;;  %v2835_v61 = vld [vmem:[%s3492_s7 + $0x68] sm:$0xff]  }
 0x893   : > { %v2642_v63 = vpop.f32.mrb[19].mxu1  ;;  %2646 = vmatmul.mubr.msk.bf16.vlgmr.msra.gmra.mrb[20].mxu0 %vm613_vm2, %v1025_v60  ;;  %v2834_v60 = vld [vmem:[%s3492_s7 + $0x60] sm:$0xff]   ;;  %v2417_v62 = vld [vmem:[%s3490_s5 + $0x8] ss:$0 sm:$0xff] }
 0x894   : > { %2659 = vmatprep.mubr.msk.bf16.mxu0 %vm2942_vm0, %v2941_v2  ;;  %2656 = vmatpush3.bf16.msra.mxu0 %v2828_v21  ;;  %v2408_v21 = vld [vmem:[%s3490_s5 + $0x6] ss:$0 sm:$0xff] }
 0x895   : > { %2657 = vmatprep.subr.bf16.mxu0 %v2941_v2 }
 0x898   : > { %v1121_v0 = vpop.f32.mrb[20].mxu1 }
 0x899   : > { %v2653_v1 = vpop.f32.mrb[21].mxu1 }
 0x89a   : > { %v1124_v3 = vpop.f32.mrb[22].mxu1 }
 0x89b   : > { %v2654_v4 = vpop.f32.mrb[23].mxu1 }
 0x966   : > { %v1072_v5 = vpop.f32.mrb[20].mxu0 }
 0x967   : > { %v1122_v8 = vadd.f32 %v1121_v0, %v1072_v5  ;;  %v2647_v10 = vpop.f32.mrb[21].mxu0 }
 0x968   : > { %v1075_v11 = vpop.f32.mrb[22].mxu0 }
 0x969   : > { %v1132_v12 = vadd.f32 %v2384_v7, %v1122_v8  ;;  %v2648_v13 = vpop.f32.mrb[23].mxu0 }
 0x96a   : > { %v2401_v13 = vld [vmem:[%s3489_s4 + $0x4] ss:$0 sm:$0xff] }
 0x96b   : > { %v1133_v14 = vadd.f32 %v1132_v12, %v3099_v33  ;;  %v2829_v33 = vld [vmem:[%s3494_s9 + $0x8] sm:$0xff]  }
 0x96c   : > { %2658 = vmatpush3.bf16.msra.mxu0 %v2829_v33 }
 0x96d   : > { %v1136_v15 = vsel %vm384_vm1, %v1133_v14, 0.0  ;;  %2671 = vmatprep.subr.bf16.mxu0 %v2941_v2 }
 0x96e   : > { %1137 = vadd.xlane.f32.xlu1 %v1136_v15  ;;  %v2402_v15 = vld [vmem:[%s3489_s4 + $0x5] ss:$0 sm:$0xff] }
 0x9fb   : > { %v1138_v16 = vpop.xlane.xlu1 %1137 }
 0x9fc   : > { %v1139_v17 = vmul.f32 0.03125, %v1138_v16 }
 0x9fe   : > { %v1140_v18 = vsub.f32 %v1133_v14, %v1139_v17 }
 0xa00   : > { %v1141_v19 = vmul.f32 %v1140_v18, %v1140_v18 }
 0xa02   : > { %v1142_v20 = vsel %vm384_vm1, %v1141_v19, 0.0 }
 0xa03   : > { %1143 = vadd.xlane.f32.xlu1 %v1142_v20  ;;  %v2837_v20 = vld [vmem:[%s3492_s7 + $0xa8] sm:$0xff]  }
 0xa90   : > { %v1144_v22 = vpop.xlane.xlu1 %1143 }
 0xa91   : > { %v1145_v23 = vmul.f32 0.03125, %v1144_v22 }
 0xa93   : > { %v1146_v24 = vadd.f32 1e-08, %v1145_v23 }
 0xa95   : > { %2860 = vrsqrt.f32 %v1146_v24 }
 0xa9f   : > { %v2861_v25 = vpop.eup %2860 }
 0xaa0   : > { %v1148_v27 = vmul.f32 %v2861_v25, %v1140_v18  ;;  %v2836_v18 = vld [vmem:[%s3492_s7 + $0xa0] sm:$0xff]   ;;  %v2838_v25 = vld [vmem:[%s3492_s7 + $0x70] sm:$0xff]  }
 0xaa2   : > { %v1153_v29 = vmul.f32 %v2385_v26, %v1148_v27 }
 0xaa4   : > { %v1158_v30 = vadd.f32 %v2386_v28, %v1153_v29  ;;  %v2426_v28 = vld [vmem:[%s3490_s5 + $0xa] ss:$0 sm:$0xff]  ;;  %v2839_v29 = vld [vmem:[%s3492_s7 + $0x78] sm:$0xff]  }
 0xaa6   : > { %v1159_v31 = vpack.c.bf16 %v1158_v30, %v1158_v30 }
 0xaa8   : > { %2660 = vmatmul.mubr.msk.bf16.vlgmr.msra.gmra.mrb[24].mxu0 %vm384_vm1, %v1159_v31 }
 0xaa9   : > { %2675 = vmatprep.mubr.msk.bf16.mxu0 %vm2942_vm0, %v2941_v2  ;;  %2672 = vmatpush3.bf16.msra.mxu0 %v2834_v60 }
 0xaaa   : > { %2673 = vmatprep.subr.bf16.mxu0 %v2941_v2 }
 0xaad   : > { %2674 = vmatpush3.bf16.msra.mxu0 %v2835_v61 }
 0xaae   : > { %2687 = vmatprep.subr.bf16.mxu0 %v2941_v2 }
 0xb7b   : > { %v1218_v36 = vpop.f32.mrb[24].mxu0 }
 0xb7c   : > { %v1219_v9 = vadd.f32 %v2387_v35, %v1218_v36  ;;  %v2661_v37 = vpop.f32.mrb[25].mxu0  ;;  %v2840_v35 = vld [vmem:[%s3492_s7 + $0xb0] sm:$0xff]  }
 0xb7d   : > { %v1221_v38 = vpop.f32.mrb[26].mxu0 }
 0xb7e   : > { %v1224_v39 = vmax.f32 %v1219_v9, 0.0  ;;  %v2662_v40 = vpop.f32.mrb[27].mxu0  ;;  %v2841_v38 = vld [vmem:[%s3492_s7 + $0xb8] sm:$0xff]  }
 0xb80   : > { %v1225_v41 = vpack.c.bf16 %v1224_v39, %v1224_v39 }
 0xb82   : > { %2668 = vmatmul.mubr.msk.bf16.vlgmr.msra.gmra.mrb[24].mxu1 %vm384_vm1, %v1225_v41 }
 0xb83   : > { %2683 = vmatprep.mubr.msk.bf16.mxu1 %vm2942_vm0, %v2941_v2  ;;  %2680 = vmatpush3.bf16.msra.mxu1 %v2832_v42 }
 0xb84   : > { %2681 = vmatprep.subr.bf16.mxu1 %v2941_v2 }
 0xb87   : > { %2682 = vmatpush3.bf16.msra.mxu1 %v2833_v43 }
 0xb88   : > { %2695 = vmatprep.subr.bf16.mxu1 %v2941_v2 }
 0xc55   : > { %v1285_v45 = vpop.f32.mrb[24].mxu1 }
 0xc56   : > { %v1286_v46 = vadd.f32 %v2395_v44, %v1285_v45  ;;  %v2669_v47 = vpop.f32.mrb[25].mxu1 }
 0xc57   : > { %v1288_v48 = vpop.f32.mrb[26].mxu1 }
 0xc58   : > { %v1291_v49 = vadd.f32 %v1286_v46, %v1158_v30  ;;  %v2670_v50 = vpop.f32.mrb[27].mxu1 }
 0xc5a   : > { %v1292_v51 = vmul.f32 %v1291_v49, %v3069_v6  ;;  %v2457_v49 = vld [vmem:[%s3490_s5 + $0xb] ss:$0 sm:$0xff] }
 0xc5c   : > { %v3260_v52 = vpack.c.bf16 %v1292_v51, %v1292_v51  ;;  %v1296_v53 = vsel %vm384_vm1, %v1292_v51, 0.0 }
 0xc5d   : > { %1297 = vadd.xlane.f32.xlu1 %v1296_v53 }
 0xc5e   : > { %2684 = vmatmul.mubr.msk.bf16.vlgmr.msra.gmra.mrb[28].mxu1 %vm384_vm1, %v3260_v52 }
 0xc5f   : > { %2697 = vmatprep.mubr.msk.bf16.mxu1 %vm2942_vm0, %v2941_v2 }
 0xcea   : > { %v1298_v54 = vpop.xlane.xlu1 %1297 }
 0xceb   : > { %v1299_v55 = vmul.f32 0.03125, %v1298_v54 }
 0xced   : > { %v1300_v57 = vsub.f32 %v1292_v51, %v1299_v55 }
 0xcef   : > { %v1301_v58 = vmul.f32 %v1300_v57, %v1300_v57 }
 0xcf1   : > { %v1302_v59 = vsel %vm384_vm1, %v1301_v58, 0.0 }
 0xcf2   : > { %1303 = vadd.xlane.f32.xlu1 %v1302_v59 }
 0xd31   : > { %v1451_v63 = vpop.f32.mrb[28].mxu1 }
 0xd32   : > { %v1452_v0 = vadd.f32 %v2417_v62, %v1451_v63  ;;  %v2685_v1 = vpop.f32.mrb[29].mxu1 }
 0xd33   : > { %v1454_v3 = vpop.f32.mrb[30].mxu1 }
 0xd34   : > { %v1523_v4 = vpack.c.bf16 %v1452_v0, %v1452_v0  ;;  %v2686_v5 = vpop.f32.mrb[31].mxu1 }
 0xd36   : > { %v1529_v7 = vsel %vm613_vm2, %v1523_v4, 0  ;;  %v2842_v4 = vld [vmem:[%s3492_s7 + $0x90] sm:$0xff]  }
 0xd37   : > { %2696 = vmatpush3.bf16.xpose.msra.mxu1 %v1529_v7  ;;  %v2843_v7 = vld [vmem:[%s3492_s7 + $0x98] sm:$0xff]  }
 0xd38   : > { %2707 = vmatprep.subr.bf16.mxu1 %v2941_v2 }
 0xd7f   : > { %v1304_v8 = vpop.xlane.xlu1 %1303 }
 0xd80   : > { %v1305_v10 = vmul.f32 0.03125, %v1304_v8 }
 0xd82   : > { %v1306_v11 = vadd.f32 1e-08, %v1305_v10 }
 0xd84   : > { %2862 = vrsqrt.f32 %v1306_v11 }
 0xd8e   : > { %v2863_v12 = vpop.eup %2862 }
 0xd8f   : > { %v1308_v14 = vmul.f32 %v2863_v12, %v1300_v57 }
 0xd91   : > { %v1313_v16 = vmul.f32 %v2401_v13, %v1308_v14  ;;  %v2448_v13 = vld [vmem:[%s3490_s5 + $0x9] ss:$0 sm:$0xff] }
 0xd93   : > { %v3287_v17 = vadd.f32 %v2402_v15, %v1313_v16 }
 0xd95   : > { %v1319_v19 = vpack.c.bf16 %v3287_v17, %v3287_v17 }
 0xd97   : > { %2676 = vmatmul.mubr.msk.bf16.vlgmr.msra.gmra.mrb[28].mxu0 %vm384_vm1, %v1319_v19 }
 0xd98   : > { %2688 = vmatpush3.bf16.msra.mxu0 %v2836_v18  ;;  %2691 = vmatprep.mubr.msk.bf16.mxu0 %vm2942_vm0, %v2941_v2 }
 0xd99   : > { %2689 = vmatprep.subr.bf16.mxu0 %v2941_v2 }
 0xd9c   : > { %2690 = vmatpush3.bf16.msra.mxu0 %v2837_v20 }
 0xd9d   : > { %2701 = vmatprep.subr.bf16.mxu0 %v2941_v2 }
 0xd9f   : > { %2692 = vmatmul.mubr.msk.bf16.vlgmr.msra.gmra.mrb[32].mxu0 %vm384_vm1, %v3260_v52 }
 0xda0   : > { %2703 = vmatprep.mubr.msk.bf16.mxu0 %vm2942_vm0, %v2941_v2 }
 0xe6a   : > { %v1383_v33 = vpop.f32.mrb[28].mxu0 }
 0xe6b   : > { %v1384_v22 = vadd.f32 %v2408_v21, %v1383_v33  ;;  %v2677_v23 = vpop.f32.mrb[29].mxu0 }
 0xe6c   : > { %v1386_v24 = vpop.f32.mrb[30].mxu0 }
 0xe6d   : > { %v1522_v26 = vpack.c.bf16 %v1384_v22, %v1384_v22  ;;  %v2678_v27 = vpop.f32.mrb[31].mxu0 }
 0xe6f   : > { %2698 = vmatmul.mubr.msk.bf16.vlgmr.msra.gmra.mrb[32].mxu1 %vm613_vm2, %v1522_v26 }
 0xe70   : > { %2708 = vmatpush3.bf16.msra.mxu1 %v2838_v25  ;;  %2711 = vmatprep.mubr.msk.bf16.mxu1 %vm2942_vm0, %v2941_v2 }
 0xe71   : > { %2709 = vmatprep.subr.bf16.mxu1 %v2941_v2 }
 0xe72   : > { %v1516_v30 = vpop.f32.mrb[32].mxu0 }
 0xe73   : > { %v1517_v31 = vadd.f32 %v2426_v28, %v1516_v30  ;;  %v2693_v32 = vpop.f32.mrb[33].mxu0 }
 0xe74   : > { %v1519_v34 = vpop.f32.mrb[34].mxu0  ;;  %2710 = vmatpush3.bf16.msra.mxu1 %v2839_v29 }
 0xe75   : > { %v1524_v36 = vpack.c.bf16 %v1517_v31, %v1517_v31  ;;  %v2694_v9 = vpop.f32.mrb[35].mxu0  ;;  %2723 = vmatprep.subr.bf16.mxu1 %v2941_v2 }
 0xe77   : > { %v1587_v37 = vsel %vm676_vm3, %v1524_v36, 0  ;;  %2712 = vmatmul.mubr.msk.bf16.vlgmr.msra.gmra.mrb[36].mxu1 %vm384_vm1, %v1319_v19 }
 0xe78   : > { %2702 = vmatpush3.bf16.msra.mxu0 %v1587_v37  ;;  %2724 = vmatpush3.bf16.msra.mxu1 %v2840_v35  ;;  %v2845_v35 = vld [vmem:[%s3493_s8 + $0x18] sm:$0xff]   ;;  %v2844_v37 = vld [vmem:[%s3493_s8 + $0x10] sm:$0xff]  }
 0xe79   : > { %2725 = vmatprep.subr.bf16.mxu1 %v2941_v2  ;;  %2727 = vmatprep.mubr.msk.bf16.mxu1 %vm2942_vm0, %v2941_v2 }
 0xe7a   : > { %2715 = vmatprep.subr.bf16.mxu0 %v2941_v2 }
 0xe7c   : > { %2726 = vmatpush3.bf16.msra.mxu1 %v2841_v38 }
 0xe7d   : > { %2737 = vmatprep.subr.bf16.mxu1 %v2941_v2 }
 0xe7f   : > { %2728 = vmatmul.mubr.msk.bf16.vlgmr.msra.gmra.mrb[40].mxu1 %vm384_vm1, %v3260_v52 }
 0xe80   : > { %2739 = vmatprep.mubr.msk.bf16.mxu1 %vm2942_vm0, %v2941_v2 }
 0xf42   : > { %v1565_v39 = vpop.f32.mrb[32].mxu1 }
 0xf43   : > { %v1566_v40 = vadd.f32 %v1565_v39, %v3155_v56  ;;  %v2699_v41 = vpop.f32.mrb[33].mxu1 }
 0xf44   : > { %v1568_v42 = vpop.f32.mrb[34].mxu1 }
 0xf45   : > { %v2700_v43 = vpop.f32.mrb[35].mxu1  ;;  %v1571_v44 = vsel %vm660_vm4, %v1566_v40, -inf }
 0xf46   : > { %1572 = vmax.xlane.f32.xlu0 %v1571_v44 }
 0xf4a   : > { %v1692_v45 = vpop.f32.mrb[36].mxu1 }
 0xf4b   : > { %v2713_v46 = vpop.f32.mrb[37].mxu1 }
 0xf4c   : > { %v1695_v47 = vpop.f32.mrb[38].mxu1 }
 0xf4d   : > { %v2714_v48 = vpop.f32.mrb[39].mxu1 }
 0xf52   : > { %v1822_v50 = vpop.f32.mrb[40].mxu1 }
 0xf53   : > { %v1823_v51 = vadd.f32 %v2457_v49, %v1822_v50  ;;  %v2729_v53 = vpop.f32.mrb[41].mxu1  ;;  %v2470_v50 = vld [vmem:[%s3491_s6 + $0x4] ss:$0 sm:$0xff] }
 0xf54   : > { %v1825_v54 = vpop.f32.mrb[42].mxu1 }
 0xf55   : > { %v1830_v55 = vpack.c.bf16 %v1823_v51, %v1823_v51  ;;  %v2730_v57 = vpop.f32.mrb[43].mxu1 }
 0xf57   : > { %v1893_v58 = vsel %vm676_vm3, %v1830_v55, 0 }
 0xf58   : > { %2738 = vmatpush3.bf16.msra.mxu1 %v1893_v58 }
 0xf59   : > { %2749 = vmatprep.subr.bf16.mxu1 %v2941_v2 }
 0xfd3   : > { %v1573_v59 = vpop.xlane.xlu0 %1572 }
 0xfd4   : > { %v1574_v60 = vsub.f32 %v1566_v40, %v1573_v59 }
 0xfd6   : > { %v1575_v61 = vmul.f32 1.442695, %v1574_v60 }
 0xfd8   : > { %2864 = vpow2.f32 %v1575_v61 }
 0xfe2   : > { %v2865_v62 = vpop.eup %2864 }
 0xfe3   : > { %v1577_v63 = vsel %vm660_vm4, %v2865_v62, 0.0 }
 0xfe4   : > { %1578 = vadd.xlane.f32.xlu1 %v1577_v63 }
0x1071   : > { %v1579_v0 = vpop.xlane.xlu1 %1578 }
0x1072   : > { %2866 = vrcp.f32 %v1579_v0 }
0x107c   : > { %v2867_v1 = vpop.eup %2866 }
0x107d   : > { %v1581_v3 = vmul.f32 %v2867_v1, %v2865_v62  ;;  %v2846_v1 = vld [vmem:[%s3494_s9 + $0x20] sm:$0xff]  }
0x107f   : > { %v1582_v5 = vpack.c.bf16 %v1581_v3, %v1581_v3 }
0x1081   : > { %2704 = vmatmul.mubr.msk.bf16.vlgmr.msra.gmra.mrb[36].mxu0 %vm660_vm4, %v1582_v5 }
0x1082   : > { %2716 = vmatpush3.bf16.msra.mxu0 %v2842_v4  ;;  %2719 = vmatprep.mubr.msk.bf16.mxu0 %vm2942_vm0, %v2941_v2 }
0x1083   : > { %2717 = vmatprep.subr.bf16.mxu0 %v2941_v2 }
0x1086   : > { %2718 = vmatpush3.bf16.msra.mxu0 %v2843_v7 }
0x1087   : > { %2731 = vmatprep.subr.bf16.mxu0 %v2941_v2 }
0x1089   : > { %2720 = vmatmul.mubr.msk.bf16.vlgmr.msra.gmra.mrb[40].mxu0 %vm384_vm1, %v3260_v52  ;;  %v2439_v52 = vld [vmem:[%s3490_s5 + $0x7] ss:$0 sm:$0xff] }
0x108a   : > { %2733 = vmatprep.mubr.msk.bf16.mxu0 %vm2942_vm0, %v2941_v2  ;;  %v1693_v33 = vadd.f32 %v2439_v52, %v1692_v45 }
0x108c   : > { %v1828_v22 = vpack.c.bf16 %v1693_v33, %v1693_v33 }
0x1154   : > { %v1623_v8 = vpop.f32.mrb[36].mxu0 }
0x1155   : > { %v2705_v10 = vpop.f32.mrb[37].mxu0  ;;  %v1629_v39 = vpack.c.bf16 %v1623_v8, %v1623_v8  ;;  %v2473_v8 = vld [vmem:[%s3489_s4 + $0x6] ss:$0 sm:$0xff] }
0x1156   : > { %v1626_v11 = vpop.f32.mrb[38].mxu0 }
0x1157   : > { %v2706_v12 = vpop.f32.mrb[39].mxu0  ;;  %v2474_v11 = vld [vmem:[%s3489_s4 + $0x7] ss:$0 sm:$0xff] }
0x115c   : > { %v1757_v14 = vpop.f32.mrb[40].mxu0 }
0x115d   : > { %v1758_v15 = vadd.f32 %v2448_v13, %v1757_v14  ;;  %v2721_v16 = vpop.f32.mrb[41].mxu0 }
0x115e   : > { %v1760_v18 = vpop.f32.mrb[42].mxu0  ;;  %v2849_v16 = vld [vmem:[%s3494_s9 + $0x38] sm:$0xff]  }
0x115f   : > { %v1829_v19 = vpack.c.bf16 %v1758_v15, %v1758_v15  ;;  %v2722_v20 = vpop.f32.mrb[43].mxu0  ;;  %v2848_v15 = vld [vmem:[%s3494_s9 + $0x30] sm:$0xff]   ;;  %v2480_v18 = vld [vmem:[%s3491_s6 + $0x5] ss:$0 sm:$0xff] }
0x1161   : > { %v1835_v21 = vsel %vm613_vm2, %v1829_v19, 0 }
0x1162   : > { %2732 = vmatpush3.bf16.xpose.msra.mxu0 %v1835_v21 }
0x1163   : > { %2743 = vmatprep.subr.bf16.mxu0 %v2941_v2 }
0x1169   : > { %2734 = vmatmul.mubr.msk.bf16.vlgmr.msra.gmra.mrb[44].mxu0 %vm613_vm2, %v1828_v22 }
0x116a   : > { %2745 = vmatprep.mubr.msk.bf16.mxu0 %vm2942_vm0, %v2941_v2  ;;  %2744 = vmatpush3.bf16.msra.mxu0 %v2845_v35 }
0x116b   : > { %2755 = vmatprep.subr.bf16.mxu0 %v2941_v2 }
0x123c   : > { %v1871_v23 = vpop.f32.mrb[44].mxu0 }
0x123d   : > { %v1872_v24 = vadd.f32 %v1871_v23, %v3155_v56  ;;  %v2735_v25 = vpop.f32.mrb[45].mxu0 }
0x123e   : > { %v1874_v26 = vpop.f32.mrb[46].mxu0 }
0x123f   : > { %v2736_v27 = vpop.f32.mrb[47].mxu0  ;;  %v1877_v28 = vsel %vm660_vm4, %v1872_v24, -inf }
0x1240   : > { %1878 = vmax.xlane.f32.xlu0 %v1877_v28 }
0x12cd   : > { %v1879_v29 = vpop.xlane.xlu0 %1878 }
0x12ce   : > { %v1880_v30 = vsub.f32 %v1872_v24, %v1879_v29 }
0x12d0   : > { %v1881_v31 = vmul.f32 1.442695, %v1880_v30 }
0x12d2   : > { %2868 = vpow2.f32 %v1881_v31 }
0x12dc   : > { %v2869_v32 = vpop.eup %2868 }
0x12dd   : > { %v1883_v34 = vsel %vm660_vm4, %v2869_v32, 0.0 }
0x12de   : > { %1884 = vadd.xlane.f32.xlu1 %v1883_v34 }
0x136b   : > { %v1885_v56 = vpop.xlane.xlu1 %1884 }
0x136c   : > { %2870 = vrcp.f32 %v1885_v56 }
0x1376   : > { %v2871_v36 = vpop.eup %2870 }
0x1377   : > { %v1887_v9 = vmul.f32 %v2871_v36, %v2869_v32 }
0x1379   : > { %v1888_v38 = vpack.c.bf16 %v1887_v9, %v1887_v9 }
0x137b   : > { %2740 = vmatmul.mubr.msk.bf16.vlgmr.msra.gmra.mrb[44].mxu1 %vm660_vm4, %v1888_v38 }
0x137c   : > { %2750 = vmatpush3.bf16.msra.mxu1 %v2844_v37  ;;  %2751 = vmatprep.mubr.msk.bf16.mxu1 %vm2942_vm0, %v2941_v2 }
0x137d   : > { %2763 = vmatprep.subr.bf16.mxu1 %v2941_v2 }
0x1383   : > { %2752 = vmatmul.mubr.msk.bf16.vlgmr.msra.gmra.mrb[48].mxu1 %vm613_vm2, %v1629_v39 }
0x1384   : > { %2767 = vmatprep.mubr.msk.bf16.mxu1 %vm2942_vm0, %v2941_v2  ;;  %2764 = vmatpush3.bf16.msra.mxu1 %v2848_v15 }
0x1385   : > { %2765 = vmatprep.subr.bf16.mxu1 %v2941_v2 }
0x1388   : > { %2766 = vmatpush3.bf16.msra.mxu1 %v2849_v16 }
0x144e   : > { %v1929_v40 = vpop.f32.mrb[44].mxu1 }
0x144f   : > { %v1935_v41 = vpack.c.bf16 %v1929_v40, %v1929_v40  ;;  %v2741_v42 = vpop.f32.mrb[45].mxu1 }
0x1450   : > { %v1932_v43 = vpop.f32.mrb[46].mxu1 }
0x1451   : > { %v2742_v44 = vpop.f32.mrb[47].mxu1  ;;  %2746 = vmatmul.mubr.msk.bf16.vlgmr.msra.gmra.mrb[48].mxu0 %vm613_vm2, %v1935_v41  ;;  %v2494_v41 = vld [vmem:[%s3488_s3 + $0x1] ss:$0 sm:$0xff] }
0x1452   : > { %2759 = vmatprep.mubr.msk.bf16.mxu0 %vm2942_vm0, %v2941_v2  ;;  %2756 = vmatpush3.bf16.msra.mxu0 %v2846_v1 }
0x1453   : > { %2757 = vmatprep.subr.bf16.mxu0 %v2941_v2  ;;  %v2489_v2 = vld [vmem:[%s3491_s6 + $0x6] ss:$0 sm:$0xff] }
0x1456   : > { %v2031_v45 = vpop.f32.mrb[48].mxu1 }
0x1457   : > { %v2753_v46 = vpop.f32.mrb[49].mxu1 }
0x1458   : > { %v2034_v47 = vpop.f32.mrb[50].mxu1 }
0x1459   : > { %v2754_v48 = vpop.f32.mrb[51].mxu1 }
0x1524   : > { %v1982_v49 = vpop.f32.mrb[48].mxu0 }
0x1525   : > { %v2032_v51 = vadd.f32 %v2031_v45, %v1982_v49  ;;  %v2747_v53 = vpop.f32.mrb[49].mxu0 }
0x1526   : > { %v1985_v54 = vpop.f32.mrb[50].mxu0 }
0x1527   : > { %v2043_v55 = vadd.f32 %v2470_v50, %v2032_v51  ;;  %v2748_v57 = vpop.f32.mrb[51].mxu0 }
0x1529   : > { %v2044_v58 = vadd.f32 %v2043_v55, %v3287_v17  ;;  %v2847_v17 = vld [vmem:[%s3494_s9 + $0x28] sm:$0xff]  }
0x152a   : > { %2758 = vmatpush3.bf16.msra.mxu0 %v2847_v17 }
0x152b   : > { %v2047_v59 = vsel %vm384_vm1, %v2044_v58, 0.0 }
0x152c   : > { %2048 = vadd.xlane.f32.xlu0 %v2047_v59 }
0x15b9   : > { %v2049_v60 = vpop.xlane.xlu0 %2048 }
0x15ba   : > { %v2050_v61 = vmul.f32 0.03125, %v2049_v60 }
0x15bc   : > { %v2051_v62 = vsub.f32 %v2044_v58, %v2050_v61 }
0x15be   : > { %v2052_v63 = vmul.f32 %v2051_v62, %v2051_v62 }
0x15c0   : > { %v2053_v0 = vsel %vm384_vm1, %v2052_v63, 0.0 }
0x15c1   : > { %2054 = vadd.xlane.f32.xlu1 %v2053_v0 }
0x164e   : > { %v2055_v3 = vpop.xlane.xlu1 %2054 }
0x164f   : > { %v2056_v4 = vmul.f32 0.03125, %v2055_v3 }
0x1651   : > { %v2057_v5 = vadd.f32 1e-08, %v2056_v4 }
0x1653   : > { %2872 = vrsqrt.f32 %v2057_v5 }
0x165d   : > { %v2873_v7 = vpop.eup %2872 }
0x165e   : > { %v2059_v10 = vmul.f32 %v2873_v7, %v2051_v62 }
0x1660   : > { %v2064_v12 = vmul.f32 %v2473_v8, %v2059_v10 }
0x1662   : > { %v2069_v13 = vadd.f32 %v2474_v11, %v2064_v12 }
0x1664   : > { %v2070_v14 = vpack.c.bf16 %v2069_v13, %v2069_v13 }
0x1666   : > { %2760 = vmatmul.mubr.msk.bf16.vlgmr.msra.gmra.mrb[52].mxu0 %vm384_vm1, %v2070_v14 }
0x1739   : > { %v2130_v19 = vpop.f32.mrb[52].mxu0 }
0x173a   : > { %v2131_v20 = vadd.f32 %v2480_v18, %v2130_v19  ;;  %v2761_v52 = vpop.f32.mrb[53].mxu0 }
0x173b   : > { %v2133_v21 = vpop.f32.mrb[54].mxu0 }
0x173c   : > { %v2136_v33 = vmax.f32 %v2131_v20, 0.0  ;;  %v2762_v22 = vpop.f32.mrb[55].mxu0 }
0x173e   : > { %v2137_v23 = vpack.c.bf16 %v2136_v33, %v2136_v33 }
0x1740   : > { %2768 = vmatmul.mubr.msk.bf16.vlgmr.msra.gmra.mrb[52].mxu1 %vm384_vm1, %v2137_v23 }
0x1813   : > { %v2197_v24 = vpop.f32.mrb[52].mxu1 }
0x1814   : > { %v2198_v25 = vadd.f32 %v2489_v2, %v2197_v24  ;;  %v2769_v26 = vpop.f32.mrb[53].mxu1 }
0x1815   : > { %v2200_v27 = vpop.f32.mrb[54].mxu1 }
0x1816   : > { %v2203_v28 = vadd.f32 %v2198_v25, %v2069_v13  ;;  %v2770_v29 = vpop.f32.mrb[55].mxu1 }
0x1818   : > { %v2204_v30 = vmul.f32 %v2203_v28, %v3069_v6  ;;  %v2493_v6 = vld [vmem:[%s3488_s3] ss:$0 sm:$0xff] }
0x181a   : > { %v2207_v31 = vsel %vm384_vm1, %v2204_v30, 0.0 }
0x181b   : > { %2208 = vadd.xlane.f32.xlu0 %v2207_v31 }
0x18a8   : > { %v2209_v32 = vpop.xlane.xlu0 %2208 }
0x18a9   : > { %v2210_v34 = vmul.f32 0.03125, %v2209_v32 }
0x18ab   : > { %v2211_v35 = vsub.f32 %v2204_v30, %v2210_v34 }
0x18ad   : > { %v2212_v56 = vmul.f32 %v2211_v35, %v2211_v35 }
0x18af   : > { %v2213_v36 = vsel %vm384_vm1, %v2212_v56, 0.0 }
0x18b0   : > { %2214 = vadd.xlane.f32.xlu1 %v2213_v36 }
0x193d   : > { %v2215_v9 = vpop.xlane.xlu1 %2214 }
0x193e   : > { %v2216_v37 = vmul.f32 0.03125, %v2215_v9 }
0x1940   : > { %v2217_v38 = vadd.f32 1e-08, %v2216_v37 }
0x1942   : > { %2874 = vrsqrt.f32 %v2217_v38 }
0x194c   : > { %v2875_v39 = vpop.eup %2874 }
0x194d   : > { %v2219_v40 = vmul.f32 %v2875_v39, %v2211_v35 }
0x194f   : > { %v2224_v42 = vmul.f32 %v2493_v6, %v2219_v40 }
0x1951   : > { %v2229_v43 = vadd.f32 %v2494_v41, %v2224_v42 }
0x1953   : > { %2230 = vst.msk [vmem:[%s363_s20] sm:$0xff] %vm384_vm1, %v2229_v43 }
0x1954   : > { %2889 = shalt.err (!%p2886_p3)
}
0x1955   : > { %s2890_s27 = scalar_lea.hbm %s3442_s0, 128  ;;  %s2894_s20 = scalar_lea.hbm %s3495_s10, 256 }
0x1956   : > { %p2891_p4 = scmp.ne.s32.totalorder %s3442_s0, %s2890_s27  ;;  %p2895_p9 = scmp.lt.u32.totalorder %s3442_s0, %s3495_s10 }
0x1957   : > { %p2896_p10 = scmp.lt.u32.totalorder %s2894_s20, %s2890_s27  ;;  %p2898_p12 = scmp.lt.u32.totalorder %s2890_s27, %s3442_s0 }
0x1958   : > { %p2892_p7 = pnand %p2891_p4, %p3037_p5 }
0x1959   : > { %p2897_p11 = por %p2896_p10, %p2895_p9 }
0x195a   : > { %p2893_p8 = pneg %p2892_p7 }
0x195b   : > { %p2899_p13 = por %p2898_p12, %p2897_p11 }
0x195d   : > { %p2900_p0 = pnand %p2899_p13, %p2893_p8 }
0x195f   : > { %2903 = shalt.err (!%p2900_p0)
}
0x1960   : > { %2771 = dma.vmem_to_hbm [thread:$0]  (%p3037_p5), %s3444_s21, 128, %s3442_s0, %s2232_s29  }
0x1961 PF: > { %p2777_p1 = scmp.ge.s32.totalorder %s2938_s16, 2  ;;  %s2257_s30 = sand.u32 1, %s2926_s13  }
0x1962   : > { %s2258_s17 = scalar_lea.sflag [#allocation3], %s2257_s30 }
0x1963   : > { %p2774_p2 = pnand %p2777_p1, %p3041_p6 }
0x1965   : > { %2921 = dma.done.wait (!%p2774_p2), %s2258_s17, 128  }
0x1966   : > { %2923 = vsyncadd (!%p2774_p2), %s2258_s17, 4294967168  ;;  %p20_p3 = scmp.ge.s32.totalorder %s3024_s19, 4   ;;  %s3500_s13 = smov %s2930_s14 }
0x1967   : > { %s3501_s14 = smov %s2934_s15  ;;  %s3502_s15 = smov %s3035_s22 }
0x1968   : > { %s3503_s16 = smov %s3024_s19  ;;  %22 = sbr.rel (!%p20_p3) target bundleno = 5 (0x5), region = 128 }
0x196f   :  { %2263 = vsyncpa [#allocation3], 1 }
0x1970   :  { %2265 = vsyncpa [#allocation3 + $0x1], 1 }

// kernel: tpu_custom_call.1
= control target key start
LH: loop header
LB: loop body
LE: loop exit
PB: predicated region body
PF: predicated region fallthrough
CT: control target
= control target key end

     0   :  { %s3485_s0 = inlined_call_operand.vmem [shape: f32[16,32], index: 0, kind: input, shape index: {}]   ;;  %s3486_s1 = inlined_call_operand.vmem [shape: f32[16,1], index: 1, kind: input, shape index: {}]   ;;  %s3487_s2 = inlined_call_operand.vmem [shape: f32[8,8], index: 2, kind: input, shape index: {}]   ;;  %s3488_s3 = inlined_call_operand.vmem [shape: f32[2,32], index: 3, kind: input, shape index: {}]   ;;  %s3489_s4 = inlined_call_operand.vmem [shape: f32[2,4,32], index: 4, kind: input, shape index: {}]   ;;  %s3490_s5 = inlined_call_operand.vmem [shape: f32[2,3,2,1,16], index: 5, kind: input, shape index: {}]   ;;  %s3491_s6 = inlined_call_operand.vmem [shape: f32[2,3,32], index: 6, kind: input, shape index: {}]   ;;  %s3492_s7 = inlined_call_operand.vmem [shape: bf16[2,3,2,32,16], index: 7, kind: input, shape index: {}]   ;;  %s3493_s8 = inlined_call_operand.vmem [shape: bf16[2,2,16,32], index: 8, kind: input, shape index: {}]   ;;  %s3494_s9 = inlined_call_operand.vmem [shape: bf16[2,2,32,32], index: 9, kind: input, shape index: {}]   ;;  %s3495_s10 = inlined_call_operand.hbm [shape: f32[16,32], index: 10, kind: output, shape index: {}]  }
   0x1   :  { %3496 = sst [smem:[#allocation5_spill]] %s3485_s0 }
   0x2   :  { %15 = vsyncpa [#allocation3], 0 }
   0x3   :  { %17 = vsyncpa [#allocation3 + $0x1], 0  ;;  %s2999_s13 = smov 0   ;;  %s3001_s14 = smov 0  }
   0x4   :  { %s3003_s15 = smov 0   ;;  %s3005_s16 = smov 0  }
   0x5 LB: > { %s3020_s17 = sadd.s32 4294967295, %s2938_s16   ;;  %s2316_s18 = sadd.s32 4294967294, %s2938_s16   ;;  %s2938_s16 = sphi %s3005_s16, %s3503_s16   ;;  %s2934_s15 = sphi %s3003_s15, %s3502_s15   ;;  %s2930_s14 = sphi %s3001_s14, %s3501_s14   ;;  %s2926_s13 = sphi %s2999_s13, %s3500_s13  }
   0x6   : > { %s3024_s19 = sadd.s32 1, %s2938_s16   ;;  %s250_s20 = sadd.s32 1, %s2934_s15 }
   0x7   : > { %s247_s21 = ssub.s32 %s2938_s16, %s3024_s19  ;;  %p260_p0 = scmp.ne.s32.totalorder %s2934_s15, %s2930_s14 }
   0x8   : > { %p248_p1 = scmp.eq.s32.totalorder %s247_s21, 0  ;;  %p261_p2 = scmp.eq.s32.totalorder %s3020_s17, 1 }
   0x9   : > { %p266_p3 = scmp.ne.s32.totalorder %s2930_s14, %s2926_s13  ;;  %p267_p4 = scmp.eq.s32.totalorder %s2316_s18, 1 }
   0xa   : > { %s3035_s22 = scalar_select %p248_p1, %s2934_s15, %s250_s20  }
   0xb   : > { %p3037_p5 = por %p261_p2, %p260_p0  ;;  %p3041_p6 = por %p267_p4, %p266_p3 }
   0xc   : > { %p2319_p7 = scmp.ge.s32.totalorder %s2938_s16, 1  ;;  %p323_p8 = scmp.lt.s32.totalorder %s2938_s16, 3 }
   0xe   : > { %p324_p9 = pnand %p2319_p7, %p323_p8 }
   0xf   : > { %p364_p10 = scmp.lt.s32.totalorder (!%p324_p9), %s3020_s17, 1  ;;  %v2814_v0 = vld [vmem:[%s3492_s7 + $0x20] sm:$0xff] (!%p324_p9)   ;;  %v2940_v1 = vmov (!%p324_p9), 0   ;;  %v2941_v2 = vmov (!%p324_p9), 0.0   ;;  %v2815_v4 = vld [vmem:[%s3492_s7 + $0x28] sm:$0xff] (!%p324_p9)   ;;  %vm2942_vm0 = vmmov (!%p324_p9), 0  }
  0x10   : > { %327 = sbr.rel (%p324_p9) target bundleno = 6497 (0x1961), region = 60  ;;  %2813 = vset.pattern.permute.xlu0 (!%p324_p9), %v2940_v1  ;;  %2579 = vmatprep.subr.bf16.mxu1 (!%p324_p9), %v2941_v2  ;;  %s3499_s0 = sld [smem:[#allocation5_spill]] (!%p324_p9)  ;;  %vm384_vm1 = vcmask (!%p324_p9), 261120   ;;  %v2816_v15 = vld [vmem:[%s3492_s7] sm:$0xff] (!%p324_p9)   ;;  %v2817_v16 = vld [vmem:[%s3492_s7 + $0x8] sm:$0xff] (!%p324_p9)   ;;  %vm613_vm2 = vcmask (!%p324_p9), 130048  }
  0x11   : > { %2580 = vmatpush3.bf16.msra.mxu1 (!%p324_p9), %v2814_v0  ;;  %2571 = vmatprep.subr.bf16.mxu0 (!%p324_p9), %v2941_v2  ;;  %v2334_v17 = vld [vmem:[%s3490_s5 + $0x2] ss:$0 sm:$0xff] (!%p324_p9)  ;;  %v2323_v29 = vld [vmem:[%s3489_s4] ss:$0 sm:$0xff] (!%p324_p9)  ;;  %v2324_v31 = vld [vmem:[%s3489_s4 + $0x1] ss:$0 sm:$0xff] (!%p324_p9) }
  0x12   : > { %2581 = vmatprep.subr.bf16.mxu1 (!%p324_p9), %v2941_v2  ;;  %2583 = vmatprep.mubr.msk.bf16.mxu1 (!%p324_p9), %vm2942_vm0, %v2941_v2  ;;  %v2818_v34 = vld [vmem:[%s3492_s7 + $0x40] sm:$0xff] (!%p324_p9)   ;;  %v2819_v36 = vld [vmem:[%s3492_s7 + $0x48] sm:$0xff] (!%p324_p9)   ;;  %v2820_v42 = vld [vmem:[%s3492_s7 + $0x10] sm:$0xff] (!%p324_p9)   ;;  %vm676_vm3 = vcmask (!%p324_p9), 1043456   ;;  %vm660_vm4 = vcmask (!%p324_p9), 64512   ;;  %s2496_s18 = sshll.u32 (!%p324_p9), %s3020_s17, 7 }
  0x13   : > { %2575 = vmatprep.mubr.msk.bf16.mxu0 (!%p324_p9), %vm2942_vm0, %v2941_v2  ;;  %2572 = vmatpush3.bf16.msra.mxu0 (!%p324_p9), %v2816_v15  ;;  %v2325_v37 = vld [vmem:[%s3490_s5] ss:$0 sm:$0xff] (!%p324_p9)  ;;  %v2343_v45 = vld [vmem:[%s3490_s5 + $0x4] ss:$0 sm:$0xff] (!%p324_p9)  ;;  %v2821_v46 = vld [vmem:[%s3492_s7 + $0x18] sm:$0xff] (!%p324_p9)  }
  0x14   : > { %2573 = vmatprep.subr.bf16.mxu0 (!%p324_p9), %v2941_v2  ;;  %v2822_v51 = vld [vmem:[%s3492_s7 + $0x50] sm:$0xff] (!%p324_p9)   ;;  %v2823_v55 = vld [vmem:[%s3492_s7 + $0x58] sm:$0xff] (!%p324_p9)   ;;  %v3155_v56 = vld [vmem:[%s3487_s2] sm:$0xff] (!%p324_p9) }
  0x15   : > { %2582 = vmatpush3.bf16.msra.mxu1 (!%p324_p9), %v2815_v4  ;;  %v2372_v4 = vld [vmem:[%s3490_s5 + $0x5] ss:$0 sm:$0xff] (!%p324_p9) }
  0x16   : > { %2595 = vmatprep.subr.bf16.mxu1 (!%p324_p9), %v2941_v2 }
  0x17   : > { %s365_s27 = scalar_select %p364_p10, %s3020_s17, 1  ;;  %2574 = vmatpush3.bf16.msra.mxu0 %v2817_v16 }
  0x18   : > { %2587 = vmatprep.subr.bf16.mxu0 %v2941_v2  ;;  %s2943_s17 = smov [#allocation2]  }
  0x19   : > { %s2321_s28 = sshll.u32 %s365_s27, 3  ;;  %s361_s27 = sand.u32 1, %s2930_s14  }
  0x1a   : > { %s371_s11 = scalar_lea.vmem %s3486_s1, %s2321_s28  ;;  %s367_s25 = scalar_lea.vmem %s3499_s0, %s2321_s28 }
  0x1b   : > { %v373_v3 = vld [vmem:[%s371_s11] sm:$0xff]  ;;  %s2320_s28 = sshll.u32 %s361_s27, 3  ;;  %s3442_s0 = scalar_lea.hbm %s3495_s10, %s2496_s18 }
  0x1c   : > { %378 = vperm.xlu0 %2813, %v373_v3   ;;  %v375_v5 = vld [vmem:[%s367_s25] sm:$0xff]  ;;  %s363_s20 = scalar_lea.vmem [#allocation2], %s2320_s28  ;;  %s2232_s29 = scalar_lea.sflag [#allocation3], %s361_s27 }
  0x1d   : > { %s2245_s21 = sshll.u32 %s363_s20, 4  ;;  %s2880_s28 = sshll.u32 %s2943_s17, 4  ;;  %s3444_s21 = int_to_ptr.vmem [resolvable:$true] %s2245_s21  ;;  %s2881_s28 = int_to_ptr.vmem [resolvable:$false] %s2880_s28 }
  0x1e   : > { %s2876_s30 = scalar_lea.vmem %s3444_s21, 128  ;;  %s2882_s11 = scalar_lea.vmem %s2881_s28, 256 }
  0x1f   : > { %p2877_p11 = scmp.ne.s32.totalorder %s3444_s21, %s2876_s30  ;;  %p2883_p0 = scmp.lt.s32.totalorder %s3444_s21, %s2881_s28 }
  0x20   : > { %p2884_p1 = scmp.lt.s32.totalorder %s2882_s11, %s2876_s30 }
  0x21   : > { %p2878_p12 = pnand %p2877_p11, %p3037_p5 }
  0x22   : > { %p2885_p2 = por %p2884_p1, %p2883_p0 }
  0x23   : > { %p2879_p13 = pneg %p2878_p12 }
  0x25   : > { %p2886_p3 = pnand %p2885_p2, %p2879_p13 }
  0x9b   : > { %v3069_v6 = vpop.permute.xlu0 %378 }
  0x9c   : > { %v381_v7 = vmul.f32 %v3069_v6, %v375_v5 }
  0x9e   : > { %v385_v8 = vsel %vm384_vm1, %v381_v7, 0.0  ;;  %v3073_v9 = vpack.c.bf16 %v381_v7, %v381_v7 }
  0x9f   : > { %386 = vadd.xlane.f32.xlu0 %v385_v8 }
  0xa0   : > { %2584 = vmatmul.mubr.msk.bf16.vlgmr.msra.gmra.mrb[0].mxu1 %vm384_vm1, %v3073_v9 }
  0xa1   : > { %2597 = vmatprep.mubr.msk.bf16.mxu1 %vm2942_vm0, %v2941_v2 }
 0x12c   : > { %v387_v10 = vpop.xlane.xlu0 %386 }
 0x12d   : > { %v389_v11 = vmul.f32 0.03125, %v387_v10 }
 0x12f   : > { %v390_v12 = vsub.f32 %v381_v7, %v389_v11 }
 0x131   : > { %v391_v13 = vmul.f32 %v390_v12, %v390_v12 }
 0x133   : > { %v392_v14 = vsel %vm384_vm1, %v391_v13, 0.0 }
 0x134   : > { %393 = vadd.xlane.f32.xlu1 %v392_v14 }
 0x173   : > { %v539_v18 = vpop.f32.mrb[0].mxu1 }
 0x174   : > { %v540_v19 = vadd.f32 %v2334_v17, %v539_v18  ;;  %v2585_v20 = vpop.f32.mrb[1].mxu1 }
 0x175   : > { %v542_v21 = vpop.f32.mrb[2].mxu1 }
 0x176   : > { %v611_v22 = vpack.c.bf16 %v540_v19, %v540_v19  ;;  %v2586_v23 = vpop.f32.mrb[3].mxu1 }
 0x178   : > { %v618_v24 = vsel %vm613_vm2, %v611_v22, 0  ;;  %v2824_v22 = vld [vmem:[%s3492_s7 + $0x30] sm:$0xff]  }
 0x179   : > { %2596 = vmatpush3.bf16.xpose.msra.mxu1 %v618_v24  ;;  %v2825_v24 = vld [vmem:[%s3492_s7 + $0x38] sm:$0xff]  }
 0x17a   : > { %2607 = vmatprep.subr.bf16.mxu1 %v2941_v2 }
 0x1c1   : > { %v394_v25 = vpop.xlane.xlu1 %393 }
 0x1c2   : > { %v395_v26 = vmul.f32 0.03125, %v394_v25 }
 0x1c4   : > { %v396_v27 = vadd.f32 1e-08, %v395_v26 }
 0x1c6   : > { %2850 = vrsqrt.f32 %v396_v27 }
 0x1d0   : > { %v2851_v28 = vpop.eup %2850 }
 0x1d1   : > { %v398_v30 = vmul.f32 %v2851_v28, %v390_v12 }
 0x1d3   : > { %v403_v32 = vmul.f32 %v2323_v29, %v398_v30  ;;  %v2363_v29 = vld [vmem:[%s3490_s5 + $0x3] ss:$0 sm:$0xff] }
 0x1d5   : > { %v3099_v33 = vadd.f32 %v2324_v31, %v403_v32 }
 0x1d7   : > { %v409_v35 = vpack.c.bf16 %v3099_v33, %v3099_v33 }
 0x1d9   : > { %2576 = vmatmul.mubr.msk.bf16.vlgmr.msra.gmra.mrb[0].mxu0 %vm384_vm1, %v409_v35 }
 0x1da   : > { %2588 = vmatpush3.bf16.msra.mxu0 %v2818_v34  ;;  %2591 = vmatprep.mubr.msk.bf16.mxu0 %vm2942_vm0, %v2941_v2 }
 0x1db   : > { %2589 = vmatprep.subr.bf16.mxu0 %v2941_v2 }
 0x1de   : > { %2590 = vmatpush3.bf16.msra.mxu0 %v2819_v36 }
 0x1df   : > { %2601 = vmatprep.subr.bf16.mxu0 %v2941_v2 }
 0x1e1   : > { %2592 = vmatmul.mubr.msk.bf16.vlgmr.msra.gmra.mrb[4].mxu0 %vm384_vm1, %v3073_v9 }
 0x1e2   : > { %2603 = vmatprep.mubr.msk.bf16.mxu0 %vm2942_vm0, %v2941_v2 }
 0x2ac   : > { %v471_v38 = vpop.f32.mrb[0].mxu0 }
 0x2ad   : > { %v472_v39 = vadd.f32 %v2325_v37, %v471_v38  ;;  %v2577_v40 = vpop.f32.mrb[1].mxu0 }
 0x2ae   : > { %v474_v41 = vpop.f32.mrb[2].mxu0 }
 0x2af   : > { %v610_v43 = vpack.c.bf16 %v472_v39, %v472_v39  ;;  %v2578_v44 = vpop.f32.mrb[3].mxu0 }
 0x2b1   : > { %2598 = vmatmul.mubr.msk.bf16.vlgmr.msra.gmra.mrb[4].mxu1 %vm613_vm2, %v610_v43 }
 0x2b2   : > { %2608 = vmatpush3.bf16.msra.mxu1 %v2820_v42  ;;  %2611 = vmatprep.mubr.msk.bf16.mxu1 %vm2942_vm0, %v2941_v2 }
 0x2b3   : > { %2609 = vmatprep.subr.bf16.mxu1 %v2941_v2 }
 0x2b4   : > { %v604_v47 = vpop.f32.mrb[4].mxu0 }
 0x2b5   : > { %v605_v48 = vadd.f32 %v2343_v45, %v604_v47  ;;  %v2593_v49 = vpop.f32.mrb[5].mxu0 }
 0x2b6   : > { %v607_v50 = vpop.f32.mrb[6].mxu0  ;;  %2610 = vmatpush3.bf16.msra.mxu1 %v2821_v46 }
 0x2b7   : > { %v612_v52 = vpack.c.bf16 %v605_v48, %v605_v48  ;;  %v2594_v53 = vpop.f32.mrb[7].mxu0  ;;  %2623 = vmatprep.subr.bf16.mxu1 %v2941_v2 }
 0x2b9   : > { %v678_v54 = vsel %vm676_vm3, %v612_v52, 0  ;;  %2612 = vmatmul.mubr.msk.bf16.vlgmr.msra.gmra.mrb[8].mxu1 %vm384_vm1, %v409_v35 }
 0x2ba   : > { %2602 = vmatpush3.bf16.msra.mxu0 %v678_v54  ;;  %2624 = vmatpush3.bf16.msra.mxu1 %v2822_v51  ;;  %v2827_v51 = vld [vmem:[%s3493_s8 + $0x8] sm:$0xff]  }
 0x2bb   : > { %2625 = vmatprep.subr.bf16.mxu1 %v2941_v2  ;;  %2627 = vmatprep.mubr.msk.bf16.mxu1 %vm2942_vm0, %v2941_v2 }
 0x2bc   : > { %2615 = vmatprep.subr.bf16.mxu0 %v2941_v2 }
 0x2be   : > { %2626 = vmatpush3.bf16.msra.mxu1 %v2823_v55  ;;  %v2826_v55 = vld [vmem:[%s3493_s8] sm:$0xff]  }
 0x2bf   : > { %2637 = vmatprep.subr.bf16.mxu1 %v2941_v2 }
 0x2c1   : > { %2628 = vmatmul.mubr.msk.bf16.vlgmr.msra.gmra.mrb[12].mxu1 %vm384_vm1, %v3073_v9 }
 0x2c2   : > { %2639 = vmatprep.mubr.msk.bf16.mxu1 %vm2942_vm0, %v2941_v2 }
 0x384   : > { %v654_v57 = vpop.f32.mrb[4].mxu1 }
 0x385   : > { %v655_v58 = vadd.f32 %v654_v57, %v3155_v56  ;;  %v2599_v59 = vpop.f32.mrb[5].mxu1 }
 0x386   : > { %v657_v60 = vpop.f32.mrb[6].mxu1 }
 0x387   : > { %v2600_v61 = vpop.f32.mrb[7].mxu1  ;;  %v661_v62 = vsel %vm660_vm4, %v655_v58, -inf }
 0x388   : > { %662 = vmax.xlane.f32.xlu1 %v661_v62 }
 0x38c   : > { %v782_v63 = vpop.f32.mrb[8].mxu1 }
 0x38d   : > { %v2613_v0 = vpop.f32.mrb[9].mxu1 }
 0x38e   : > { %v785_v1 = vpop.f32.mrb[10].mxu1 }
 0x38f   : > { %v2614_v3 = vpop.f32.mrb[11].mxu1 }
 0x394   : > { %v912_v5 = vpop.f32.mrb[12].mxu1 }
 0x395   : > { %v913_v7 = vadd.f32 %v2372_v4, %v912_v5  ;;  %v2629_v8 = vpop.f32.mrb[13].mxu1 }
 0x396   : > { %v915_v10 = vpop.f32.mrb[14].mxu1 }
 0x397   : > { %v920_v11 = vpack.c.bf16 %v913_v7, %v913_v7  ;;  %v2630_v12 = vpop.f32.mrb[15].mxu1  ;;  %v2384_v7 = vld [vmem:[%s3491_s6] ss:$0 sm:$0xff] }
 0x399   : > { %v983_v13 = vsel %vm676_vm3, %v920_v11, 0 }
 0x39a   : > { %2638 = vmatpush3.bf16.msra.mxu1 %v983_v13 }
 0x39b   : > { %2649 = vmatprep.subr.bf16.mxu1 %v2941_v2 }
 0x415   : > { %v663_v14 = vpop.xlane.xlu1 %662 }
 0x416   : > { %v664_v15 = vsub.f32 %v655_v58, %v663_v14 }
 0x418   : > { %v665_v16 = vmul.f32 1.442695, %v664_v15 }
 0x41a   : > { %2852 = vpow2.f32 %v665_v16 }
 0x424   : > { %v2853_v17 = vpop.eup %2852 }
 0x425   : > { %v667_v18 = vsel %vm660_vm4, %v2853_v17, 0.0 }
 0x426   : > { %668 = vadd.xlane.f32.xlu1 %v667_v18 }
 0x4b3   : > { %v669_v19 = vpop.xlane.xlu1 %668 }
 0x4b4   : > { %2854 = vrcp.f32 %v669_v19 }
 0x4be   : > { %v2855_v20 = vpop.eup %2854 }
 0x4bf   : > { %v671_v21 = vmul.f32 %v2855_v20, %v2853_v17 }
 0x4c1   : > { %v672_v23 = vpack.c.bf16 %v671_v21, %v671_v21  ;;  %v2828_v21 = vld [vmem:[%s3494_s9] sm:$0xff]  }
 0x4c3   : > { %2604 = vmatmul.mubr.msk.bf16.vlgmr.msra.gmra.mrb[8].mxu0 %vm660_vm4, %v672_v23 }
 0x4c4   : > { %2616 = vmatpush3.bf16.msra.mxu0 %v2824_v22  ;;  %2619 = vmatprep.mubr.msk.bf16.mxu0 %vm2942_vm0, %v2941_v2 }
 0x4c5   : > { %2617 = vmatprep.subr.bf16.mxu0 %v2941_v2 }
 0x4c8   : > { %2618 = vmatpush3.bf16.msra.mxu0 %v2825_v24 }
 0x4c9   : > { %2631 = vmatprep.subr.bf16.mxu0 %v2941_v2 }
 0x4cb   : > { %2620 = vmatmul.mubr.msk.bf16.vlgmr.msra.gmra.mrb[12].mxu0 %vm384_vm1, %v3073_v9  ;;  %v2354_v9 = vld [vmem:[%s3490_s5 + $0x1] ss:$0 sm:$0xff] }
 0x4cc   : > { %2633 = vmatprep.mubr.msk.bf16.mxu0 %vm2942_vm0, %v2941_v2  ;;  %v783_v38 = vadd.f32 %v2354_v9, %v782_v63 }
 0x4ce   : > { %v918_v39 = vpack.c.bf16 %v783_v38, %v783_v38 }
 0x596   : > { %v714_v25 = vpop.f32.mrb[8].mxu0 }
 0x597   : > { %v2605_v26 = vpop.f32.mrb[9].mxu0  ;;  %v720_v58 = vpack.c.bf16 %v714_v25, %v714_v25 }
 0x598   : > { %v717_v27 = vpop.f32.mrb[10].mxu0  ;;  %v2385_v26 = vld [vmem:[%s3489_s4 + $0x2] ss:$0 sm:$0xff] }
 0x599   : > { %v2606_v28 = vpop.f32.mrb[11].mxu0 }
 0x59a   : > { %v2386_v28 = vld [vmem:[%s3489_s4 + $0x3] ss:$0 sm:$0xff] }
 0x59e   : > { %v847_v30 = vpop.f32.mrb[12].mxu0 }
 0x59f   : > { %v848_v31 = vadd.f32 %v2363_v29, %v847_v30  ;;  %v2621_v32 = vpop.f32.mrb[13].mxu0 }
 0x5a0   : > { %v850_v34 = vpop.f32.mrb[14].mxu0  ;;  %v2830_v32 = vld [vmem:[%s3494_s9 + $0x10] sm:$0xff]  }
 0x5a1   : > { %v919_v35 = vpack.c.bf16 %v848_v31, %v848_v31  ;;  %v2622_v36 = vpop.f32.mrb[15].mxu0  ;;  %v2831_v34 = vld [vmem:[%s3494_s9 + $0x18] sm:$0xff]  }
 0x5a3   : > { %v925_v37 = vsel %vm613_vm2, %v919_v35, 0  ;;  %v2387_v35 = vld [vmem:[%s3491_s6 + $0x1] ss:$0 sm:$0xff] }
 0x5a4   : > { %2632 = vmatpush3.bf16.xpose.msra.mxu0 %v925_v37 }
 0x5a5   : > { %2643 = vmatprep.subr.bf16.mxu0 %v2941_v2 }
 0x5ab   : > { %2634 = vmatmul.mubr.msk.bf16.vlgmr.msra.gmra.mrb[16].mxu0 %vm613_vm2, %v918_v39 }
 0x5ac   : > { %2645 = vmatprep.mubr.msk.bf16.mxu0 %vm2942_vm0, %v2941_v2  ;;  %2644 = vmatpush3.bf16.msra.mxu0 %v2827_v51 }
 0x5ad   : > { %2655 = vmatprep.subr.bf16.mxu0 %v2941_v2 }
 0x67e   : > { %v961_v40 = vpop.f32.mrb[16].mxu0 }
 0x67f   : > { %v962_v41 = vadd.f32 %v961_v40, %v3155_v56  ;;  %v2635_v42 = vpop.f32.mrb[17].mxu0 }
 0x680   : > { %v964_v43 = vpop.f32.mrb[18].mxu0  ;;  %v2832_v42 = vld [vmem:[%s3492_s7 + $0x80] sm:$0xff]  }
 0x681   : > { %v2636_v44 = vpop.f32.mrb[19].mxu0  ;;  %v967_v45 = vsel %vm660_vm4, %v962_v41, -inf  ;;  %v2833_v43 = vld [vmem:[%s3492_s7 + $0x88] sm:$0xff]  }
 0x682   : > { %968 = vmax.xlane.f32.xlu1 %v967_v45  ;;  %v2395_v44 = vld [vmem:[%s3491_s6 + $0x2] ss:$0 sm:$0xff] }
 0x70f   : > { %v969_v46 = vpop.xlane.xlu1 %968 }
 0x710   : > { %v970_v47 = vsub.f32 %v962_v41, %v969_v46 }
 0x712   : > { %v971_v48 = vmul.f32 1.442695, %v970_v47 }
 0x714   : > { %2856 = vpow2.f32 %v971_v48 }
 0x71e   : > { %v2857_v49 = vpop.eup %2856 }
 0x71f   : > { %v973_v50 = vsel %vm660_vm4, %v2857_v49, 0.0 }
 0x720   : > { %974 = vadd.xlane.f32.xlu1 %v973_v50 }
 0x7ad   : > { %v975_v52 = vpop.xlane.xlu1 %974 }
 0x7ae   : > { %2858 = vrcp.f32 %v975_v52 }
 0x7b8   : > { %v2859_v53 = vpop.eup %2858 }
 0x7b9   : > { %v977_v54 = vmul.f32 %v2859_v53, %v2857_v49 }
 0x7bb   : > { %v978_v57 = vpack.c.bf16 %v977_v54, %v977_v54 }
 0x7bd   : > { %2640 = vmatmul.mubr.msk.bf16.vlgmr.msra.gmra.mrb[16].mxu1 %vm660_vm4, %v978_v57 }
 0x7be   : > { %2650 = vmatpush3.bf16.msra.mxu1 %v2826_v55  ;;  %2651 = vmatprep.mubr.msk.bf16.mxu1 %vm2942_vm0, %v2941_v2 }
 0x7bf   : > { %2663 = vmatprep.subr.bf16.mxu1 %v2941_v2 }
 0x7c5   : > { %2652 = vmatmul.mubr.msk.bf16.vlgmr.msra.gmra.mrb[20].mxu1 %vm613_vm2, %v720_v58 }
 0x7c6   : > { %2667 = vmatprep.mubr.msk.bf16.mxu1 %vm2942_vm0, %v2941_v2  ;;  %2664 = vmatpush3.bf16.msra.mxu1 %v2830_v32 }
 0x7c7   : > { %2665 = vmatprep.subr.bf16.mxu1 %v2941_v2 }
 0x7ca   : > { %2666 = vmatpush3.bf16.msra.mxu1 %v2831_v34 }
 0x7cb   : > { %2679 = vmatprep.subr.bf16.mxu1 %v2941_v2 }
 0x890   : > { %v1019_v59 = vpop.f32.mrb[16].mxu1 }
 0x891   : > { %v1025_v60 = vpack.c.bf16 %v1019_v59, %v1019_v59  ;;  %v2641_v61 = vpop.f32.mrb[17].mxu1 }
 0x892   : > { %v1022_v62 = vpop.f32.mrb[18].mxu1  ;;  %v2835_v61 = vld [vmem:[%s3492_s7 + $0x68] sm:$0xff]  }
 0x893   : > { %v2642_v63 = vpop.f32.mrb[19].mxu1  ;;  %2646 = vmatmul.mubr.msk.bf16.vlgmr.msra.gmra.mrb[20].mxu0 %vm613_vm2, %v1025_v60  ;;  %v2834_v60 = vld [vmem:[%s3492_s7 + $0x60] sm:$0xff]   ;;  %v2417_v62 = vld [vmem:[%s3490_s5 + $0x8] ss:$0 sm:$0xff] }
 0x894   : > { %2659 = vmatprep.mubr.msk.bf16.mxu0 %vm2942_vm0, %v2941_v2  ;;  %2656 = vmatpush3.bf16.msra.mxu0 %v2828_v21  ;;  %v2408_v21 = vld [vmem:[%s3490_s5 + $0x6] ss:$0 sm:$0xff] }
 0x895   : > { %2657 = vmatprep.subr.bf16.mxu0 %v2941_v2 }
 0x898   : > { %v1121_v0 = vpop.f32.mrb[20].mxu1 }
 0x899   : > { %v2653_v1 = vpop.f32.mrb[21].mxu1 }
 0x89a   : > { %v1124_v3 = vpop.f32.mrb[22].mxu1 }
 0x89b   : > { %v2654_v4 = vpop.f32.mrb[23].mxu1 }
 0x966   : > { %v1072_v5 = vpop.f32.mrb[20].mxu0 }
 0x967   : > { %v1122_v8 = vadd.f32 %v1121_v0, %v1072_v5  ;;  %v2647_v10 = vpop.f32.mrb[21].mxu0 }
 0x968   : > { %v1075_v11 = vpop.f32.mrb[22].mxu0 }
 0x969   : > { %v1132_v12 = vadd.f32 %v2384_v7, %v1122_v8  ;;  %v2648_v13 = vpop.f32.mrb[23].mxu0 }
 0x96a   : > { %v2401_v13 = vld [vmem:[%s3489_s4 + $0x4] ss:$0 sm:$0xff] }
 0x96b   : > { %v1133_v14 = vadd.f32 %v1132_v12, %v3099_v33  ;;  %v2829_v33 = vld [vmem:[%s3494_s9 + $0x8] sm:$0xff]  }
 0x96c   : > { %2658 = vmatpush3.bf16.msra.mxu0 %v2829_v33 }
 0x96d   : > { %v1136_v15 = vsel %vm384_vm1, %v1133_v14, 0.0  ;;  %2671 = vmatprep.subr.bf16.mxu0 %v2941_v2 }
 0x96e   : > { %1137 = vadd.xlane.f32.xlu1 %v1136_v15  ;;  %v2402_v15 = vld [vmem:[%s3489_s4 + $0x5] ss:$0 sm:$0xff] }
 0x9fb   : > { %v1138_v16 = vpop.xlane.xlu1 %1137 }
 0x9fc   : > { %v1139_v17 = vmul.f32 0.03125, %v1138_v16 }
 0x9fe   : > { %v1140_v18 = vsub.f32 %v1133_v14, %v1139_v17 }
 0xa00   : > { %v1141_v19 = vmul.f32 %v1140_v18, %v1140_v18 }
 0xa02   : > { %v1142_v20 = vsel %vm384_vm1, %v1141_v19, 0.0 }
 0xa03   : > { %1143 = vadd.xlane.f32.xlu1 %v1142_v20  ;;  %v2837_v20 = vld [vmem:[%s3492_s7 + $0xa8] sm:$0xff]  }
 0xa90   : > { %v1144_v22 = vpop.xlane.xlu1 %1143 }
 0xa91   : > { %v1145_v23 = vmul.f32 0.03125, %v1144_v22 }
 0xa93   : > { %v1146_v24 = vadd.f32 1e-08, %v1145_v23 }
 0xa95   : > { %2860 = vrsqrt.f32 %v1146_v24 }
 0xa9f   : > { %v2861_v25 = vpop.eup %2860 }
 0xaa0   : > { %v1148_v27 = vmul.f32 %v2861_v25, %v1140_v18  ;;  %v2836_v18 = vld [vmem:[%s3492_s7 + $0xa0] sm:$0xff]   ;;  %v2838_v25 = vld [vmem:[%s3492_s7 + $0x70] sm:$0xff]  }
 0xaa2   : > { %v1153_v29 = vmul.f32 %v2385_v26, %v1148_v27 }
 0xaa4   : > { %v1158_v30 = vadd.f32 %v2386_v28, %v1153_v29  ;;  %v2426_v28 = vld [vmem:[%s3490_s5 + $0xa] ss:$0 sm:$0xff]  ;;  %v2839_v29 = vld [vmem:[%s3492_s7 + $0x78] sm:$0xff]  }
 0xaa6   : > { %v1159_v31 = vpack.c.bf16 %v1158_v30, %v1158_v30 }
 0xaa8   : > { %2660 = vmatmul.mubr.msk.bf16.vlgmr.msra.gmra.mrb[24].mxu0 %vm384_vm1, %v1159_v31 }
 0xaa9   : > { %2675 = vmatprep.mubr.msk.bf16.mxu0 %vm2942_vm0, %v2941_v2  ;;  %2672 = vmatpush3.bf16.msra.mxu0 %v2834_v60 }
 0xaaa   : > { %2673 = vmatprep.subr.bf16.mxu0 %v2941_v2 }
 0xaad   : > { %2674 = vmatpush3.bf16.msra.mxu0 %v2835_v61 }
 0xaae   : > { %2687 = vmatprep.subr.bf16.mxu0 %v2941_v2 }
 0xb7b   : > { %v1218_v36 = vpop.f32.mrb[24].mxu0 }
 0xb7c   : > { %v1219_v9 = vadd.f32 %v2387_v35, %v1218_v36  ;;  %v2661_v37 = vpop.f32.mrb[25].mxu0  ;;  %v2840_v35 = vld [vmem:[%s3492_s7 + $0xb0] sm:$0xff]  }
 0xb7d   : > { %v1221_v38 = vpop.f32.mrb[26].mxu0 }
 0xb7e   : > { %v1224_v39 = vmax.f32 %v1219_v9, 0.0  ;;  %v2662_v40 = vpop.f32.mrb[27].mxu0  ;;  %v2841_v38 = vld [vmem:[%s3492_s7 + $0xb8] sm:$0xff]  }
 0xb80   : > { %v1225_v41 = vpack.c.bf16 %v1224_v39, %v1224_v39 }
 0xb82   : > { %2668 = vmatmul.mubr.msk.bf16.vlgmr.msra.gmra.mrb[24].mxu1 %vm384_vm1, %v1225_v41 }
 0xb83   : > { %2683 = vmatprep.mubr.msk.bf16.mxu1 %vm2942_vm0, %v2941_v2  ;;  %2680 = vmatpush3.bf16.msra.mxu1 %v2832_v42 }
 0xb84   : > { %2681 = vmatprep.subr.bf16.mxu1 %v2941_v2 }
 0xb87   : > { %2682 = vmatpush3.bf16.msra.mxu1 %v2833_v43 }
 0xb88   : > { %2695 = vmatprep.subr.bf16.mxu1 %v2941_v2 }
 0xc55   : > { %v1285_v45 = vpop.f32.mrb[24].mxu1 }
 0xc56   : > { %v1286_v46 = vadd.f32 %v2395_v44, %v1285_v45  ;;  %v2669_v47 = vpop.f32.mrb[25].mxu1 }
 0xc57   : > { %v1288_v48 = vpop.f32.mrb[26].mxu1 }
 0xc58   : > { %v1291_v49 = vadd.f32 %v1286_v46, %v1158_v30  ;;  %v2670_v50 = vpop.f32.mrb[27].mxu1 }
 0xc5a   : > { %v1292_v51 = vmul.f32 %v1291_v49, %v3069_v6  ;;  %v2457_v49 = vld [vmem:[%s3490_s5 + $0xb] ss:$0 sm:$0xff] }
 0xc5c   : > { %v3260_v52 = vpack.c.bf16 %v1292_v51, %v1292_v51  ;;  %v1296_v53 = vsel %vm384_vm1, %v1292_v51, 0.0 }
 0xc5d   : > { %1297 = vadd.xlane.f32.xlu1 %v1296_v53 }
 0xc5e   : > { %2684 = vmatmul.mubr.msk.bf16.vlgmr.msra.gmra.mrb[28].mxu1 %vm384_vm1, %v3260_v52 }
 0xc5f   : > { %2697 = vmatprep.mubr.msk.bf16.mxu1 %vm2942_vm0, %v2941_v2 }
 0xcea   : > { %v1298_v54 = vpop.xlane.xlu1 %1297 }
 0xceb   : > { %v1299_v55 = vmul.f32 0.03125, %v1298_v54 }
 0xced   : > { %v1300_v57 = vsub.f32 %v1292_v51, %v1299_v55 }
 0xcef   : > { %v1301_v58 = vmul.f32 %v1300_v57, %v1300_v57 }
 0xcf1   : > { %v1302_v59 = vsel %vm384_vm1, %v1301_v58, 0.0 }
 0xcf2   : > { %1303 = vadd.xlane.f32.xlu1 %v1302_v59 }
 0xd31   : > { %v1451_v63 = vpop.f32.mrb[28].mxu1 }
 0xd32   : > { %v1452_v0 = vadd.f32 %v2417_v62, %v1451_v63  ;;  %v2685_v1 = vpop.f32.mrb[29].mxu1 }
 0xd33   : > { %v1454_v3 = vpop.f32.mrb[30].mxu1 }
 0xd34   : > { %v1523_v4 = vpack.c.bf16 %v1452_v0, %v1452_v0  ;;  %v2686_v5 = vpop.f32.mrb[31].mxu1 }
 0xd36   : > { %v1529_v7 = vsel %vm613_vm2, %v1523_v4, 0  ;;  %v2842_v4 = vld [vmem:[%s3492_s7 + $0x90] sm:$0xff]  }
 0xd37   : > { %2696 = vmatpush3.bf16.xpose.msra.mxu1 %v1529_v7  ;;  %v2843_v7 = vld [vmem:[%s3492_s7 + $0x98] sm:$0xff]  }
 0xd38   : > { %2707 = vmatprep.subr.bf16.mxu1 %v2941_v2 }
 0xd7f   : > { %v1304_v8 = vpop.xlane.xlu1 %1303 }
 0xd80   : > { %v1305_v10 = vmul.f32 0.03125, %v1304_v8 }
 0xd82   : > { %v1306_v11 = vadd.f32 1e-08, %v1305_v10 }
 0xd84   : > { %2862 = vrsqrt.f32 %v1306_v11 }
 0xd8e   : > { %v2863_v12 = vpop.eup %2862 }
 0xd8f   : > { %v1308_v14 = vmul.f32 %v2863_v12, %v1300_v57 }
 0xd91   : > { %v1313_v16 = vmul.f32 %v2401_v13, %v1308_v14  ;;  %v2448_v13 = vld [vmem:[%s3490_s5 + $0x9] ss:$0 sm:$0xff] }
 0xd93   : > { %v3287_v17 = vadd.f32 %v2402_v15, %v1313_v16 }
 0xd95   : > { %v1319_v19 = vpack.c.bf16 %v3287_v17, %v3287_v17 }
 0xd97   : > { %2676 = vmatmul.mubr.msk.bf16.vlgmr.msra.gmra.mrb[28].mxu0 %vm384_vm1, %v1319_v19 }
 0xd98   : > { %2688 = vmatpush3.bf16.msra.mxu0 %v2836_v18  ;;  %2691 = vmatprep.mubr.msk.bf16.mxu0 %vm2942_vm0, %v2941_v2 }
 0xd99   : > { %2689 = vmatprep.subr.bf16.mxu0 %v2941_v2 }
 0xd9c   : > { %2690 = vmatpush3.bf16.msra.mxu0 %v2837_v20 }
 0xd9d   : > { %2701 = vmatprep.subr.bf16.mxu0 %v2941_v2 }
 0xd9f   : > { %2692 = vmatmul.mubr.msk.bf16.vlgmr.msra.gmra.mrb[32].mxu0 %vm384_vm1, %v3260_v52 }
 0xda0   : > { %2703 = vmatprep.mubr.msk.bf16.mxu0 %vm2942_vm0, %v2941_v2 }
 0xe6a   : > { %v1383_v33 = vpop.f32.mrb[28].mxu0 }
 0xe6b   : > { %v1384_v22 = vadd.f32 %v2408_v21, %v1383_v33  ;;  %v2677_v23 = vpop.f32.mrb[29].mxu0 }
 0xe6c   : > { %v1386_v24 = vpop.f32.mrb[30].mxu0 }
 0xe6d   : > { %v1522_v26 = vpack.c.bf16 %v1384_v22, %v1384_v22  ;;  %v2678_v27 = vpop.f32.mrb[31].mxu0 }
 0xe6f   : > { %2698 = vmatmul.mubr.msk.bf16.vlgmr.msra.gmra.mrb[32].mxu1 %vm613_vm2, %v1522_v26 }
 0xe70   : > { %2708 = vmatpush3.bf16.msra.mxu1 %v2838_v25  ;;  %2711 = vmatprep.mubr.msk.bf16.mxu1 %vm2942_vm0, %v2941_v2 }
 0xe71   : > { %2709 = vmatprep.subr.bf16.mxu1 %v2941_v2 }
 0xe72   : > { %v1516_v30 = vpop.f32.mrb[32].mxu0 }
 0xe73   : > { %v1517_v31 = vadd.f32 %v2426_v28, %v1516_v30  ;;  %v2693_v32 = vpop.f32.mrb[33].mxu0 }
 0xe74   : > { %v1519_v34 = vpop.f32.mrb[34].mxu0  ;;  %2710 = vmatpush3.bf16.msra.mxu1 %v2839_v29 }
 0xe75   : > { %v1524_v36 = vpack.c.bf16 %v1517_v31, %v1517_v31  ;;  %v2694_v9 = vpop.f32.mrb[35].mxu0  ;;  %2723 = vmatprep.subr.bf16.mxu1 %v2941_v2 }
 0xe77   : > { %v1587_v37 = vsel %vm676_vm3, %v1524_v36, 0  ;;  %2712 = vmatmul.mubr.msk.bf16.vlgmr.msra.gmra.mrb[36].mxu1 %vm384_vm1, %v1319_v19 }
 0xe78   : > { %2702 = vmatpush3.bf16.msra.mxu0 %v1587_v37  ;;  %2724 = vmatpush3.bf16.msra.mxu1 %v2840_v35  ;;  %v2845_v35 = vld [vmem:[%s3493_s8 + $0x18] sm:$0xff]   ;;  %v2844_v37 = vld [vmem:[%s3493_s8 + $0x10] sm:$0xff]  }
 0xe79   : > { %2725 = vmatprep.subr.bf16.mxu1 %v2941_v2  ;;  %2727 = vmatprep.mubr.msk.bf16.mxu1 %vm2942_vm0, %v2941_v2 }
 0xe7a   : > { %2715 = vmatprep.subr.bf16.mxu0 %v2941_v2 }
 0xe7c   : > { %2726 = vmatpush3.bf16.msra.mxu1 %v2841_v38 }
 0xe7d   : > { %2737 = vmatprep.subr.bf16.mxu1 %v2941_v2 }
 0xe7f   : > { %2728 = vmatmul.mubr.msk.bf16.vlgmr.msra.gmra.mrb[40].mxu1 %vm384_vm1, %v3260_v52 }
 0xe80   : > { %2739 = vmatprep.mubr.msk.bf16.mxu1 %vm2942_vm0, %v2941_v2 }
 0xf42   : > { %v1565_v39 = vpop.f32.mrb[32].mxu1 }
 0xf43   : > { %v1566_v40 = vadd.f32 %v1565_v39, %v3155_v56  ;;  %v2699_v41 = vpop.f32.mrb[33].mxu1 }
 0xf44   : > { %v1568_v42 = vpop.f32.mrb[34].mxu1 }
 0xf45   : > { %v2700_v43 = vpop.f32.mrb[35].mxu1  ;;  %v1571_v44 = vsel %vm660_vm4, %v1566_v40, -inf }
 0xf46   : > { %1572 = vmax.xlane.f32.xlu0 %v1571_v44 }
 0xf4a   : > { %v1692_v45 = vpop.f32.mrb[36].mxu1 }
 0xf4b   : > { %v2713_v46 = vpop.f32.mrb[37].mxu1 }
 0xf4c   : > { %v1695_v47 = vpop.f32.mrb[38].mxu1 }
 0xf4d   : > { %v2714_v48 = vpop.f32.mrb[39].mxu1 }
 0xf52   : > { %v1822_v50 = vpop.f32.mrb[40].mxu1 }
 0xf53   : > { %v1823_v51 = vadd.f32 %v2457_v49, %v1822_v50  ;;  %v2729_v53 = vpop.f32.mrb[41].mxu1  ;;  %v2470_v50 = vld [vmem:[%s3491_s6 + $0x4] ss:$0 sm:$0xff] }
 0xf54   : > { %v1825_v54 = vpop.f32.mrb[42].mxu1 }
 0xf55   : > { %v1830_v55 = vpack.c.bf16 %v1823_v51, %v1823_v51  ;;  %v2730_v57 = vpop.f32.mrb[43].mxu1 }
 0xf57   : > { %v1893_v58 = vsel %vm676_vm3, %v1830_v55, 0 }
 0xf58   : > { %2738 = vmatpush3.bf16.msra.mxu1 %v1893_v58 }
 0xf59   : > { %2749 = vmatprep.subr.bf16.mxu1 %v2941_v2 }
 0xfd3   : > { %v1573_v59 = vpop.xlane.xlu0 %1572 }
 0xfd4   : > { %v1574_v60 = vsub.f32 %v1566_v40, %v1573_v59 }
 0xfd6   : > { %v1575_v61 = vmul.f32 1.442695, %v1574_v60 }
 0xfd8   : > { %2864 = vpow2.f32 %v1575_v61 }
 0xfe2   : > { %v2865_v62 = vpop.eup %2864 }
 0xfe3   : > { %v1577_v63 = vsel %vm660_vm4, %v2865_v62, 0.0 }
 0xfe4   : > { %1578 = vadd.xlane.f32.xlu1 %v1577_v63 }
0x1071   : > { %v1579_v0 = vpop.xlane.xlu1 %1578 }
0x1072   : > { %2866 = vrcp.f32 %v1579_v0 }
0x107c   : > { %v2867_v1 = vpop.eup %2866 }
0x107d   : > { %v1581_v3 = vmul.f32 %v2867_v1, %v2865_v62  ;;  %v2846_v1 = vld [vmem:[%s3494_s9 + $0x20] sm:$0xff]  }
0x107f   : > { %v1582_v5 = vpack.c.bf16 %v1581_v3, %v1581_v3 }
0x1081   : > { %2704 = vmatmul.mubr.msk.bf16.vlgmr.msra.gmra.mrb[36].mxu0 %vm660_vm4, %v1582_v5 }
0x1082   : > { %2716 = vmatpush3.bf16.msra.mxu0 %v2842_v4  ;;  %2719 = vmatprep.mubr.msk.bf16.mxu0 %vm2942_vm0, %v2941_v2 }
0x1083   : > { %2717 = vmatprep.subr.bf16.mxu0 %v2941_v2 }
0x1086   : > { %2718 = vmatpush3.bf16.msra.mxu0 %v2843_v7 }
0x1087   : > { %2731 = vmatprep.subr.bf16.mxu0 %v2941_v2 }
0x1089   : > { %2720 = vmatmul.mubr.msk.bf16.vlgmr.msra.gmra.mrb[40].mxu0 %vm384_vm1, %v3260_v52  ;;  %v2439_v52 = vld [vmem:[%s3490_s5 + $0x7] ss:$0 sm:$0xff] }
0x108a   : > { %2733 = vmatprep.mubr.msk.bf16.mxu0 %vm2942_vm0, %v2941_v2  ;;  %v1693_v33 = vadd.f32 %v2439_v52, %v1692_v45 }
0x108c   : > { %v1828_v22 = vpack.c.bf16 %v1693_v33, %v1693_v33 }
0x1154   : > { %v1623_v8 = vpop.f32.mrb[36].mxu0 }
0x1155   : > { %v2705_v10 = vpop.f32.mrb[37].mxu0  ;;  %v1629_v39 = vpack.c.bf16 %v1623_v8, %v1623_v8  ;;  %v2473_v8 = vld [vmem:[%s3489_s4 + $0x6] ss:$0 sm:$0xff] }
0x1156   : > { %v1626_v11 = vpop.f32.mrb[38].mxu0 }
0x1157   : > { %v2706_v12 = vpop.f32.mrb[39].mxu0  ;;  %v2474_v11 = vld [vmem:[%s3489_s4 + $0x7] ss:$0 sm:$0xff] }
0x115c   : > { %v1757_v14 = vpop.f32.mrb[40].mxu0 }
0x115d   : > { %v1758_v15 = vadd.f32 %v2448_v13, %v1757_v14  ;;  %v2721_v16 = vpop.f32.mrb[41].mxu0 }
0x115e   : > { %v1760_v18 = vpop.f32.mrb[42].mxu0  ;;  %v2849_v16 = vld [vmem:[%s3494_s9 + $0x38] sm:$0xff]  }
0x115f   : > { %v1829_v19 = vpack.c.bf16 %v1758_v15, %v1758_v15  ;;  %v2722_v20 = vpop.f32.mrb[43].mxu0  ;;  %v2848_v15 = vld [vmem:[%s3494_s9 + $0x30] sm:$0xff]   ;;  %v2480_v18 = vld [vmem:[%s3491_s6 + $0x5] ss:$0 sm:$0xff] }
0x1161   : > { %v1835_v21 = vsel %vm613_vm2, %v1829_v19, 0 }
0x1162   : > { %2732 = vmatpush3.bf16.xpose.msra.mxu0 %v1835_v21 }
0x1163   : > { %2743 = vmatprep.subr.bf16.mxu0 %v2941_v2 }
0x1169   : > { %2734 = vmatmul.mubr.msk.bf16.vlgmr.msra.gmra.mrb[44].mxu0 %vm613_vm2, %v1828_v22 }
0x116a   : > { %2745 = vmatprep.mubr.msk.bf16.mxu0 %vm2942_vm0, %v2941_v2  ;;  %2744 = vmatpush3.bf16.msra.mxu0 %v2845_v35 }
0x116b   : > { %2755 = vmatprep.subr.bf16.mxu0 %v2941_v2 }
0x123c   : > { %v1871_v23 = vpop.f32.mrb[44].mxu0 }
0x123d   : > { %v1872_v24 = vadd.f32 %v1871_v23, %v3155_v56  ;;  %v2735_v25 = vpop.f32.mrb[45].mxu0 }
0x123e   : > { %v1874_v26 = vpop.f32.mrb[46].mxu0 }
0x123f   : > { %v2736_v27 = vpop.f32.mrb[47].mxu0  ;;  %v1877_v28 = vsel %vm660_vm4, %v1872_v24, -inf }
0x1240   : > { %1878 = vmax.xlane.f32.xlu0 %v1877_v28 }
0x12cd   : > { %v1879_v29 = vpop.xlane.xlu0 %1878 }
0x12ce   : > { %v1880_v30 = vsub.f32 %v1872_v24, %v1879_v29 }
0x12d0   : > { %v1881_v31 = vmul.f32 1.442695, %v1880_v30 }
0x12d2   : > { %2868 = vpow2.f32 %v1881_v31 }
0x12dc   : > { %v2869_v32 = vpop.eup %2868 }
0x12dd   : > { %v1883_v34 = vsel %vm660_vm4, %v2869_v32, 0.0 }
0x12de   : > { %1884 = vadd.xlane.f32.xlu1 %v1883_v34 }
0x136b   : > { %v1885_v56 = vpop.xlane.xlu1 %1884 }
0x136c   : > { %2870 = vrcp.f32 %v1885_v56 }
0x1376   : > { %v2871_v36 = vpop.eup %2870 }
0x1377   : > { %v1887_v9 = vmul.f32 %v2871_v36, %v2869_v32 }
0x1379   : > { %v1888_v38 = vpack.c.bf16 %v1887_v9, %v1887_v9 }
0x137b   : > { %2740 = vmatmul.mubr.msk.bf16.vlgmr.msra.gmra.mrb[44].mxu1 %vm660_vm4, %v1888_v38 }
0x137c   : > { %2750 = vmatpush3.bf16.msra.mxu1 %v2844_v37  ;;  %2751 = vmatprep.mubr.msk.bf16.mxu1 %vm2942_vm0, %v2941_v2 }
0x137d   : > { %2763 = vmatprep.subr.bf16.mxu1 %v2941_v2 }
0x1383   : > { %2752 = vmatmul.mubr.msk.bf16.vlgmr.msra.gmra.mrb[48].mxu1 %vm613_vm2, %v1629_v39 }
0x1384   : > { %2767 = vmatprep.mubr.msk.bf16.mxu1 %vm2942_vm0, %v2941_v2  ;;  %2764 = vmatpush3.bf16.msra.mxu1 %v2848_v15 }
0x1385   : > { %2765 = vmatprep.subr.bf16.mxu1 %v2941_v2 }
0x1388   : > { %2766 = vmatpush3.bf16.msra.mxu1 %v2849_v16 }
0x144e   : > { %v1929_v40 = vpop.f32.mrb[44].mxu1 }
0x144f   : > { %v1935_v41 = vpack.c.bf16 %v1929_v40, %v1929_v40  ;;  %v2741_v42 = vpop.f32.mrb[45].mxu1 }
0x1450   : > { %v1932_v43 = vpop.f32.mrb[46].mxu1 }
0x1451   : > { %v2742_v44 = vpop.f32.mrb[47].mxu1  ;;  %2746 = vmatmul.mubr.msk.bf16.vlgmr.msra.gmra.mrb[48].mxu0 %vm613_vm2, %v1935_v41  ;;  %v2494_v41 = vld [vmem:[%s3488_s3 + $0x1] ss:$0 sm:$0xff] }
0x1452   : > { %2759 = vmatprep.mubr.msk.bf16.mxu0 %vm2942_vm0, %v2941_v2  ;;  %2756 = vmatpush3.bf16.msra.mxu0 %v2846_v1 }
0x1453   : > { %2757 = vmatprep.subr.bf16.mxu0 %v2941_v2  ;;  %v2489_v2 = vld [vmem:[%s3491_s6 + $0x6] ss:$0 sm:$0xff] }
0x1456   : > { %v2031_v45 = vpop.f32.mrb[48].mxu1 }
0x1457   : > { %v2753_v46 = vpop.f32.mrb[49].mxu1 }
0x1458   : > { %v2034_v47 = vpop.f32.mrb[50].mxu1 }
0x1459   : > { %v2754_v48 = vpop.f32.mrb[51].mxu1 }
0x1524   : > { %v1982_v49 = vpop.f32.mrb[48].mxu0 }
0x1525   : > { %v2032_v51 = vadd.f32 %v2031_v45, %v1982_v49  ;;  %v2747_v53 = vpop.f32.mrb[49].mxu0 }
0x1526   : > { %v1985_v54 = vpop.f32.mrb[50].mxu0 }
0x1527   : > { %v2043_v55 = vadd.f32 %v2470_v50, %v2032_v51  ;;  %v2748_v57 = vpop.f32.mrb[51].mxu0 }
0x1529   : > { %v2044_v58 = vadd.f32 %v2043_v55, %v3287_v17  ;;  %v2847_v17 = vld [vmem:[%s3494_s9 + $0x28] sm:$0xff]  }
0x152a   : > { %2758 = vmatpush3.bf16.msra.mxu0 %v2847_v17 }
0x152b   : > { %v2047_v59 = vsel %vm384_vm1, %v2044_v58, 0.0 }
0x152c   : > { %2048 = vadd.xlane.f32.xlu0 %v2047_v59 }
0x15b9   : > { %v2049_v60 = vpop.xlane.xlu0 %2048 }
0x15ba   : > { %v2050_v61 = vmul.f32 0.03125, %v2049_v60 }
0x15bc   : > { %v2051_v62 = vsub.f32 %v2044_v58, %v2050_v61 }
0x15be   : > { %v2052_v63 = vmul.f32 %v2051_v62, %v2051_v62 }
0x15c0   : > { %v2053_v0 = vsel %vm384_vm1, %v2052_v63, 0.0 }
0x15c1   : > { %2054 = vadd.xlane.f32.xlu1 %v2053_v0 }
0x164e   : > { %v2055_v3 = vpop.xlane.xlu1 %2054 }
0x164f   : > { %v2056_v4 = vmul.f32 0.03125, %v2055_v3 }
0x1651   : > { %v2057_v5 = vadd.f32 1e-08, %v2056_v4 }
0x1653   : > { %2872 = vrsqrt.f32 %v2057_v5 }
0x165d   : > { %v2873_v7 = vpop.eup %2872 }
0x165e   : > { %v2059_v10 = vmul.f32 %v2873_v7, %v2051_v62 }
0x1660   : > { %v2064_v12 = vmul.f32 %v2473_v8, %v2059_v10 }
0x1662   : > { %v2069_v13 = vadd.f32 %v2474_v11, %v2064_v12 }
0x1664   : > { %v2070_v14 = vpack.c.bf16 %v2069_v13, %v2069_v13 }
0x1666   : > { %2760 = vmatmul.mubr.msk.bf16.vlgmr.msra.gmra.mrb[52].mxu0 %vm384_vm1, %v2070_v14 }
0x1739   : > { %v2130_v19 = vpop.f32.mrb[52].mxu0 }
0x173a   : > { %v2131_v20 = vadd.f32 %v2480_v18, %v2130_v19  ;;  %v2761_v52 = vpop.f32.mrb[53].mxu0 }
0x173b   : > { %v2133_v21 = vpop.f32.mrb[54].mxu0 }
0x173c   : > { %v2136_v33 = vmax.f32 %v2131_v20, 0.0  ;;  %v2762_v22 = vpop.f32.mrb[55].mxu0 }
0x173e   : > { %v2137_v23 = vpack.c.bf16 %v2136_v33, %v2136_v33 }
0x1740   : > { %2768 = vmatmul.mubr.msk.bf16.vlgmr.msra.gmra.mrb[52].mxu1 %vm384_vm1, %v2137_v23 }
0x1813   : > { %v2197_v24 = vpop.f32.mrb[52].mxu1 }
0x1814   : > { %v2198_v25 = vadd.f32 %v2489_v2, %v2197_v24  ;;  %v2769_v26 = vpop.f32.mrb[53].mxu1 }
0x1815   : > { %v2200_v27 = vpop.f32.mrb[54].mxu1 }
0x1816   : > { %v2203_v28 = vadd.f32 %v2198_v25, %v2069_v13  ;;  %v2770_v29 = vpop.f32.mrb[55].mxu1 }
0x1818   : > { %v2204_v30 = vmul.f32 %v2203_v28, %v3069_v6  ;;  %v2493_v6 = vld [vmem:[%s3488_s3] ss:$0 sm:$0xff] }
0x181a   : > { %v2207_v31 = vsel %vm384_vm1, %v2204_v30, 0.0 }
0x181b   : > { %2208 = vadd.xlane.f32.xlu0 %v2207_v31 }
0x18a8   : > { %v2209_v32 = vpop.xlane.xlu0 %2208 }
0x18a9   : > { %v2210_v34 = vmul.f32 0.03125, %v2209_v32 }
0x18ab   : > { %v2211_v35 = vsub.f32 %v2204_v30, %v2210_v34 }
0x18ad   : > { %v2212_v56 = vmul.f32 %v2211_v35, %v2211_v35 }
0x18af   : > { %v2213_v36 = vsel %vm384_vm1, %v2212_v56, 0.0 }
0x18b0   : > { %2214 = vadd.xlane.f32.xlu1 %v2213_v36 }
0x193d   : > { %v2215_v9 = vpop.xlane.xlu1 %2214 }
0x193e   : > { %v2216_v37 = vmul.f32 0.03125, %v2215_v9 }
0x1940   : > { %v2217_v38 = vadd.f32 1e-08, %v2216_v37 }
0x1942   : > { %2874 = vrsqrt.f32 %v2217_v38 }
0x194c   : > { %v2875_v39 = vpop.eup %2874 }
0x194d   : > { %v2219_v40 = vmul.f32 %v2875_v39, %v2211_v35 }
0x194f   : > { %v2224_v42 = vmul.f32 %v2493_v6, %v2219_v40 }
0x1951   : > { %v2229_v43 = vadd.f32 %v2494_v41, %v2224_v42 }
0x1953   : > { %2230 = vst.msk [vmem:[%s363_s20] sm:$0xff] %vm384_vm1, %v2229_v43 }
0x1954   : > { %2889 = shalt.err (!%p2886_p3)
}
0x1955   : > { %s2890_s27 = scalar_lea.hbm %s3442_s0, 128  ;;  %s2894_s20 = scalar_lea.hbm %s3495_s10, 256 }
0x1956   : > { %p2891_p4 = scmp.ne.s32.totalorder %s3442_s0, %s2890_s27  ;;  %p2895_p9 = scmp.lt.u32.totalorder %s3442_s0, %s3495_s10 }
0x1957   : > { %p2896_p10 = scmp.lt.u32.totalorder %s2894_s20, %s2890_s27  ;;  %p2898_p12 = scmp.lt.u32.totalorder %s2890_s27, %s3442_s0 }
0x1958   : > { %p2892_p7 = pnand %p2891_p4, %p3037_p5 }
0x1959   : > { %p2897_p11 = por %p2896_p10, %p2895_p9 }
0x195a   : > { %p2893_p8 = pneg %p2892_p7 }
0x195b   : > { %p2899_p13 = por %p2898_p12, %p2897_p11 }
0x195d   : > { %p2900_p0 = pnand %p2899_p13, %p2893_p8 }
0x195f   : > { %2903 = shalt.err (!%p2900_p0)
}
0x1960   : > { %2771 = dma.vmem_to_hbm [thread:$0]  (%p3037_p5), %s3444_s21, 128, %s3442_s0, %s2232_s29  }
0x1961 PF: > { %p2777_p1 = scmp.ge.s32.totalorder %s2938_s16, 2  ;;  %s2257_s30 = sand.u32 1, %s2926_s13  }
0x1962   : > { %s2258_s17 = scalar_lea.sflag [#allocation3], %s2257_s30 }
0x1963   : > { %p2774_p2 = pnand %p2777_p1, %p3041_p6 }
0x1965   : > { %2921 = dma.done.wait (!%p2774_p2), %s2258_s17, 128  }
0x1966   : > { %2923 = vsyncadd (!%p2774_p2), %s2258_s17, 4294967168  ;;  %p20_p3 = scmp.ge.s32.totalorder %s3024_s19, 4   ;;  %s3500_s13 = smov %s2930_s14 }
0x1967   : > { %s3501_s14 = smov %s2934_s15  ;;  %s3502_s15 = smov %s3035_s22 }
0x1968   : > { %s3503_s16 = smov %s3024_s19  ;;  %22 = sbr.rel (!%p20_p3) target bundleno = 5 (0x5), region = 128 }
0x196f   :  { %2263 = vsyncpa [#allocation3], 1 }
0x1970   :  { %2265 = vsyncpa [#allocation3 + $0x1], 1 }

</bundles_post_ra>
